<compile_context>
chip_gen: v7x
topology: tpu7x:2x2x1
jax: 0.10.0
libtpu: 0.0.40
codegen_flags: <defaults>
</compile_context>

<pallas_src>
import functools

import jax
import jax.numpy as jnp
import numpy as np
from jax.experimental import pallas as pl
from jax.experimental.pallas import tpu as pltpu

NEG_SLOPE = 0.01                       # torch.nn.LeakyReLU default
SUBLANE = 8                            # channel padding granule
_TIME_TILE_CANDIDATES = (2048, 1024, 512, 256, 128)


def _round_up(n, m):
    return ((n + m - 1) // m) * m


def _leaky(v):
    return jnp.where(v > 0, v, NEG_SLOPE * v)


def _pick_time_tile(L, min_tile, cp, K, vmem_budget=8 << 20):
    """Largest lane-aligned tile dividing L, >= max receptive field, fitting VMEM."""
    for t in _TIME_TILE_CANDIDATES:
        # Rough per-step VMEM estimate: double-buffered in/out (Cp,T) blocks plus
        # the K-way tap concats and a few live (Cp,T) intermediates.
        est = cp * t * 4 * (2 * 2 + 2 * 2 + 2 * K + 4)
        if L % t == 0 and t >= min_tile and est <= vmem_budget:
            return t
    return L   # ragged / short L: one full-length tile (carry state unused)


# --------------------------------- kernel ---------------------------------- #
def _causal_cnn_kernel(x_ref, w1_ref, b1_ref, w2_ref, b2_ref, wr_ref, br_ref,
                       out_ref, *carry_refs, K, T, dilations, has_res, use_carry):
    """Whole CausalCNN stack on one (channels, time-tile) slab.

    refs:
      x_ref   : (1, Cp, T)          input tile (no halo)
      w1_ref  : (nb, Cp, K*Cp)      conv1 weights, taps fused on contraction dim
      b1_ref  : (nb, Cp, 1)
      w2_ref  : (nb, Cp, K*Cp)      conv2 weights
      b2_ref  : (nb, Cp, 1)
      wr_ref  : (nb, Cp, Cp)        1x1 residual conv (identity rows if unused)
      br_ref  : (nb, Cp, 1)
      out_ref : (1, Cp, T)
      carry_refs (only if use_carry): per block, two (Cp, P_i) VMEM buffers
        holding the last P_i columns of conv1's / conv2's input from the
        previous time tile (== the causal left context).
    """
    lt = pl.program_id(1)
    cp = x_ref.shape[1]
    a = x_ref[0].astype(jnp.float32)                         # (Cp, T)

    for i, d in enumerate(dilations):
        P = (K - 1) * d                                      # causal left padding

        # ---- conv1 + LeakyReLU ------------------------------------------------
        if use_carry:
            c1 = carry_refs[2 * i]
            c2 = carry_refs[2 * i + 1]

            @pl.when(lt == 0)
            def _(c1=c1, c2=c2):                             # zero left-padding
                c1[...] = jnp.zeros_like(c1)
                c2[...] = jnp.zeros_like(c2)

            left1 = c1[...]
        else:
            left1 = jnp.zeros((cp, P), jnp.float32)

        xin = jnp.concatenate([left1, a], axis=1)            # (Cp, P+T)
        if use_carry:
            c1[...] = a[:, T - P:]                           # context for next tile
        xs = jnp.concatenate([xin[:, k * d:k * d + T] for k in range(K)], axis=0)
        h = jnp.dot(w1_ref[i], xs, preferred_element_type=jnp.float32)
        h = _leaky(h + b1_ref[i])                            # (Cp, T)

        # ---- conv2 + LeakyReLU ------------------------------------------------
        if use_carry:
            left2 = c2[...]
        else:
            left2 = jnp.zeros((cp, P), jnp.float32)
        hin = jnp.concatenate([left2, h], axis=1)            # (Cp, P+T)
        if use_carry:
            c2[...] = h[:, T - P:]
        hs = jnp.concatenate([hin[:, k * d:k * d + T] for k in range(K)], axis=0)
        y = jnp.dot(w2_ref[i], hs, preferred_element_type=jnp.float32)
        y = _leaky(y + b2_ref[i])                            # (Cp, T)

        # ---- residual branch ---------------------------------------------------
        if has_res[i]:
            res = jnp.dot(wr_ref[i], a, preferred_element_type=jnp.float32)
            res = res + br_ref[i]
        else:
            res = a
        a = y + res                                          # next block's input

    out_ref[0] = a.astype(out_ref.dtype)


# ------------------------------ host wrappers ------------------------------ #
def _fuse_conv_weight(w_oik, cin_p, cout_p):
    """(Cout, Cin, K) torch layout -> (Cout_p, K*Cin_p); row index = k*Cin_p+cin."""
    cout, cin, K = w_oik.shape
    w = jnp.transpose(w_oik, (0, 2, 1))                      # (Cout, K, Cin)
    w = jnp.pad(w, ((0, cout_p - cout), (0, 0), (0, cin_p - cin)))
    return w.reshape(cout_p, K * cin_p)


def _pad_bias(b, cout_p):
    return jnp.pad(b, (0, cout_p - b.shape[0])).reshape(cout_p, 1)


def causal_cnn_forward(x_ncl, params, out_channels):
    """Full CausalCNN forward.  Input/output in PyTorch NCL (B, C, L) layout."""
    B, cin, L = x_ncl.shape
    nb = len(params)
    K = params[0]["w1"].shape[2]
    assert K >= 2, "kernel_size must be >= 2"

    # One shared channel padding for every layer (max over all layer widths).
    widths = [cin] + [p["w1"].shape[0] for p in params] + [p["w1"].shape[1] for p in params]
    cp = _round_up(max(widths), SUBLANE)

    dilations = tuple(int(p["dilation"]) for p in params)
    pads = tuple((K - 1) * d for d in dilations)
    has_res = tuple(p["wres"] is not None for p in params)

    T = _pick_time_tile(L, max(pads), cp, K)
    n_lt = L // T
    use_carry = n_lt > 1

    # --- pack parameters once (tiny) ---
    W1 = jnp.stack([_fuse_conv_weight(p["w1"], cp, cp) for p in params])
    B1 = jnp.stack([_pad_bias(p["b1"], cp) for p in params])
    W2 = jnp.stack([_fuse_conv_weight(p["w2"], cp, cp) for p in params])
    B2 = jnp.stack([_pad_bias(p["b2"], cp) for p in params])
    WR = jnp.stack([
        jnp.pad(p["wres"], ((0, cp - p["wres"].shape[0]), (0, cp - p["wres"].shape[1])))
        if p["wres"] is not None else jnp.eye(cp, dtype=jnp.float32)
        for p in params])
    BR = jnp.stack([
        _pad_bias(p["bres"], cp) if p["bres"] is not None
        else jnp.zeros((cp, 1), jnp.float32)
        for p in params])

    x_p = jnp.pad(x_ncl, ((0, 0), (0, cp - cin), (0, 0)))    # pad channels once

    in_specs = [
        pl.BlockSpec((1, cp, T), lambda b, lt: (b, 0, lt)),
        pl.BlockSpec((nb, cp, K * cp), lambda b, lt: (0, 0, 0)),
        pl.BlockSpec((nb, cp, 1), lambda b, lt: (0, 0, 0)),
        pl.BlockSpec((nb, cp, K * cp), lambda b, lt: (0, 0, 0)),
        pl.BlockSpec((nb, cp, 1), lambda b, lt: (0, 0, 0)),
        pl.BlockSpec((nb, cp, cp), lambda b, lt: (0, 0, 0)),
        pl.BlockSpec((nb, cp, 1), lambda b, lt: (0, 0, 0)),
    ]
    out_specs = pl.BlockSpec((1, cp, T), lambda b, lt: (b, 0, lt))

    scratch_shapes = []
    if use_carry:
        for P in pads:
            scratch_shapes += [pltpu.VMEM((cp, P), jnp.float32),
                               pltpu.VMEM((cp, P), jnp.float32)]

    kernel = functools.partial(
        _causal_cnn_kernel, K=K, T=T, dilations=dilations,
        has_res=has_res, use_carry=use_carry)

    out = pl.pallas_call(
        kernel,
        out_shape=jax.ShapeDtypeStruct((B, cp, L), x_ncl.dtype),
        grid=(B, n_lt),
        in_specs=in_specs,
        out_specs=out_specs,
        scratch_shapes=scratch_shapes,
        compiler_params=pltpu.CompilerParams(
            # time axis is sequential (carry state); batch axis feeds both
            # TensorCores on v7x when B >= 2.
            dimension_semantics=("parallel", "arbitrary"),
            # per-step footprint is <~2 MiB with the tile picker's 8 MiB budget;
            # 32 MiB cap is safe on v5e/v6e (128 MiB) and v7x (64 MiB physical).
            vmem_limit_bytes=32 * 1024 * 1024),
    )(x_p, W1, B1, W2, B2, WR, BR)

    return out[:, :out_channels, :]                          # strip channel padding


# ---------------------------- parameter creation --------------------------- #
def init_causal_cnn_params(key, in_channels, channels, depth, out_channels,
                           kernel_size):
    """Deterministic synthetic parameters in torch Conv1d layout (Cout, Cin, K).

    weight_norm is folded into the effective weight (pure reparameterization)."""
    params = []
    dilation = 1
    specs = []
    for i in range(depth):
        specs.append((in_channels if i == 0 else channels, channels, dilation))
        dilation *= 2
    specs.append((channels, out_channels, dilation))

    for cin, cout, d in specs:
        key, k1, k2, k3, k4, k5, k6 = jax.random.split(key, 7)
        s1 = 1.0 / np.sqrt(cin * kernel_size)
        s2 = 1.0 / np.sqrt(cout * kernel_size)
        p = {
            "dilation": d,
            "w1": s1 * jax.random.normal(k1, (cout, cin, kernel_size), jnp.float32),
            "b1": s1 * jax.random.normal(k2, (cout,), jnp.float32),
            "w2": s2 * jax.random.normal(k3, (cout, cout, kernel_size), jnp.float32),
            "b2": s2 * jax.random.normal(k4, (cout,), jnp.float32),
        }
        if cin != cout:
            p["wres"] = (1.0 / np.sqrt(cin)) * jax.random.normal(
                k5, (cout, cin), jnp.float32)
            p["bres"] = (1.0 / np.sqrt(cin)) * jax.random.normal(
                k6, (cout,), jnp.float32)
        else:
            p["wres"] = None
            p["bres"] = None
        params.append(p)
    return params


# ----------------------------- pure-JAX reference --------------------------- #
def _ref_conv(x_ncl, w_oik, b, dilation):
    pad = (w_oik.shape[2] - 1) * dilation                    # left-pad + chomp
    y = jax.lax.conv_general_dilated(
        x_ncl, w_oik, window_strides=(1,), padding=[(pad, 0)],
        rhs_dilation=(dilation,), dimension_numbers=("NCH", "OIH", "NCH"),
        precision=jax.lax.Precision.HIGHEST)
    return y + b[None, :, None]


def _ref_forward(x_ncl, params):
    x = x_ncl
    for p in params:
        h = _leaky(_ref_conv(x, p["w1"], p["b1"], p["dilation"]))
        h = _leaky(_ref_conv(h, p["w2"], p["b2"], p["dilation"]))
        if p["wres"] is None:
            res = x
        else:
            res = jnp.einsum("oc,bcl->bol", p["wres"], x,
                             precision=jax.lax.Precision.HIGHEST)
            res = res + p["bres"][None, :, None]
        x = h + res
    return x


# ----------------------------------- main ----------------------------------- #
if __name__ == "__main__":
    # CausalCNN(in_channels=4, channels=8, depth=2, out_channels=6, kernel_size=3)
    B, Cin, L = 2, 4, 4096          # L=4096 -> T=2048, 2 time tiles: exercises carries
    channels, depth, Cout, K = 8, 2, 6, 3

    key = jax.random.PRNGKey(0)
    key, kx = jax.random.split(key)
    x = jax.random.normal(kx, (B, Cin, L), jnp.float32)      # PyTorch NCL input

    params = init_causal_cnn_params(key, Cin, channels, depth, Cout, K)

    out = jax.block_until_ready(causal_cnn_forward(x, params, Cout))
    assert out.shape == (B, Cout, L), out.shape
    ref = jax.block_until_ready(_ref_forward(x, params))
    np.testing.assert_allclose(np.asarray(out), np.asarray(ref),
                               rtol=2e-3, atol=2e-3)

    # Ragged length (not a multiple of 128): single full-length tile path.
    L2 = 300
    key, kx2 = jax.random.split(key)
    x2 = jax.random.normal(kx2, (B, Cin, L2), jnp.float32)
    out2 = jax.block_until_ready(causal_cnn_forward(x2, params, Cout))
    ref2 = jax.block_until_ready(_ref_forward(x2, params))
    np.testing.assert_allclose(np.asarray(out2), np.asarray(ref2),
                               rtol=2e-3, atol=2e-3)

    print("KERNEL_OK")
</pallas_src>

<mosaic_0001>
module attributes {stable_mosaic.version = 11 : i64} {
  func.func @_causal_cnn_kernel(%arg0: i32, %arg1: i32, %arg2: memref<1x8x2048xf32, #tpu.memory_space<vmem>>, %arg3: memref<3x8x24xf32, #tpu.memory_space<vmem>>, %arg4: memref<3x8x1xf32, #tpu.memory_space<vmem>>, %arg5: memref<3x8x24xf32, #tpu.memory_space<vmem>>, %arg6: memref<3x8x1xf32, #tpu.memory_space<vmem>>, %arg7: memref<3x8x8xf32, #tpu.memory_space<vmem>>, %arg8: memref<3x8x1xf32, #tpu.memory_space<vmem>>, %arg9: memref<1x8x2048xf32, #tpu.memory_space<vmem>>, %arg10: memref<8x2xf32, #tpu.memory_space<vmem>>, %arg11: memref<8x2xf32, #tpu.memory_space<vmem>>, %arg12: memref<8x4xf32, #tpu.memory_space<vmem>>, %arg13: memref<8x4xf32, #tpu.memory_space<vmem>>, %arg14: memref<8x8xf32, #tpu.memory_space<vmem>>, %arg15: memref<8x8xf32, #tpu.memory_space<vmem>>) attributes {dimension_semantics = [#tpu.dimension_semantics<parallel>, #tpu.dimension_semantics<arbitrary>], iteration_bounds = array<i64: 2, 2>, scalar_prefetch = 0 : i64, scratch_operands = 6 : i64, tpu.core_type = #tpu.core_type<tc>, window_params = [{transform_indices = @transform_0, window_bounds = array<i64: 1, 8, 2048>}, {pipeline_mode = #tpu.pipeline_mode<synchronous>, transform_indices = @transform_1, window_bounds = array<i64: 3, 8, 24>}, {pipeline_mode = #tpu.pipeline_mode<synchronous>, transform_indices = @transform_2, window_bounds = array<i64: 3, 8, 1>}, {pipeline_mode = #tpu.pipeline_mode<synchronous>, transform_indices = @transform_3, window_bounds = array<i64: 3, 8, 24>}, {pipeline_mode = #tpu.pipeline_mode<synchronous>, transform_indices = @transform_4, window_bounds = array<i64: 3, 8, 1>}, {pipeline_mode = #tpu.pipeline_mode<synchronous>, transform_indices = @transform_5, window_bounds = array<i64: 3, 8, 8>}, {pipeline_mode = #tpu.pipeline_mode<synchronous>, transform_indices = @transform_6, window_bounds = array<i64: 3, 8, 1>}, {transform_indices = @transform_7, window_bounds = array<i64: 1, 8, 2048>}]} {
    %c0 = arith.constant 0 : index
    %c0_0 = arith.constant 0 : index
    %c0_1 = arith.constant 0 : index
    %0 = vector.load %arg2[%c0, %c0_0, %c0_1] : memref<1x8x2048xf32, #tpu.memory_space<vmem>>, vector<1x8x2048xf32>
    %1 = vector.shape_cast %0 : vector<1x8x2048xf32> to vector<8x2048xf32>
    %c0_i32 = arith.constant 0 : i32
    %2 = arith.cmpi eq, %arg1, %c0_i32 : i32
    %3 = arith.extui %2 : i1 to i32
    %c0_i32_2 = arith.constant 0 : i32
    %4 = arith.cmpi ne, %3, %c0_i32_2 : i32
    scf.if %4 {
      %cst_99 = arith.constant 0.000000e+00 : f32
      %151 = vector.broadcast %cst_99 : f32 to vector<8x2xf32>
      %c0_100 = arith.constant 0 : index
      %c0_101 = arith.constant 0 : index
      %152 = vector.load %arg10[%c0_100, %c0_101] : memref<8x2xf32, #tpu.memory_space<vmem>>, vector<8x2xf32>
      tpu.vector_store %arg10[%c0_100, %c0_101], %151 {strides = array<i32>} : memref<8x2xf32, #tpu.memory_space<vmem>>, vector<8x2xf32>,
      %cst_102 = arith.constant 0.000000e+00 : f32
      %153 = vector.broadcast %cst_102 : f32 to vector<8x2xf32>
      %c0_103 = arith.constant 0 : index
      %c0_104 = arith.constant 0 : index
      %154 = vector.load %arg11[%c0_103, %c0_104] : memref<8x2xf32, #tpu.memory_space<vmem>>, vector<8x2xf32>
      tpu.vector_store %arg11[%c0_103, %c0_104], %153 {strides = array<i32>} : memref<8x2xf32, #tpu.memory_space<vmem>>, vector<8x2xf32>,
    } else {
    }
    %c0_3 = arith.constant 0 : index
    %c0_4 = arith.constant 0 : index
    %5 = vector.load %arg10[%c0_3, %c0_4] : memref<8x2xf32, #tpu.memory_space<vmem>>, vector<8x2xf32>
    %6 = tpu.concatenate %5, %1 in 1 : vector<8x2xf32>, vector<8x2048xf32> -> vector<8x2050xf32>
    %7 = vector.extract_strided_slice %1 {offsets = [0, 2046], sizes = [8, 2], strides = [1, 1]} : vector<8x2048xf32> to vector<8x2xf32>
    %c0_5 = arith.constant 0 : index
    %c0_6 = arith.constant 0 : index
    %8 = vector.load %arg10[%c0_5, %c0_6] : memref<8x2xf32, #tpu.memory_space<vmem>>, vector<8x2xf32>
    tpu.vector_store %arg10[%c0_5, %c0_6], %7 {strides = array<i32>} : memref<8x2xf32, #tpu.memory_space<vmem>>, vector<8x2xf32>,
    %9 = vector.extract_strided_slice %6 {offsets = [0, 0], sizes = [8, 2048], strides = [1, 1]} : vector<8x2050xf32> to vector<8x2048xf32>
    %10 = vector.extract_strided_slice %6 {offsets = [0, 1], sizes = [8, 2048], strides = [1, 1]} : vector<8x2050xf32> to vector<8x2048xf32>
    %11 = vector.extract_strided_slice %6 {offsets = [0, 2], sizes = [8, 2048], strides = [1, 1]} : vector<8x2050xf32> to vector<8x2048xf32>
    %12 = tpu.concatenate %9, %10, %11 in 0 : vector<8x2048xf32>, vector<8x2048xf32>, vector<8x2048xf32> -> vector<24x2048xf32>
    %c0_7 = arith.constant 0 : index
    %c0_8 = arith.constant 0 : index
    %c0_9 = arith.constant 0 : index
    %13 = vector.load %arg3[%c0_7, %c0_8, %c0_9] : memref<3x8x24xf32, #tpu.memory_space<vmem>>, vector<1x8x24xf32>
    %14 = vector.shape_cast %13 : vector<1x8x24xf32> to vector<8x24xf32>
    %cst = arith.constant dense<0.000000e+00> : vector<8x2048xf32>
    %15 = tpu.matmul %14, %12, %cst {dimension_numbers = #tpu.dot_dimension_numbers<[1], [0], [0], [1], [0, 0, 1, 1], [], []>} : vector<8x24xf32>, vector<24x2048xf32>, vector<8x2048xf32> -> vector<8x2048xf32>
    %c0_10 = arith.constant 0 : index
    %c0_11 = arith.constant 0 : index
    %c0_12 = arith.constant 0 : index
    %16 = vector.load %arg4[%c0_10, %c0_11, %c0_12] : memref<3x8x1xf32, #tpu.memory_space<vmem>>, vector<1x8x1xf32>
    %17 = vector.shape_cast %16 : vector<1x8x1xf32> to vector<8x1xf32>
    %18 = vector.broadcast %17 : vector<8x1xf32> to vector<8x2048xf32>
    %19 = arith.addf %15, %18 : vector<8x2048xf32>
    %cst_13 = arith.constant 0.000000e+00 : f32
    %20 = vector.broadcast %cst_13 : f32 to vector<8x2048xf32>
    %21 = arith.cmpf ogt, %19, %20 : vector<8x2048xf32>
    %cst_14 = arith.constant 0.00999999977 : f32
    %22 = vector.broadcast %cst_14 : f32 to vector<8x2048xf32>
    %23 = arith.mulf %22, %19 : vector<8x2048xf32>
    %24 = arith.select %21, %19, %23 : vector<8x2048xi1>, vector<8x2048xf32>
    %c0_15 = arith.constant 0 : index
    %c0_16 = arith.constant 0 : index
    %25 = vector.load %arg11[%c0_15, %c0_16] : memref<8x2xf32, #tpu.memory_space<vmem>>, vector<8x2xf32>
    %26 = tpu.concatenate %25, %24 in 1 : vector<8x2xf32>, vector<8x2048xf32> -> vector<8x2050xf32>
    %27 = vector.extract_strided_slice %24 {offsets = [0, 2046], sizes = [8, 2], strides = [1, 1]} : vector<8x2048xf32> to vector<8x2xf32>
    %c0_17 = arith.constant 0 : index
    %c0_18 = arith.constant 0 : index
    %28 = vector.load %arg11[%c0_17, %c0_18] : memref<8x2xf32, #tpu.memory_space<vmem>>, vector<8x2xf32>
    tpu.vector_store %arg11[%c0_17, %c0_18], %27 {strides = array<i32>} : memref<8x2xf32, #tpu.memory_space<vmem>>, vector<8x2xf32>,
    %29 = vector.extract_strided_slice %26 {offsets = [0, 0], sizes = [8, 2048], strides = [1, 1]} : vector<8x2050xf32> to vector<8x2048xf32>
    %30 = vector.extract_strided_slice %26 {offsets = [0, 1], sizes = [8, 2048], strides = [1, 1]} : vector<8x2050xf32> to vector<8x2048xf32>
    %31 = vector.extract_strided_slice %26 {offsets = [0, 2], sizes = [8, 2048], strides = [1, 1]} : vector<8x2050xf32> to vector<8x2048xf32>
    %32 = tpu.concatenate %29, %30, %31 in 0 : vector<8x2048xf32>, vector<8x2048xf32>, vector<8x2048xf32> -> vector<24x2048xf32>
    %c0_19 = arith.constant 0 : index
    %c0_20 = arith.constant 0 : index
    %c0_21 = arith.constant 0 : index
    %33 = vector.load %arg5[%c0_19, %c0_20, %c0_21] : memref<3x8x24xf32, #tpu.memory_space<vmem>>, vector<1x8x24xf32>
    %34 = vector.shape_cast %33 : vector<1x8x24xf32> to vector<8x24xf32>
    %cst_22 = arith.constant dense<0.000000e+00> : vector<8x2048xf32>
    %35 = tpu.matmul %34, %32, %cst_22 {dimension_numbers = #tpu.dot_dimension_numbers<[1], [0], [0], [1], [0, 0, 1, 1], [], []>} : vector<8x24xf32>, vector<24x2048xf32>, vector<8x2048xf32> -> vector<8x2048xf32>
    %c0_23 = arith.constant 0 : index
    %c0_24 = arith.constant 0 : index
    %c0_25 = arith.constant 0 : index
    %36 = vector.load %arg6[%c0_23, %c0_24, %c0_25] : memref<3x8x1xf32, #tpu.memory_space<vmem>>, vector<1x8x1xf32>
    %37 = vector.shape_cast %36 : vector<1x8x1xf32> to vector<8x1xf32>
    %38 = vector.broadcast %37 : vector<8x1xf32> to vector<8x2048xf32>
    %39 = arith.addf %35, %38 : vector<8x2048xf32>
    %cst_26 = arith.constant 0.000000e+00 : f32
    %40 = vector.broadcast %cst_26 : f32 to vector<8x2048xf32>
    %41 = arith.cmpf ogt, %39, %40 : vector<8x2048xf32>
    %cst_27 = arith.constant 0.00999999977 : f32
    %42 = vector.broadcast %cst_27 : f32 to vector<8x2048xf32>
    %43 = arith.mulf %42, %39 : vector<8x2048xf32>
    %44 = arith.select %41, %39, %43 : vector<8x2048xi1>, vector<8x2048xf32>
    %c0_28 = arith.constant 0 : index
    %c0_29 = arith.constant 0 : index
    %c0_30 = arith.constant 0 : index
    %45 = vector.load %arg7[%c0_28, %c0_29, %c0_30] : memref<3x8x8xf32, #tpu.memory_space<vmem>>, vector<1x8x8xf32>
    %46 = vector.shape_cast %45 : vector<1x8x8xf32> to vector<8x8xf32>
    %cst_31 = arith.constant dense<0.000000e+00> : vector<8x2048xf32>
    %47 = tpu.matmul %46, %1, %cst_31 {dimension_numbers = #tpu.dot_dimension_numbers<[1], [0], [0], [1], [0, 0, 1, 1], [], []>} : vector<8x8xf32>, vector<8x2048xf32>, vector<8x2048xf32> -> vector<8x2048xf32>
    %c0_32 = arith.constant 0 : index
    %c0_33 = arith.constant 0 : index
    %c0_34 = arith.constant 0 : index
    %48 = vector.load %arg8[%c0_32, %c0_33, %c0_34] : memref<3x8x1xf32, #tpu.memory_space<vmem>>, vector<1x8x1xf32>
    %49 = vector.shape_cast %48 : vector<1x8x1xf32> to vector<8x1xf32>
    %50 = vector.broadcast %49 : vector<8x1xf32> to vector<8x2048xf32>
    %51 = arith.addf %47, %50 : vector<8x2048xf32>
    %52 = arith.addf %44, %51 : vector<8x2048xf32>
    %c0_i32_35 = arith.constant 0 : i32
    %53 = arith.cmpi eq, %arg1, %c0_i32_35 : i32
    %54 = arith.extui %53 : i1 to i32
    %c0_i32_36 = arith.constant 0 : i32
    %55 = arith.cmpi ne, %54, %c0_i32_36 : i32
    scf.if %55 {
      %cst_99 = arith.constant 0.000000e+00 : f32
      %151 = vector.broadcast %cst_99 : f32 to vector<8x4xf32>
      %c0_100 = arith.constant 0 : index
      %c0_101 = arith.constant 0 : index
      %152 = vector.load %arg12[%c0_100, %c0_101] : memref<8x4xf32, #tpu.memory_space<vmem>>, vector<8x4xf32>
      tpu.vector_store %arg12[%c0_100, %c0_101], %151 {strides = array<i32>} : memref<8x4xf32, #tpu.memory_space<vmem>>, vector<8x4xf32>,
      %cst_102 = arith.constant 0.000000e+00 : f32
      %153 = vector.broadcast %cst_102 : f32 to vector<8x4xf32>
      %c0_103 = arith.constant 0 : index
      %c0_104 = arith.constant 0 : index
      %154 = vector.load %arg13[%c0_103, %c0_104] : memref<8x4xf32, #tpu.memory_space<vmem>>, vector<8x4xf32>
      tpu.vector_store %arg13[%c0_103, %c0_104], %153 {strides = array<i32>} : memref<8x4xf32, #tpu.memory_space<vmem>>, vector<8x4xf32>,
    } else {
    }
    %c0_37 = arith.constant 0 : index
    %c0_38 = arith.constant 0 : index
    %56 = vector.load %arg12[%c0_37, %c0_38] : memref<8x4xf32, #tpu.memory_space<vmem>>, vector<8x4xf32>
    %57 = tpu.concatenate %56, %52 in 1 : vector<8x4xf32>, vector<8x2048xf32> -> vector<8x2052xf32>
    %58 = vector.extract_strided_slice %52 {offsets = [0, 2044], sizes = [8, 4], strides = [1, 1]} : vector<8x2048xf32> to vector<8x4xf32>
    %c0_39 = arith.constant 0 : index
    %c0_40 = arith.constant 0 : index
    %59 = vector.load %arg12[%c0_39, %c0_40] : memref<8x4xf32, #tpu.memory_space<vmem>>, vector<8x4xf32>
    tpu.vector_store %arg12[%c0_39, %c0_40], %58 {strides = array<i32>} : memref<8x4xf32, #tpu.memory_space<vmem>>, vector<8x4xf32>,
    %60 = vector.extract_strided_slice %57 {offsets = [0, 0], sizes = [8, 2048], strides = [1, 1]} : vector<8x2052xf32> to vector<8x2048xf32>
    %61 = vector.extract_strided_slice %57 {offsets = [0, 2], sizes = [8, 2048], strides = [1, 1]} : vector<8x2052xf32> to vector<8x2048xf32>
    %62 = vector.extract_strided_slice %57 {offsets = [0, 4], sizes = [8, 2048], strides = [1, 1]} : vector<8x2052xf32> to vector<8x2048xf32>
    %63 = tpu.concatenate %60, %61, %62 in 0 : vector<8x2048xf32>, vector<8x2048xf32>, vector<8x2048xf32> -> vector<24x2048xf32>
    %c1 = arith.constant 1 : index
    %c0_41 = arith.constant 0 : index
    %c0_42 = arith.constant 0 : index
    %64 = vector.load %arg3[%c1, %c0_41, %c0_42] : memref<3x8x24xf32, #tpu.memory_space<vmem>>, vector<1x8x24xf32>
    %65 = vector.shape_cast %64 : vector<1x8x24xf32> to vector<8x24xf32>
    %cst_43 = arith.constant dense<0.000000e+00> : vector<8x2048xf32>
    %66 = tpu.matmul %65, %63, %cst_43 {dimension_numbers = #tpu.dot_dimension_numbers<[1], [0], [0], [1], [0, 0, 1, 1], [], []>} : vector<8x24xf32>, vector<24x2048xf32>, vector<8x2048xf32> -> vector<8x2048xf32>
    %c1_44 = arith.constant 1 : index
    %c0_45 = arith.constant 0 : index
    %c0_46 = arith.constant 0 : index
    %67 = vector.load %arg4[%c1_44, %c0_45, %c0_46] : memref<3x8x1xf32, #tpu.memory_space<vmem>>, vector<1x8x1xf32>
    %68 = vector.shape_cast %67 : vector<1x8x1xf32> to vector<8x1xf32>
    %69 = vector.broadcast %68 : vector<8x1xf32> to vector<8x2048xf32>
    %70 = arith.addf %66, %69 : vector<8x2048xf32>
    %cst_47 = arith.constant 0.000000e+00 : f32
    %71 = vector.broadcast %cst_47 : f32 to vector<8x2048xf32>
    %72 = arith.cmpf ogt, %70, %71 : vector<8x2048xf32>
    %cst_48 = arith.constant 0.00999999977 : f32
    %73 = vector.broadcast %cst_48 : f32 to vector<8x2048xf32>
    %74 = arith.mulf %73, %70 : vector<8x2048xf32>
    %75 = arith.select %72, %70, %74 : vector<8x2048xi1>, vector<8x2048xf32>
    %c0_49 = arith.constant 0 : index
    %c0_50 = arith.constant 0 : index
    %76 = vector.load %arg13[%c0_49, %c0_50] : memref<8x4xf32, #tpu.memory_space<vmem>>, vector<8x4xf32>
    %77 = tpu.concatenate %76, %75 in 1 : vector<8x4xf32>, vector<8x2048xf32> -> vector<8x2052xf32>
    %78 = vector.extract_strided_slice %75 {offsets = [0, 2044], sizes = [8, 4], strides = [1, 1]} : vector<8x2048xf32> to vector<8x4xf32>
    %c0_51 = arith.constant 0 : index
    %c0_52 = arith.constant 0 : index
    %79 = vector.load %arg13[%c0_51, %c0_52] : memref<8x4xf32, #tpu.memory_space<vmem>>, vector<8x4xf32>
    tpu.vector_store %arg13[%c0_51, %c0_52], %78 {strides = array<i32>} : memref<8x4xf32, #tpu.memory_space<vmem>>, vector<8x4xf32>,
    %80 = vector.extract_strided_slice %77 {offsets = [0, 0], sizes = [8, 2048], strides = [1, 1]} : vector<8x2052xf32> to vector<8x2048xf32>
    %81 = vector.extract_strided_slice %77 {offsets = [0, 2], sizes = [8, 2048], strides = [1, 1]} : vector<8x2052xf32> to vector<8x2048xf32>
    %82 = vector.extract_strided_slice %77 {offsets = [0, 4], sizes = [8, 2048], strides = [1, 1]} : vector<8x2052xf32> to vector<8x2048xf32>
    %83 = tpu.concatenate %80, %81, %82 in 0 : vector<8x2048xf32>, vector<8x2048xf32>, vector<8x2048xf32> -> vector<24x2048xf32>
    %c1_53 = arith.constant 1 : index
    %c0_54 = arith.constant 0 : index
    %c0_55 = arith.constant 0 : index
    %84 = vector.load %arg5[%c1_53, %c0_54, %c0_55] : memref<3x8x24xf32, #tpu.memory_space<vmem>>, vector<1x8x24xf32>
    %85 = vector.shape_cast %84 : vector<1x8x24xf32> to vector<8x24xf32>
    %cst_56 = arith.constant dense<0.000000e+00> : vector<8x2048xf32>
    %86 = tpu.matmul %85, %83, %cst_56 {dimension_numbers = #tpu.dot_dimension_numbers<[1], [0], [0], [1], [0, 0, 1, 1], [], []>} : vector<8x24xf32>, vector<24x2048xf32>, vector<8x2048xf32> -> vector<8x2048xf32>
    %c1_57 = arith.constant 1 : index
    %c0_58 = arith.constant 0 : index
    %c0_59 = arith.constant 0 : index
    %87 = vector.load %arg6[%c1_57, %c0_58, %c0_59] : memref<3x8x1xf32, #tpu.memory_space<vmem>>, vector<1x8x1xf32>
    %88 = vector.shape_cast %87 : vector<1x8x1xf32> to vector<8x1xf32>
    %89 = vector.broadcast %88 : vector<8x1xf32> to vector<8x2048xf32>
    %90 = arith.addf %86, %89 : vector<8x2048xf32>
    %cst_60 = arith.constant 0.000000e+00 : f32
    %91 = vector.broadcast %cst_60 : f32 to vector<8x2048xf32>
    %92 = arith.cmpf ogt, %90, %91 : vector<8x2048xf32>
    %cst_61 = arith.constant 0.00999999977 : f32
    %93 = vector.broadcast %cst_61 : f32 to vector<8x2048xf32>
    %94 = arith.mulf %93, %90 : vector<8x2048xf32>
    %95 = arith.select %92, %90, %94 : vector<8x2048xi1>, vector<8x2048xf32>
    %96 = arith.addf %95, %52 : vector<8x2048xf32>
    %c0_i32_62 = arith.constant 0 : i32
    %97 = arith.cmpi eq, %arg1, %c0_i32_62 : i32
    %98 = arith.extui %97 : i1 to i32
    %c0_i32_63 = arith.constant 0 : i32
    %99 = arith.cmpi ne, %98, %c0_i32_63 : i32
    scf.if %99 {
      %cst_99 = arith.constant 0.000000e+00 : f32
      %151 = vector.broadcast %cst_99 : f32 to vector<8x8xf32>
      %c0_100 = arith.constant 0 : index
      %c0_101 = arith.constant 0 : index
      %152 = vector.load %arg14[%c0_100, %c0_101] : memref<8x8xf32, #tpu.memory_space<vmem>>, vector<8x8xf32>
      tpu.vector_store %arg14[%c0_100, %c0_101], %151 {strides = array<i32>} : memref<8x8xf32, #tpu.memory_space<vmem>>, vector<8x8xf32>,
      %cst_102 = arith.constant 0.000000e+00 : f32
      %153 = vector.broadcast %cst_102 : f32 to vector<8x8xf32>
      %c0_103 = arith.constant 0 : index
      %c0_104 = arith.constant 0 : index
      %154 = vector.load %arg15[%c0_103, %c0_104] : memref<8x8xf32, #tpu.memory_space<vmem>>, vector<8x8xf32>
      tpu.vector_store %arg15[%c0_103, %c0_104], %153 {strides = array<i32>} : memref<8x8xf32, #tpu.memory_space<vmem>>, vector<8x8xf32>,
    } else {
    }
    %c0_64 = arith.constant 0 : index
    %c0_65 = arith.constant 0 : index
    %100 = vector.load %arg14[%c0_64, %c0_65] : memref<8x8xf32, #tpu.memory_space<vmem>>, vector<8x8xf32>
    %101 = tpu.concatenate %100, %96 in 1 : vector<8x8xf32>, vector<8x2048xf32> -> vector<8x2056xf32>
    %102 = vector.extract_strided_slice %96 {offsets = [0, 2040], sizes = [8, 8], strides = [1, 1]} : vector<8x2048xf32> to vector<8x8xf32>
    %c0_66 = arith.constant 0 : index
    %c0_67 = arith.constant 0 : index
    %103 = vector.load %arg14[%c0_66, %c0_67] : memref<8x8xf32, #tpu.memory_space<vmem>>, vector<8x8xf32>
    tpu.vector_store %arg14[%c0_66, %c0_67], %102 {strides = array<i32>} : memref<8x8xf32, #tpu.memory_space<vmem>>, vector<8x8xf32>,
    %104 = vector.extract_strided_slice %101 {offsets = [0, 0], sizes = [8, 2048], strides = [1, 1]} : vector<8x2056xf32> to vector<8x2048xf32>
    %105 = vector.extract_strided_slice %101 {offsets = [0, 4], sizes = [8, 2048], strides = [1, 1]} : vector<8x2056xf32> to vector<8x2048xf32>
    %106 = vector.extract_strided_slice %101 {offsets = [0, 8], sizes = [8, 2048], strides = [1, 1]} : vector<8x2056xf32> to vector<8x2048xf32>
    %107 = tpu.concatenate %104, %105, %106 in 0 : vector<8x2048xf32>, vector<8x2048xf32>, vector<8x2048xf32> -> vector<24x2048xf32>
    %c2 = arith.constant 2 : index
    %c0_68 = arith.constant 0 : index
    %c0_69 = arith.constant 0 : index
    %108 = vector.load %arg3[%c2, %c0_68, %c0_69] : memref<3x8x24xf32, #tpu.memory_space<vmem>>, vector<1x8x24xf32>
    %109 = vector.shape_cast %108 : vector<1x8x24xf32> to vector<8x24xf32>
    %cst_70 = arith.constant dense<0.000000e+00> : vector<8x2048xf32>
    %110 = tpu.matmul %109, %107, %cst_70 {dimension_numbers = #tpu.dot_dimension_numbers<[1], [0], [0], [1], [0, 0, 1, 1], [], []>} : vector<8x24xf32>, vector<24x2048xf32>, vector<8x2048xf32> -> vector<8x2048xf32>
    %c2_71 = arith.constant 2 : index
    %c0_72 = arith.constant 0 : index
    %c0_73 = arith.constant 0 : index
    %111 = vector.load %arg4[%c2_71, %c0_72, %c0_73] : memref<3x8x1xf32, #tpu.memory_space<vmem>>, vector<1x8x1xf32>
    %112 = vector.shape_cast %111 : vector<1x8x1xf32> to vector<8x1xf32>
    %113 = vector.broadcast %112 : vector<8x1xf32> to vector<8x2048xf32>
    %114 = arith.addf %110, %113 : vector<8x2048xf32>
    %cst_74 = arith.constant 0.000000e+00 : f32
    %115 = vector.broadcast %cst_74 : f32 to vector<8x2048xf32>
    %116 = arith.cmpf ogt, %114, %115 : vector<8x2048xf32>
    %cst_75 = arith.constant 0.00999999977 : f32
    %117 = vector.broadcast %cst_75 : f32 to vector<8x2048xf32>
    %118 = arith.mulf %117, %114 : vector<8x2048xf32>
    %119 = arith.select %116, %114, %118 : vector<8x2048xi1>, vector<8x2048xf32>
    %c0_76 = arith.constant 0 : index
    %c0_77 = arith.constant 0 : index
    %120 = vector.load %arg15[%c0_76, %c0_77] : memref<8x8xf32, #tpu.memory_space<vmem>>, vector<8x8xf32>
    %121 = tpu.concatenate %120, %119 in 1 : vector<8x8xf32>, vector<8x2048xf32> -> vector<8x2056xf32>
    %122 = vector.extract_strided_slice %119 {offsets = [0, 2040], sizes = [8, 8], strides = [1, 1]} : vector<8x2048xf32> to vector<8x8xf32>
    %c0_78 = arith.constant 0 : index
    %c0_79 = arith.constant 0 : index
    %123 = vector.load %arg15[%c0_78, %c0_79] : memref<8x8xf32, #tpu.memory_space<vmem>>, vector<8x8xf32>
    tpu.vector_store %arg15[%c0_78, %c0_79], %122 {strides = array<i32>} : memref<8x8xf32, #tpu.memory_space<vmem>>, vector<8x8xf32>,
    %124 = vector.extract_strided_slice %121 {offsets = [0, 0], sizes = [8, 2048], strides = [1, 1]} : vector<8x2056xf32> to vector<8x2048xf32>
    %125 = vector.extract_strided_slice %121 {offsets = [0, 4], sizes = [8, 2048], strides = [1, 1]} : vector<8x2056xf32> to vector<8x2048xf32>
    %126 = vector.extract_strided_slice %121 {offsets = [0, 8], sizes = [8, 2048], strides = [1, 1]} : vector<8x2056xf32> to vector<8x2048xf32>
    %127 = tpu.concatenate %124, %125, %126 in 0 : vector<8x2048xf32>, vector<8x2048xf32>, vector<8x2048xf32> -> vector<24x2048xf32>
    %c2_80 = arith.constant 2 : index
    %c0_81 = arith.constant 0 : index
    %c0_82 = arith.constant 0 : index
    %128 = vector.load %arg5[%c2_80, %c0_81, %c0_82] : memref<3x8x24xf32, #tpu.memory_space<vmem>>, vector<1x8x24xf32>
    %129 = vector.shape_cast %128 : vector<1x8x24xf32> to vector<8x24xf32>
    %cst_83 = arith.constant dense<0.000000e+00> : vector<8x2048xf32>
    %130 = tpu.matmul %129, %127, %cst_83 {dimension_numbers = #tpu.dot_dimension_numbers<[1], [0], [0], [1], [0, 0, 1, 1], [], []>} : vector<8x24xf32>, vector<24x2048xf32>, vector<8x2048xf32> -> vector<8x2048xf32>
    %c2_84 = arith.constant 2 : index
    %c0_85 = arith.constant 0 : index
    %c0_86 = arith.constant 0 : index
    %131 = vector.load %arg6[%c2_84, %c0_85, %c0_86] : memref<3x8x1xf32, #tpu.memory_space<vmem>>, vector<1x8x1xf32>
    %132 = vector.shape_cast %131 : vector<1x8x1xf32> to vector<8x1xf32>
    %133 = vector.broadcast %132 : vector<8x1xf32> to vector<8x2048xf32>
    %134 = arith.addf %130, %133 : vector<8x2048xf32>
    %cst_87 = arith.constant 0.000000e+00 : f32
    %135 = vector.broadcast %cst_87 : f32 to vector<8x2048xf32>
    %136 = arith.cmpf ogt, %134, %135 : vector<8x2048xf32>
    %cst_88 = arith.constant 0.00999999977 : f32
    %137 = vector.broadcast %cst_88 : f32 to vector<8x2048xf32>
    %138 = arith.mulf %137, %134 : vector<8x2048xf32>
    %139 = arith.select %136, %134, %138 : vector<8x2048xi1>, vector<8x2048xf32>
    %c2_89 = arith.constant 2 : index
    %c0_90 = arith.constant 0 : index
    %c0_91 = arith.constant 0 : index
    %140 = vector.load %arg7[%c2_89, %c0_90, %c0_91] : memref<3x8x8xf32, #tpu.memory_space<vmem>>, vector<1x8x8xf32>
    %141 = vector.shape_cast %140 : vector<1x8x8xf32> to vector<8x8xf32>
    %cst_92 = arith.constant dense<0.000000e+00> : vector<8x2048xf32>
    %142 = tpu.matmul %141, %96, %cst_92 {dimension_numbers = #tpu.dot_dimension_numbers<[1], [0], [0], [1], [0, 0, 1, 1], [], []>} : vector<8x8xf32>, vector<8x2048xf32>, vector<8x2048xf32> -> vector<8x2048xf32>
    %c2_93 = arith.constant 2 : index
    %c0_94 = arith.constant 0 : index
    %c0_95 = arith.constant 0 : index
    %143 = vector.load %arg8[%c2_93, %c0_94, %c0_95] : memref<3x8x1xf32, #tpu.memory_space<vmem>>, vector<1x8x1xf32>
    %144 = vector.shape_cast %143 : vector<1x8x1xf32> to vector<8x1xf32>
    %145 = vector.broadcast %144 : vector<8x1xf32> to vector<8x2048xf32>
    %146 = arith.addf %142, %145 : vector<8x2048xf32>
    %147 = arith.addf %139, %146 : vector<8x2048xf32>
    %c0_96 = arith.constant 0 : index
    %c0_97 = arith.constant 0 : index
    %c0_98 = arith.constant 0 : index
    %148 = vector.load %arg9[%c0_96, %c0_97, %c0_98] : memref<1x8x2048xf32, #tpu.memory_space<vmem>>, vector<1x8x2048xf32>
    %149 = vector.shape_cast %148 : vector<1x8x2048xf32> to vector<8x2048xf32>
    %150 = vector.shape_cast %147 : vector<8x2048xf32> to vector<1x8x2048xf32>
    tpu.vector_store %arg9[%c0_96, %c0_97, %c0_98], %150 {strides = array<i32>} : memref<1x8x2048xf32, #tpu.memory_space<vmem>>, vector<1x8x2048xf32>,
    return
  }
  func.func @transform_0(%arg0: i32, %arg1: i32) -> (i32, i32, i32) {
    %c0_i32 = arith.constant 0 : i32
    %c0_i32_0 = arith.constant 0 : i32
    return %arg0, %c0_i32, %arg1 : i32, i32, i32
  }
  func.func @transform_1(%arg0: i32, %arg1: i32) -> (i32, i32, i32) {
    %c0_i32 = arith.constant 0 : i32
    %c0_i32_0 = arith.constant 0 : i32
    %c0_i32_1 = arith.constant 0 : i32
    %c0_i32_2 = arith.constant 0 : i32
    return %c0_i32, %c0_i32_0, %c0_i32_1 : i32, i32, i32
  }
  func.func @transform_2(%arg0: i32, %arg1: i32) -> (i32, i32, i32) {
    %c0_i32 = arith.constant 0 : i32
    %c0_i32_0 = arith.constant 0 : i32
    %c0_i32_1 = arith.constant 0 : i32
    %c0_i32_2 = arith.constant 0 : i32
    return %c0_i32, %c0_i32_0, %c0_i32_1 : i32, i32, i32
  }
  func.func @transform_3(%arg0: i32, %arg1: i32) -> (i32, i32, i32) {
    %c0_i32 = arith.constant 0 : i32
    %c0_i32_0 = arith.constant 0 : i32
    %c0_i32_1 = arith.constant 0 : i32
    %c0_i32_2 = arith.constant 0 : i32
    return %c0_i32, %c0_i32_0, %c0_i32_1 : i32, i32, i32
  }
  func.func @transform_4(%arg0: i32, %arg1: i32) -> (i32, i32, i32) {
    %c0_i32 = arith.constant 0 : i32
    %c0_i32_0 = arith.constant 0 : i32
    %c0_i32_1 = arith.constant 0 : i32
    %c0_i32_2 = arith.constant 0 : i32
    return %c0_i32, %c0_i32_0, %c0_i32_1 : i32, i32, i32
  }
  func.func @transform_5(%arg0: i32, %arg1: i32) -> (i32, i32, i32) {
    %c0_i32 = arith.constant 0 : i32
    %c0_i32_0 = arith.constant 0 : i32
    %c0_i32_1 = arith.constant 0 : i32
    %c0_i32_2 = arith.constant 0 : i32
    return %c0_i32, %c0_i32_0, %c0_i32_1 : i32, i32, i32
  }
  func.func @transform_6(%arg0: i32, %arg1: i32) -> (i32, i32, i32) {
    %c0_i32 = arith.constant 0 : i32
    %c0_i32_0 = arith.constant 0 : i32
    %c0_i32_1 = arith.constant 0 : i32
    %c0_i32_2 = arith.constant 0 : i32
    return %c0_i32, %c0_i32_0, %c0_i32_1 : i32, i32, i32
  }
  func.func @transform_7(%arg0: i32, %arg1: i32) -> (i32, i32, i32) {
    %c0_i32 = arith.constant 0 : i32
    %c0_i32_0 = arith.constant 0 : i32
    return %arg0, %c0_i32, %arg1 : i32, i32, i32
  }
}

</mosaic_0001>

<bundles_post_ra>
// kernel: tpu_custom_call.1
= control target key start
LH: loop header
LB: loop body
LE: loop exit
PB: predicated region body
PF: predicated region fallthrough
CT: control target
= control target key end

     0   :  { %s9435_s0 = inlined_call_operand.hbm [shape: f32[2,8,4096], index: 0, kind: input, shape index: {}]   ;;  %s9436_s1 = inlined_call_operand.vmem [shape: f32[3,8,24], index: 1, kind: input, shape index: {}]   ;;  %s9437_s2 = inlined_call_operand.vmem [shape: f32[3,8,1], index: 2, kind: input, shape index: {}]   ;;  %s9438_s3 = inlined_call_operand.vmem [shape: f32[3,8,24], index: 3, kind: input, shape index: {}]   ;;  %s9439_s4 = inlined_call_operand.vmem [shape: f32[3,8,1], index: 4, kind: input, shape index: {}]   ;;  %s9440_s5 = inlined_call_operand.vmem [shape: f32[3,8,8], index: 5, kind: input, shape index: {}]   ;;  %s9441_s6 = inlined_call_operand.vmem [shape: f32[3,8,1], index: 6, kind: input, shape index: {}]   ;;  %s9442_s7 = inlined_call_operand.hbm [shape: f32[2,8,4096], index: 7, kind: output, shape index: {}]  }
   0x1   :  { %9448 = sst [smem:[#allocation17_spill]] %s9442_s7 }
   0x2   :  { %12 = vsyncpa [#allocation9], 0 }
   0x3   :  { %14 = vsyncpa [#allocation9 + $0x1], 0 }
   0x4   :  { %15 = vsyncpa [#allocation10], 0 }
   0x5   :  { %17 = vsyncpa [#allocation10 + $0x1], 0  ;;  %s7548_s24 = smov 0   ;;  %s7550_s25 = smov 0  }
   0x6   :  { %s7552_s26 = smov 0   ;;  %s7554_s27 = smov 0  }
   0x7   :  { %s7556_s28 = smov 0   ;;  %s7558_s29 = smov 0  }
   0x8   :  { %s7560_s30 = smov 0   ;;  %s7562_s8 = smov 0  }
   0x9 LB: > { %9449 = sst [smem:[#allocation14_spill]] %s7464_s24  ;;  %s6743_s9 = sadd.s32 4294967295, %s7492_s8   ;;  %s7492_s8 = sphi %s7562_s8, %s23_s8   ;;  %s7488_s30 = sphi %s7560_s30, %s9471_s30   ;;  %s7484_s29 = sphi %s7558_s29, %s9470_s29   ;;  %s7480_s28 = sphi %s7556_s28, %s9469_s28   ;;  %s7476_s27 = sphi %s7554_s27, %s9468_s27   ;;  %s7472_s26 = sphi %s7552_s26, %s9467_s26   ;;  %s7468_s25 = sphi %s7550_s25, %s9466_s25   ;;  %s7464_s24 = sphi %s7548_s24, %s9465_s24  }
   0xa   : > { %s6744_s10 = sadd.s32 4294967294, %s7492_s8   ;;  %s32_s11 = sadd.s32 1, %s7484_s29 }
   0xb   : > { %s35_s12 = sadd.s32 1, %s7488_s30  ;;  %p33_p0 = scmp.ge.s32.totalorder %s32_s11, 2 }
   0xc   : > { %s44_s13 = sadd.s32 1, %s7472_s26  ;;  %p51_p1 = scmp.ne.s32.totalorder %s7472_s26, %s7468_s25 }
   0xd   : > { %p52_p2 = scmp.eq.s32.totalorder %s7492_s8, 0  ;;  %s9473_s11 = smov (%p33_p0, %s32_s11), 0 }
   0xe   : > { %9450 = sst [smem:[#allocation15_spill]] %s9473_s11  ;;  %s9475_s12 = smov (!%p33_p0, %s35_s12), %s7488_s30 }
   0xf   : > { %s40_s14 = ssub.s32 %s7484_s29, %s9473_s11  ;;  %p7601_p3 = por %p52_p2, %p51_p1 }
  0x10   : > { %p37_p4 = scmp.ge.s32.totalorder %s9475_s12, 2  ;;  %p57_p5 = scmp.ne.s32.totalorder %s7468_s25, %s7464_s24 }
  0x11   : > { %p58_p6 = scmp.eq.s32.totalorder %s6743_s9, 0  ;;  %p209_p7 = scmp.eq.s32.totalorder %s6743_s9, 3 }
  0x12   : > { %s9477_s12 = smov (%p37_p4, %s9475_s12), 0  ;;  %p215_p10 = scmp.eq.s32.totalorder %s6744_s10, 3 }
  0x13   : > { %9452 = sst [smem:[#allocation16_spill]] %s9477_s12  ;;  %p7609_p8 = por %p58_p6, %p57_p5 }
  0x14   : > { %p7613_p9 = por %p209_p7, %p51_p1  ;;  %s39_s18 = ssub.s32 %s7488_s30, %s9477_s12 }
  0x15   : > { %s41_s19 = sor.u32 %s40_s14, %s39_s18  ;;  %p7619_p12 = por %p215_p10, %p57_p5 }
  0x16   : > { %s9454_s17 = scalar_select %p7613_p9, 1, 0 }
  0x17   : > { %p42_p11 = scmp.eq.s32.totalorder %s41_s19, 0  ;;  %p7041_p13 = scmp.lt.s32.totalorder %s7492_s8, 4 }
  0x18   : > { %s9455_s20 = scalar_select %p7619_p12, 1, 0 }
  0x19   : > { %s253_s21 = sand.u32 1, %s7472_s26   ;;  %s6748_s9 = sshll.u32 %s7484_s29, 4 }
  0x1a   : > { %s7626_s22 = scalar_select %p42_p11, %s7472_s26, %s44_s13  }
  0x1b   : > { %s6747_s23 = sshll.u32 %s253_s21, 7  ;;  %s6749_s11 = sshll.u32 %s7488_s30, 5 }
  0x1c   : > { %s257_s24 = scalar_lea.vmem [#allocation8], %s6747_s23  ;;  %s263_s12 = sadd.s32 %s6749_s11, %s6748_s9 }
  0x1d   : > { %s267_s7 = sshll.u32 %s257_s24, 4  ;;  %s6750_s10 = sshll.u32 %s263_s12, 7  ;;  %s7630_s7 = int_to_ptr.vmem [resolvable:$true] %s267_s7 }
  0x1e   : > { %p7634_p0 = pnand %p7041_p13, %p7601_p3  ;;  %s7641_s13 = scalar_lea.hbm %s9435_s0, %s6750_s10 }
  0x1f   : > { %s254_s24 = scalar_lea.sflag [#allocation9], %s253_s21  ;;  %s7364_s11 = scalar_lea.hbm %s7641_s13, 2048 }
  0x20   : > { %p7365_p4 = scmp.ne.s32.totalorder %s7641_s13, %s7364_s11  ;;  %p7366_p3 = pneg %p7634_p0 }
  0x21   : > { %s7369_s23 = scalar_lea.hbm %s9435_s0, 8192  ;;  %p7370_p7 = scmp.lt.u32.totalorder %s7641_s13, %s9435_s0 }
  0x22   : > { %p7367_p5 = pnand %p7366_p3, %p7365_p4  ;;  %p7371_p10 = scmp.lt.u32.totalorder %s7369_s23, %s7364_s11 }
  0x23   : > { %p7373_p13 = scmp.lt.u32.totalorder %s7364_s11, %s7641_s13 }
  0x24   : > { %p7368_p6 = pneg %p7367_p5  ;;  %p7372_p11 = por %p7371_p10, %p7370_p7 }
  0x26   : > { %p7374_p1 = por %p7373_p13, %p7372_p11 }
  0x28   : > { %p7375_p2 = pnand %p7374_p1, %p7368_p6 }
  0x2a   : > { %7378 = shalt.err (!%p7375_p2)
}
  0x2b   : > { %s7379_s21 = scalar_lea.vmem %s7630_s7, 2048  ;;  %s7494_s18 = smov [#allocation8]  }
  0x2c   : > { %p7380_p4 = scmp.ne.s32.totalorder %s7630_s7, %s7379_s21  ;;  %s7384_s19 = sshll.u32 %s7494_s18, 4  ;;  %s7385_s19 = int_to_ptr.vmem [resolvable:$false] %s7384_s19 }
  0x2d   : > { %s7386_s12 = scalar_lea.vmem %s7385_s19, 4096  ;;  %p7387_p9 = scmp.lt.s32.totalorder %s7630_s7, %s7385_s19 }
  0x2e   : > { %p7382_p5 = pnand %p7380_p4, %p7366_p3  ;;  %p7388_p7 = scmp.lt.s32.totalorder %s7386_s12, %s7379_s21 }
  0x30   : > { %p7383_p12 = pneg %p7382_p5  ;;  %p7389_p10 = por %p7388_p7, %p7387_p9 }
  0x32   : > { %p7390_p11 = pnand %p7389_p10, %p7383_p12 }
  0x34   : > { %7393 = shalt.err (!%p7390_p11)
}
  0x35   : > { %7036 = dma.hbm_to_vmem [thread:$0]  (!%p7634_p0), %s7641_s13, 2048, %s7630_s7, %s254_s24  }
  0x36   : > { %p9457_p1 = scmp.lt.s32.totalorder %s7492_s8, 5  ;;  %p9458_p2 = scmp.ge.s32.totalorder %s7492_s8, 1 }
  0x38   : > { %p273_p3 = pnand %p9458_p2, %p9457_p1 }
  0x39   : > { %s7675_s11 = sand.u32 (!%p273_p3), 1, %s7468_s25  }
  0x3a   : > { %276 = sbr.rel (%p273_p3) target bundleno = 3122 (0xc32), region = 48  ;;  %s6752_s15 = sshll.u32 (!%p273_p3), %s7675_s11, 7 }
  0x3b   : > { %s279_s23 = scalar_lea.sflag (!%p273_p3), [#allocation9], %s7675_s11  ;;  %s282_s9 = scalar_lea.vmem (!%p273_p3), [#allocation8], %s6752_s15 }
  0x41   : > { %7455 = dma.done.wait (%p7609_p8), %s279_s23, 2048  }
  0x42   : > { %7457 = vsyncadd (%p7609_p8), %s279_s23, 4294965248  ;;  %v7683_v0 = vld [vmem:[%s282_s9] sm:$0xff]  ;;  %v7685_v1 = vld [vmem:[%s282_s9 + $0x8] sm:$0xff]  ;;  %s7715_s7 = scalar_lea.vmem [#allocation11], %s6752_s15  ;;  %p6754_p8 = scmp.ne.s32.totalorder %s7476_s27, 0 }
  0x43   : > { %v7687_v2 = vld [vmem:[%s282_s9 + $0x10] sm:$0xff]  ;;  %v7689_v3 = vld [vmem:[%s282_s9 + $0x18] sm:$0xff]  ;;  %v7691_v4 = vld [vmem:[%s282_s9 + $0x20] sm:$0xff]  ;;  %vm335_vm0 = vcmask (!%p6754_p8), 15360   ;;  %v7495_v16 = vmov (!%p6754_p8), 0.0  }
  0x44   : > { %v7693_v5 = vld [vmem:[%s282_s9 + $0x28] sm:$0xff]  ;;  %v7695_v6 = vld [vmem:[%s282_s9 + $0x30] sm:$0xff]  ;;  %v7697_v7 = vld [vmem:[%s282_s9 + $0x38] sm:$0xff]  ;;  %334 = sbr.rel (%p6754_p8) target bundleno = 75 (0x4b), region = 56  ;;  %336 = vst.msk [vmem:[#allocation2] sm:$0xff] (!%p6754_p8), %vm335_vm0, %v7495_v16 }
  0x45   : > { %v7699_v8 = vld [vmem:[%s282_s9 + $0x40] sm:$0xff]  ;;  %v7701_v9 = vld [vmem:[%s282_s9 + $0x48] sm:$0xff]  ;;  %v7703_v10 = vld [vmem:[%s282_s9 + $0x50] sm:$0xff]  ;;  %337 = vst.msk [vmem:[#allocation3] sm:$0xff] (!%p6754_p8), %vm335_vm0, %v7495_v16 }
  0x46   : > { %v7705_v11 = vld [vmem:[%s282_s9 + $0x58] sm:$0xff]  ;;  %v7707_v12 = vld [vmem:[%s282_s9 + $0x60] sm:$0xff]  ;;  %v7709_v13 = vld [vmem:[%s282_s9 + $0x68] sm:$0xff] }
  0x47   : > { %v7711_v14 = vld [vmem:[%s282_s9 + $0x70] sm:$0xff]  ;;  %v7713_v15 = vld [vmem:[%s282_s9 + $0x78] sm:$0xff] }
  0x4b PF: > { %s7496_s16 = smov 2   ;;  %vm387_vm1 = vcmask 15360   ;;  %s7497_s14 = smov 127   ;;  %v338_v33 = vld [vmem:[#allocation2] sm:$0xff]  ;;  %v7499_v44 = vmov 0.0   ;;  %v7500_v60 = vmov 0  }
  0x4c   : > { %359 = vrot.lane.b32.xlu1 %v7687_v2, %s7496_s16  ;;  %355 = vrot.lane.b32.xlu0 %v7683_v0, %s7496_s16  ;;  %s7498_s13 = smov 126   ;;  %v558_v59 = vld [vmem:[%s9437_s2] sm:$0xff]  ;;  %vm457_vm2 = vcmask 1039360   ;;  %vm524_vm3 = vcmask 1031168   ;;  %vm564_vm4 = vcmask 195584  }
  0x4d   : > { %632 = vmatprep.mubr.f32.mxu0 %v7499_v44  ;;  %703 = vmatprep.mubr.f32.mxu1 %v7499_v44 }
  0x4e   : > { %7159 = vset.pattern.permute.xlu0 %v7500_v60  ;;  %7200 = vset.pattern.permute.xlu1 %v7500_v60 }
  0x50   : > { %361 = vrot.lane.b32.xlu1 %v7689_v3, %s7496_s16  ;;  %357 = vrot.lane.b32.xlu0 %v7685_v1, %s7496_s16 }
  0x54   : > { %365 = vrot.lane.b32.xlu1 %v7693_v5, %s7496_s16  ;;  %363 = vrot.lane.b32.xlu0 %v7691_v4, %s7496_s16 }
  0x58   : > { %369 = vrot.lane.b32.xlu1 %v7697_v7, %s7496_s16  ;;  %367 = vrot.lane.b32.xlu0 %v7695_v6, %s7496_s16 }
  0x5c   : > { %373 = vrot.lane.b32.xlu1 %v7701_v9, %s7496_s16  ;;  %371 = vrot.lane.b32.xlu0 %v7699_v8, %s7496_s16 }
  0x60   : > { %377 = vrot.lane.b32.xlu1 %v7705_v11, %s7496_s16  ;;  %375 = vrot.lane.b32.xlu0 %v7703_v10, %s7496_s16 }
  0x64   : > { %381 = vrot.lane.b32.xlu1 %v7709_v13, %s7496_s16  ;;  %379 = vrot.lane.b32.xlu0 %v7707_v12, %s7496_s16 }
  0x68   : > { %385 = vrot.lane.b32.xlu1 %v7713_v15, %s7496_s16  ;;  %383 = vrot.lane.b32.xlu0 %v7711_v14, %s7496_s16 }
  0xbe   : > { %v360_v17 = vpop.permute.xlu1 %359  ;;  %v356_v18 = vpop.permute.xlu0 %355 }
  0xbf   : > { %v7773_v34 = vsel %vm387_vm1, %v338_v33, %v356_v18 }
  0xc2   : > { %v362_v19 = vpop.permute.xlu1 %361  ;;  %v358_v20 = vpop.permute.xlu0 %357 }
  0xc3   : > { %v7753_v21 = vsel %vm387_vm1, %v356_v18, %v358_v20  ;;  %v7756_v22 = vsel %vm387_vm1, %v358_v20, %v360_v17  ;;  %v7784_v39 = vsel %vm387_vm1, %v360_v17, %v362_v19 }
  0xc4   : > { %v7119_v23 = vpack.i.bf16 %v7756_v22, %v7753_v21  ;;  %v7124_v46 = vpack.i.bf16 %v7784_v39, %v7773_v34 }
  0xc6   : > { %v366_v24 = vpop.permute.xlu1 %365  ;;  %7120 = vrot.lane.b32.xlu0 %v7119_v23, %s7497_s14  ;;  %v364_v25 = vpop.permute.xlu0 %363 }
  0xc7   : > { %v7762_v26 = vsel %vm387_vm1, %v362_v19, %v364_v25  ;;  %v7765_v27 = vsel %vm387_vm1, %v364_v25, %v366_v24 }
  0xc8   : > { %v7129_v28 = vpack.i.bf16 %v7765_v27, %v7762_v26 }
  0xca   : > { %v370_v29 = vpop.permute.xlu1 %369  ;;  %7130 = vrot.lane.b32.xlu0 %v7129_v28, %s7497_s14  ;;  %v368_v30 = vpop.permute.xlu0 %367 }
  0xcb   : > { %v7796_v45 = vsel %vm387_vm1, %v366_v24, %v368_v30  ;;  %v7803_v48 = vsel %vm387_vm1, %v368_v30, %v370_v29 }
  0xcc   : > { %v7134_v51 = vpack.i.bf16 %v7803_v48, %v7796_v45 }
  0xce   : > { %v374_v31 = vpop.permute.xlu1 %373  ;;  %492 = vrot.lane.b32.xlu0 %v7753_v21, %s7498_s13  ;;  %v372_v32 = vpop.permute.xlu0 %371 }
  0xcf   : > { %v7820_v53 = vsel %vm387_vm1, %v370_v29, %v372_v32  ;;  %v7823_v54 = vsel %vm387_vm1, %v372_v32, %v374_v31 }
  0xd0   : > { %v7139_v55 = vpack.i.bf16 %v7823_v54, %v7820_v53 }
  0xd2   : > { %v378_v35 = vpop.permute.xlu1 %377  ;;  %v376_v36 = vpop.permute.xlu0 %375  ;;  %490 = vrot.lane.b32.xlu0 %v7773_v34, %s7498_s13 }
  0xd3   : > { %v7778_v37 = vsel %vm387_vm1, %v374_v31, %v376_v36  ;;  %v7781_v38 = vsel %vm387_vm1, %v376_v36, %v378_v35 }
  0xd4   : > { %v7144_v42 = vpack.i.bf16 %v7781_v38, %v7778_v37 }
  0xd6   : > { %v382_v40 = vpop.permute.xlu1 %381  ;;  %496 = vrot.lane.b32.xlu0 %v7784_v39, %s7498_s13  ;;  %v380_v41 = vpop.permute.xlu0 %379 }
  0xd7   : > { %v7838_v56 = vsel %vm387_vm1, %v380_v41, %v382_v40  ;;  %v7841_v57 = vsel %vm387_vm1, %v378_v35, %v380_v41 }
  0xd8   : > { %v7149_v58 = vpack.i.bf16 %v7838_v56, %v7841_v57 }
  0xda   : > { %v386_v43 = vpop.permute.xlu1 %385  ;;  %7145 = vrot.lane.b32.xlu0 %v7144_v42, %s7497_s14  ;;  %v384_v47 = vpop.permute.xlu0 %383 }
  0xdb   : > { %421 = vst.msk [vmem:[#allocation2] sm:$0xff] %vm387_vm1, %v386_v43  ;;  %455 = vrot.lane.b32.xlu1 %v386_v43, %s7497_s14  ;;  %v7807_v49 = vsel %vm387_vm1, %v382_v40, %v384_v47  ;;  %v7810_v50 = vsel %vm387_vm1, %v384_v47, %v386_v43 }
  0xdc   : > { %v7154_v52 = vpack.i.bf16 %v7810_v50, %v7807_v49 }
  0xde   : > { %502 = vrot.lane.b32.xlu0 %v7796_v45, %s7498_s13 }
  0xdf   : > { %7125 = vrot.lane.b32.xlu1 %v7124_v46, %s7497_s14 }
  0xe2   : > { %504 = vrot.lane.b32.xlu0 %v7803_v48, %s7498_s13 }
  0xe3   : > { %7135 = vrot.lane.b32.xlu1 %v7134_v51, %s7497_s14 }
  0xe6   : > { %7155 = vrot.lane.b32.xlu0 %v7154_v52, %s7497_s14 }
  0xe7   : > { %494 = vrot.lane.b32.xlu1 %v7756_v22, %s7498_s13 }
  0xea   : > { %510 = vrot.lane.b32.xlu0 %v7778_v37, %s7498_s13 }
  0xeb   : > { %7140 = vrot.lane.b32.xlu1 %v7139_v55, %s7497_s14 }
  0xee   : > { %512 = vrot.lane.b32.xlu0 %v7781_v38, %s7498_s13 }
  0xef   : > { %498 = vrot.lane.b32.xlu1 %v7762_v26, %s7498_s13 }
  0xf2   : > { %516 = vrot.lane.b32.xlu0 %v7838_v56, %s7498_s13 }
  0xf3   : > { %500 = vrot.lane.b32.xlu1 %v7765_v27, %s7498_s13 }
  0xf6   : > { %520 = vrot.lane.b32.xlu0 %v7810_v50, %s7498_s13 }
  0xf7   : > { %7150 = vrot.lane.b32.xlu1 %v7149_v58, %s7497_s14 }
  0xfa   : > { %561 = vperm.xlu0 %7159, %v558_v59  }
  0xfb   : > { %506 = vrot.lane.b32.xlu1 %v7820_v53, %s7498_s13 }
  0xff   : > { %508 = vrot.lane.b32.xlu1 %v7823_v54, %s7498_s13 }
 0x103   : > { %514 = vrot.lane.b32.xlu1 %v7841_v57, %s7498_s13 }
 0x107   : > { %518 = vrot.lane.b32.xlu1 %v7807_v49, %s7498_s13 }
 0x10b   : > { %522 = vrot.lane.b32.xlu1 %v386_v43, %s7498_s13 }
 0x138   : > { %v7121_v61 = vpop.permute.xlu0 %7120 }
 0x139   : > { %v7123_v62 = vunpack.i.h.bf16 %v7121_v61  ;;  %v7122_v63 = vunpack.i.l.bf16 %v7121_v61 }
 0x13b   : > { %v459_v16 = vsel %vm457_vm2, %v7122_v63, %v7123_v62 }
 0x13c   : > { %v7131_v17 = vpop.permute.xlu0 %7130  ;;  %v6837_v18 = vpack.c.bf16 %v459_v16, %v7753_v21 }
 0x13d   : > { %v7132_v28 = vunpack.i.l.bf16 %v7131_v17  ;;  %v7133_v36 = vunpack.i.h.bf16 %v7131_v17 }
 0x13e   : > { %6838 = vmatprep.subr.bf16.mxu0 %v6837_v18 }
 0x13f   : > { %v462_v47 = vsel %vm457_vm2, %v7132_v28, %v7133_v36 }
 0x140   : > { %v493_v19 = vpop.permute.xlu0 %492  ;;  %v6847_v58 = vpack.c.bf16 %v462_v47, %v7762_v26 }
 0x144   : > { %v491_v20 = vpop.permute.xlu0 %490 }
 0x148   : > { %v497_v23 = vpop.permute.xlu0 %496 }
 0x14c   : > { %v7870_v31 = vpop.permute.xlu0 %7145 }
 0x14d   : > { %v7868_v24 = vpop.permute.xlu1 %455  ;;  %v7147_v26 = vunpack.i.l.bf16 %v7870_v31 }
 0x150   : > { %v503_v51 = vpop.permute.xlu0 %502 }
 0x151   : > { %v7126_v25 = vpop.permute.xlu1 %7125 }
 0x152   : > { %v7128_v29 = vunpack.i.h.bf16 %v7126_v25  ;;  %v7127_v30 = vunpack.i.l.bf16 %v7126_v25 }
 0x154   : > { %v458_v32 = vsel %vm457_vm2, %v7127_v30, %v7122_v63  ;;  %v461_v33 = vsel %vm457_vm2, %v7128_v29, %v7132_v28  ;;  %v460_v35 = vsel %vm457_vm2, %v7123_v62, %v7128_v29  ;;  %v505_v63 = vpop.permute.xlu0 %504 }
 0x155   : > { %v7136_v21 = vpop.permute.xlu1 %7135  ;;  %v6839_v40 = vpack.c.bf16 %v458_v32, %v7773_v34  ;;  %v6841_v41 = vpack.c.bf16 %v461_v33, %v7784_v39  ;;  %v6843_v42 = vpack.c.bf16 %v460_v35, %v7756_v22  ;;  %v7884_v34 = vld [vmem:[%s9436_s1] sm:$0xff]  ;;  %v525_v22 = vsel %vm524_vm3, %v491_v20, %v493_v19 }
 0x156   : > { %v7137_v43 = vunpack.i.l.bf16 %v7136_v21  ;;  %v7138_v59 = vunpack.i.h.bf16 %v7136_v21 }
 0x157   : > { %6840 = vmatpush1.bf16.msra.mxu0 %v6839_v40  ;;  %6842 = vmatprep.subr.bf16.mxu1 %v6841_v41 }
 0x158   : > { %6844 = vmatpush1.bf16.msra.mxu1 %v6843_v42  ;;  %v463_v46 = vsel %vm457_vm2, %v7133_v36, %v7137_v43  ;;  %v464_v18 = vsel %vm457_vm2, %v7137_v43, %v7138_v59  ;;  %v7156_v30 = vpop.permute.xlu0 %7155  ;;  %v7148_v36 = vunpack.i.h.bf16 %v7870_v31  ;;  %v531_v31 = vsel %vm524_vm3, %v503_v51, %v505_v63 }
 0x159   : > { %v495_v52 = vpop.permute.xlu1 %494  ;;  %v6845_v39 = vpack.c.bf16 %v463_v46, %v7765_v27  ;;  %v6851_v28 = vpack.c.bf16 %v464_v18, %v7796_v45 }
 0x15a   : > { %v526_v55 = vsel %vm524_vm3, %v493_v19, %v495_v52  ;;  %v527_v20 = vsel %vm524_vm3, %v495_v52, %v497_v23 }
 0x15b   : > { %572 = vmatprep.subr.mxu0 %v526_v55 }
 0x15c   : > { %573 = vmatpush1.msra.mxu0 %v525_v22  ;;  %v511_v41 = vpop.permute.xlu0 %510  ;;  %v7158_v22 = vunpack.i.h.bf16 %v7156_v30 }
 0x15d   : > { %v7141_v61 = vpop.permute.xlu1 %7140  ;;  %6755 = vmatmul.mubr.msk.f32.vlgmr.msra.gmra.mrb[0].mxu0 %vm564_vm4, %v7884_v34  ;;  %6846 = vmatprep.subr.bf16.mxu0 %v6845_v39 }
 0x15e   : > { %v7142_v62 = vunpack.i.l.bf16 %v7141_v61  ;;  %6848 = vmatpush1.bf16.msra.mxu0 %v6847_v58  ;;  %774 = vmatprep.mubr.f32.mxu0 %v7499_v44  ;;  %v7143_v16 = vunpack.i.h.bf16 %v7141_v61 }
 0x160   : > { %v465_v17 = vsel %vm457_vm2, %v7138_v59, %v7142_v62  ;;  %v467_v29 = vsel %vm457_vm2, %v7143_v16, %v7147_v26  ;;  %v466_v32 = vsel %vm457_vm2, %v7142_v62, %v7143_v16  ;;  %v513_v58 = vpop.permute.xlu0 %512 }
 0x161   : > { %v499_v27 = vpop.permute.xlu1 %498  ;;  %v6849_v25 = vpack.c.bf16 %v465_v17, %v7803_v48  ;;  %v6853_v45 = vpack.c.bf16 %v467_v29, %v7823_v54  ;;  %v6855_v48 = vpack.c.bf16 %v466_v32, %v7820_v53  ;;  %v468_v54 = vsel %vm457_vm2, %v7147_v26, %v7148_v36 }
 0x162   : > { %v528_v19 = vsel %vm524_vm3, %v497_v23, %v499_v27  ;;  %v7157_v53 = vunpack.i.l.bf16 %v7156_v30  ;;  %v6859_v55 = vpack.c.bf16 %v468_v54, %v7778_v37 }
 0x163   : > { %643 = vmatprep.subr.mxu1 %v528_v19 }
 0x164   : > { %644 = vmatpush1.msra.mxu1 %v527_v20  ;;  %v472_v16 = vsel %vm457_vm2, %v7157_v53, %v7158_v22 }
 0x165   : > { %v501_v33 = vpop.permute.xlu1 %500  ;;  %6756 = vmatmul.mubr.msk.f32.vlgmr.msra.gmra.mrb[0].mxu1 %vm564_vm4, %v7884_v34  ;;  %6850 = vmatprep.subr.bf16.mxu1 %v6849_v25 }
 0x166   : > { %v529_v35 = vsel %vm524_vm3, %v499_v27, %v501_v33  ;;  %6852 = vmatpush1.bf16.msra.mxu1 %v6851_v28  ;;  %v530_v23 = vsel %vm524_vm3, %v501_v33, %v503_v51  ;;  %845 = vmatprep.mubr.f32.mxu1 %v7499_v44  ;;  %v517_v27 = vpop.permute.xlu0 %516 }
 0x167   : > { %714 = vmatprep.subr.mxu0 %v530_v23 }
 0x168   : > { %715 = vmatpush1.msra.mxu0 %v529_v35 }
 0x169   : > { %v7151_v21 = vpop.permute.xlu1 %7150  ;;  %6757 = vmatmul.mubr.msk.f32.vlgmr.msra.gmra.mrb[2].mxu0 %vm564_vm4, %v7884_v34  ;;  %6854 = vmatprep.subr.bf16.mxu0 %v6853_v45 }
 0x16a   : > { %v7152_v40 = vunpack.i.l.bf16 %v7151_v21  ;;  %6856 = vmatpush1.bf16.msra.mxu0 %v6855_v48  ;;  %916 = vmatprep.mubr.f32.mxu0 %v7499_v44  ;;  %v7153_v42 = vunpack.i.h.bf16 %v7151_v21  ;;  %v521_v25 = vpop.permute.xlu0 %520 }
 0x16c   : > { %v469_v43 = vsel %vm457_vm2, %v7148_v36, %v7152_v40  ;;  %v471_v39 = vsel %vm457_vm2, %v7153_v42, %v7157_v53  ;;  %v470_v59 = vsel %vm457_vm2, %v7152_v40, %v7153_v42 }
 0x16d   : > { %v507_v46 = vpop.permute.xlu1 %506  ;;  %v6857_v52 = vpack.c.bf16 %v469_v43, %v7781_v38  ;;  %v6861_v37 = vpack.c.bf16 %v471_v39, %v7838_v56  ;;  %v6863_v38 = vpack.c.bf16 %v470_v59, %v7841_v57  ;;  %v535_v56 = vsel %vm524_vm3, %v511_v41, %v513_v58 }
 0x16e   : > { %v532_v47 = vsel %vm524_vm3, %v505_v63, %v507_v46  ;;  %v473_v63 = vsel %vm457_vm2, %v7158_v22, %v7868_v24  ;;  %v6867_v24 = vpack.c.bf16 %v472_v16, %v7807_v49 }
 0x16f   : > { %785 = vmatprep.subr.mxu1 %v532_v47  ;;  %v6865_v57 = vpack.c.bf16 %v473_v63, %v7810_v50 }
 0x170   : > { %786 = vmatpush1.msra.mxu1 %v531_v31 }
 0x171   : > { %v509_v61 = vpop.permute.xlu1 %508  ;;  %6758 = vmatmul.mubr.msk.f32.vlgmr.msra.gmra.mrb[2].mxu1 %vm564_vm4, %v7884_v34  ;;  %6858 = vmatprep.subr.bf16.mxu1 %v6857_v52 }
 0x172   : > { %v533_v62 = vsel %vm524_vm3, %v507_v46, %v509_v61  ;;  %6860 = vmatpush1.bf16.msra.mxu1 %v6859_v55  ;;  %v534_v51 = vsel %vm524_vm3, %v509_v61, %v511_v41  ;;  %987 = vmatprep.mubr.f32.mxu1 %v7499_v44 }
 0x173   : > { %856 = vmatprep.subr.mxu0 %v534_v51 }
 0x174   : > { %857 = vmatpush1.msra.mxu0 %v533_v62 }
 0x175   : > { %v515_v17 = vpop.permute.xlu1 %514  ;;  %6759 = vmatmul.mubr.msk.f32.vlgmr.msra.gmra.mrb[4].mxu0 %vm564_vm4, %v7884_v34  ;;  %6862 = vmatprep.subr.bf16.mxu0 %v6861_v37 }
 0x176   : > { %6864 = vmatpush1.bf16.msra.mxu0 %v6863_v38  ;;  %v536_v18 = vsel %vm524_vm3, %v513_v58, %v515_v17  ;;  %1058 = vmatprep.mubr.f32.mxu0 %v7499_v44  ;;  %v537_v20 = vsel %vm524_vm3, %v515_v17, %v517_v27 }
 0x177   : > { %927 = vmatprep.subr.mxu1 %v536_v18 }
 0x178   : > { %928 = vmatpush1.msra.mxu1 %v535_v56 }
 0x179   : > { %v519_v26 = vpop.permute.xlu1 %518  ;;  %6760 = vmatmul.mubr.msk.f32.vlgmr.msra.gmra.mrb[4].mxu1 %vm564_vm4, %v7884_v34  ;;  %6866 = vmatprep.subr.bf16.mxu1 %v6865_v57  ;;  %v7950_v29 = vpop.permute.xlu0 %561 }
 0x17a   : > { %6868 = vmatpush1.bf16.msra.mxu1 %v6867_v24  ;;  %v538_v19 = vsel %vm524_vm3, %v517_v27, %v519_v26  ;;  %1129 = vmatprep.mubr.f32.mxu1 %v7499_v44  ;;  %v539_v50 = vsel %vm524_vm3, %v519_v26, %v521_v25 }
 0x17b   : > { %998 = vmatprep.subr.mxu0 %v538_v19 }
 0x17c   : > { %999 = vmatpush1.msra.mxu0 %v537_v20 }
 0x17d   : > { %v523_v28 = vpop.permute.xlu1 %522  ;;  %6761 = vmatmul.mubr.msk.f32.vlgmr.msra.gmra.mrb[6].mxu0 %vm564_vm4, %v7884_v34 }
 0x17e   : > { %v540_v49 = vsel %vm524_vm3, %v521_v25, %v523_v28  ;;  %1474 = vmatprep.mubr.f32.mxu0 %v7499_v44 }
 0x17f   : > { %1069 = vmatprep.subr.mxu1 %v540_v49 }
 0x180   : > { %1070 = vmatpush1.msra.mxu1 %v539_v50 }
 0x181   : > { %6762 = vmatmul.mubr.msk.f32.vlgmr.msra.gmra.mrb[6].mxu1 %vm564_vm4, %v7884_v34 }
 0x182   : > { %1545 = vmatprep.mubr.f32.mxu1 %v7499_v44 }
 0x230   : > { %v634_v30 = vpop.f32.mrb[0].mxu0 }
 0x231   : > { %v635_v32 = vadd.f32 %v634_v30, %v7950_v29  ;;  %v636_v33 = vpop.f32.mrb[1].mxu0 }
 0x232   : > { %v637_v35 = vadd.f32 %v636_v33, %v7950_v29 }
 0x233   : > { %v1152_v23 = vmul.f32 0.01, %v635_v32  ;;  %vm1136_vm5 = vcmp.gt.f32.partialorder %v635_v32, 0.0 }
 0x234   : > { %v1153_v45 = vmul.f32 0.01, %v637_v35  ;;  %vm1137_vm6 = vcmp.gt.f32.partialorder %v637_v35, 0.0 }
 0x235   : > { %v1168_v48 = vsel %vm1136_vm5, %v635_v32, %v1152_v23 }
 0x236   : > { %1201 = vrot.lane.b32.xlu1 %v1168_v48, %s7496_s16  ;;  %v1169_v40 = vsel %vm1137_vm6, %v637_v35, %v1153_v45 }
 0x238   : > { %v705_v36 = vpop.f32.mrb[0].mxu1 }
 0x239   : > { %v706_v34 = vadd.f32 %v705_v36, %v7950_v29  ;;  %v707_v21 = vpop.f32.mrb[1].mxu1 }
 0x23a   : > { %v708_v41 = vadd.f32 %v707_v21, %v7950_v29  ;;  %1203 = vrot.lane.b32.xlu1 %v1169_v40, %s7496_s16 }
 0x23b   : > { %v1154_v42 = vmul.f32 0.01, %v706_v34  ;;  %vm1138_vm7 = vcmp.gt.f32.partialorder %v706_v34, 0.0 }
 0x23c   : > { %v1155_v43 = vmul.f32 0.01, %v708_v41  ;;  %v776_v54 = vpop.f32.mrb[2].mxu0  ;;  %vm1139_vm8 = vcmp.gt.f32.partialorder %v708_v41, 0.0 }
 0x23d   : > { %v777_v46 = vadd.f32 %v776_v54, %v7950_v29  ;;  %v778_v53 = vpop.f32.mrb[3].mxu0  ;;  %v1170_v47 = vsel %vm1138_vm7, %v706_v34, %v1154_v42 }
 0x23e   : > { %v779_v31 = vadd.f32 %v778_v53, %v7950_v29  ;;  %1205 = vrot.lane.b32.xlu0 %v1170_v47, %s7496_s16  ;;  %v1171_v52 = vsel %vm1139_vm8, %v708_v41, %v1155_v43 }
 0x23f   : > { %v1156_v55 = vmul.f32 0.01, %v777_v46  ;;  %1207 = vrot.lane.b32.xlu1 %v1171_v52, %s7496_s16  ;;  %vm1140_vm9 = vcmp.gt.f32.partialorder %v777_v46, 0.0  ;;  %v1184_v52 = vld [vmem:[#allocation3] sm:$0xff] }
 0x240   : > { %v1157_v22 = vmul.f32 0.01, %v779_v31  ;;  %vm1141_vm10 = vcmp.gt.f32.partialorder %v779_v31, 0.0 }
 0x241   : > { %v1172_v39 = vsel %vm1140_vm9, %v777_v46, %v1156_v55 }
 0x242   : > { %1209 = vrot.lane.b32.xlu0 %v1172_v39, %s7496_s16  ;;  %v1173_v58 = vsel %vm1141_vm10, %v779_v31, %v1157_v22 }
 0x243   : > { %1211 = vrot.lane.b32.xlu1 %v1173_v58, %s7496_s16 }
 0x244   : > { %v847_v59 = vpop.f32.mrb[2].mxu1 }
 0x245   : > { %v848_v61 = vadd.f32 %v847_v59, %v7950_v29  ;;  %v849_v62 = vpop.f32.mrb[3].mxu1 }
 0x246   : > { %v850_v51 = vadd.f32 %v849_v62, %v7950_v29 }
 0x247   : > { %v1158_v37 = vmul.f32 0.01, %v848_v61  ;;  %vm1142_vm11 = vcmp.gt.f32.partialorder %v848_v61, 0.0 }
 0x248   : > { %v1159_v38 = vmul.f32 0.01, %v850_v51  ;;  %v918_v63 = vpop.f32.mrb[4].mxu0  ;;  %vm1143_vm12 = vcmp.gt.f32.partialorder %v850_v51, 0.0 }
 0x249   : > { %v919_v16 = vadd.f32 %v918_v63, %v7950_v29  ;;  %v920_v17 = vpop.f32.mrb[5].mxu0  ;;  %v1174_v18 = vsel %vm1142_vm11, %v848_v61, %v1158_v37 }
 0x24a   : > { %v921_v56 = vadd.f32 %v920_v17, %v7950_v29  ;;  %1213 = vrot.lane.b32.xlu0 %v1174_v18, %s7496_s16  ;;  %v1175_v27 = vsel %vm1143_vm12, %v850_v51, %v1159_v38 }
 0x24b   : > { %v1160_v57 = vmul.f32 0.01, %v919_v16  ;;  %1215 = vrot.lane.b32.xlu1 %v1175_v27, %s7496_s16  ;;  %vm1144_vm13 = vcmp.gt.f32.partialorder %v919_v16, 0.0 }
 0x24c   : > { %v1161_v24 = vmul.f32 0.01, %v921_v56  ;;  %v989_v26 = vpop.f32.mrb[4].mxu1  ;;  %vm1145_vm14 = vcmp.gt.f32.partialorder %v921_v56, 0.0 }
 0x24d   : > { %v990_v19 = vadd.f32 %v989_v26, %v7950_v29  ;;  %v991_v20 = vpop.f32.mrb[5].mxu1  ;;  %v1176_v25 = vsel %vm1144_vm13, %v919_v16, %v1160_v57 }
 0x24e   : > { %v992_v28 = vadd.f32 %v991_v20, %v7950_v29  ;;  %1217 = vrot.lane.b32.xlu0 %v1176_v25, %s7496_s16  ;;  %v1177_v49 = vsel %vm1145_vm14, %v921_v56, %v1161_v24 }
 0x24f   : > { %v1162_v50 = vmul.f32 0.01, %v990_v19  ;;  %1219 = vrot.lane.b32.xlu1 %v1177_v49, %s7496_s16  ;;  %vm1146_vm15 = vcmp.gt.f32.partialorder %v990_v19, 0.0 }
 0x250   : > { %v1163_v30 = vmul.f32 0.01, %v992_v28  ;;  %v1060_v32 = vpop.f32.mrb[6].mxu0  ;;  %vm1147_vm0 = vcmp.gt.f32.partialorder %v992_v28, 0.0 }
 0x251   : > { %v1061_v33 = vadd.f32 %v1060_v32, %v7950_v29  ;;  %v1062_v35 = vpop.f32.mrb[7].mxu0  ;;  %v1178_v23 = vsel %vm1146_vm15, %v990_v19, %v1162_v50 }
 0x252   : > { %v1063_v45 = vadd.f32 %v1062_v35, %v7950_v29  ;;  %1221 = vrot.lane.b32.xlu0 %v1178_v23, %s7496_s16  ;;  %v1179_v48 = vsel %vm1147_vm0, %v992_v28, %v1163_v30 }
 0x253   : > { %v1164_v36 = vmul.f32 0.01, %v1061_v33  ;;  %1223 = vrot.lane.b32.xlu1 %v1179_v48, %s7496_s16  ;;  %vm1148_vm5 = vcmp.gt.f32.partialorder %v1061_v33, 0.0 }
 0x254   : > { %v1165_v34 = vmul.f32 0.01, %v1063_v45  ;;  %v1131_v21 = vpop.f32.mrb[6].mxu1  ;;  %vm1149_vm6 = vcmp.gt.f32.partialorder %v1063_v45, 0.0 }
 0x255   : > { %v1132_v40 = vadd.f32 %v1131_v21, %v7950_v29  ;;  %v1133_v41 = vpop.f32.mrb[7].mxu1  ;;  %v1180_v42 = vsel %vm1148_vm5, %v1061_v33, %v1164_v36 }
 0x256   : > { %v1134_v43 = vadd.f32 %v1133_v41, %v7950_v29  ;;  %1225 = vrot.lane.b32.xlu0 %v1180_v42, %s7496_s16  ;;  %v1181_v54 = vsel %vm1149_vm6, %v1063_v45, %v1165_v34 }
 0x257   : > { %v1166_v46 = vmul.f32 0.01, %v1132_v40  ;;  %1227 = vrot.lane.b32.xlu1 %v1181_v54, %s7496_s16  ;;  %vm1150_vm7 = vcmp.gt.f32.partialorder %v1132_v40, 0.0  ;;  %v1401_v54 = vld [vmem:[%s9439_s4] sm:$0xff] }
 0x258   : > { %v1167_v53 = vmul.f32 0.01, %v1134_v43  ;;  %vm1151_vm8 = vcmp.gt.f32.partialorder %v1134_v43, 0.0 }
 0x259   : > { %v1182_v47 = vsel %vm1150_vm7, %v1132_v40, %v1166_v46  ;;  %v2027_v46 = vld [vmem:[%s9441_s6] sm:$0xff] }
 0x25a   : > { %1229 = vrot.lane.b32.xlu0 %v1182_v47, %s7496_s16  ;;  %v1183_v31 = vsel %vm1151_vm8, %v1134_v43, %v1167_v53 }
 0x25b   : > { %1231 = vrot.lane.b32.xlu1 %v1183_v31, %s7496_s16 }
 0x2a8   : > { %v1202_v55 = vpop.permute.xlu1 %1201 }
 0x2a9   : > { %v7985_v22 = vsel %vm387_vm1, %v1184_v52, %v1202_v55 }
 0x2aa   : > { %1334 = vrot.lane.b32.xlu1 %v7985_v22, %s7498_s13 }
 0x2ac   : > { %v1204_v29 = vpop.permute.xlu1 %1203 }
 0x2ad   : > { %v7990_v39 = vsel %vm387_vm1, %v1202_v55, %v1204_v29 }
 0x2ae   : > { %1336 = vrot.lane.b32.xlu1 %v7990_v39, %s7498_s13 }
 0x2b0   : > { %v1206_v58 = vpop.permute.xlu0 %1205 }
 0x2b1   : > { %v7995_v59 = vsel %vm387_vm1, %v1204_v29, %v1206_v58  ;;  %v1208_v61 = vpop.permute.xlu1 %1207 }
 0x2b2   : > { %v7998_v62 = vsel %vm387_vm1, %v1206_v58, %v1208_v61  ;;  %v7160_v51 = vpack.i.bf16 %v7995_v59, %v7990_v39 }
 0x2b3   : > { %1340 = vrot.lane.b32.xlu1 %v7998_v62, %s7498_s13 }
 0x2b4   : > { %v1210_v37 = vpop.permute.xlu0 %1209  ;;  %7161 = vrot.lane.b32.xlu0 %v7160_v51, %s7497_s14 }
 0x2b5   : > { %v8006_v38 = vsel %vm387_vm1, %v1208_v61, %v1210_v37  ;;  %v1212_v16 = vpop.permute.xlu1 %1211 }
 0x2b6   : > { %v7165_v63 = vpack.i.bf16 %v8006_v38, %v7998_v62  ;;  %v8014_v17 = vsel %vm387_vm1, %v1210_v37, %v1212_v16 }
 0x2b7   : > { %v7170_v24 = vpack.i.bf16 %v8014_v17, %v7985_v22 }
 0x2b8   : > { %1338 = vrot.lane.b32.xlu0 %v7995_v59, %s7498_s13  ;;  %7166 = vrot.lane.b32.xlu1 %v7165_v63, %s7497_s14 }
 0x2bc   : > { %v1214_v18 = vpop.permute.xlu0 %1213  ;;  %1342 = vrot.lane.b32.xlu0 %v8006_v38, %s7498_s13 }
 0x2bd   : > { %v8019_v56 = vsel %vm387_vm1, %v1212_v16, %v1214_v18  ;;  %v1216_v27 = vpop.permute.xlu1 %1215 }
 0x2be   : > { %v8022_v57 = vsel %vm387_vm1, %v1214_v18, %v1216_v27 }
 0x2bf   : > { %v7175_v26 = vpack.i.bf16 %v8022_v57, %v8019_v56 }
 0x2c0   : > { %7171 = vrot.lane.b32.xlu0 %v7170_v24, %s7497_s14  ;;  %v1218_v19 = vpop.permute.xlu0 %1217 }
 0x2c1   : > { %7176 = vrot.lane.b32.xlu1 %v7175_v26, %s7497_s14  ;;  %v1220_v20 = vpop.permute.xlu1 %1219  ;;  %v8038_v50 = vsel %vm387_vm1, %v1216_v27, %v1218_v19 }
 0x2c2   : > { %v8035_v28 = vsel %vm387_vm1, %v1218_v19, %v1220_v20 }
 0x2c3   : > { %v7180_v32 = vpack.i.bf16 %v8035_v28, %v8038_v50 }
 0x2c4   : > { %1344 = vrot.lane.b32.xlu0 %v8014_v17, %s7498_s13  ;;  %v1222_v49 = vpop.permute.xlu0 %1221 }
 0x2c5   : > { %1346 = vrot.lane.b32.xlu1 %v8019_v56, %s7498_s13  ;;  %v1224_v25 = vpop.permute.xlu1 %1223  ;;  %v8050_v35 = vsel %vm387_vm1, %v1220_v20, %v1222_v49 }
 0x2c6   : > { %v8047_v33 = vsel %vm387_vm1, %v1222_v49, %v1224_v25 }
 0x2c7   : > { %v7185_v48 = vpack.i.bf16 %v8047_v33, %v8050_v35 }
 0x2c8   : > { %1348 = vrot.lane.b32.xlu0 %v8022_v57, %s7498_s13  ;;  %v1226_v23 = vpop.permute.xlu0 %1225 }
 0x2c9   : > { %1350 = vrot.lane.b32.xlu1 %v8038_v50, %s7498_s13  ;;  %v1228_v30 = vpop.permute.xlu1 %1227  ;;  %v8059_v36 = vsel %vm387_vm1, %v1224_v25, %v1226_v23 }
 0x2ca   : > { %v8062_v34 = vsel %vm387_vm1, %v1226_v23, %v1228_v30 }
 0x2cb   : > { %v7190_v21 = vpack.i.bf16 %v8062_v34, %v8059_v36 }
 0x2cc   : > { %7181 = vrot.lane.b32.xlu0 %v7180_v32, %s7497_s14  ;;  %v1230_v40 = vpop.permute.xlu0 %1229 }
 0x2cd   : > { %1354 = vrot.lane.b32.xlu1 %v8050_v35, %s7498_s13  ;;  %v1232_v45 = vpop.permute.xlu1 %1231  ;;  %v8072_v41 = vsel %vm387_vm1, %v1228_v30, %v1230_v40  ;;  %v8107_v30 = vld [vmem:[%s9438_s3] sm:$0xff] }
 0x2ce   : > { %1266 = vst.msk [vmem:[#allocation3] sm:$0xff] %vm387_vm1, %v1232_v45  ;;  %v8075_v42 = vsel %vm387_vm1, %v1230_v40, %v1232_v45  ;;  %vm2033_vm1 = vcmask 64512  }
 0x2cf   : > { %v7195_v43 = vpack.i.bf16 %v8075_v42, %v8072_v41 }
 0x2d0   : > { %7186 = vrot.lane.b32.xlu0 %v7185_v48, %s7497_s14 }
 0x2d1   : > { %1300 = vrot.lane.b32.xlu1 %v1232_v45, %s7497_s14 }
 0x2d4   : > { %1352 = vrot.lane.b32.xlu0 %v8035_v28, %s7498_s13 }
 0x2d5   : > { %7191 = vrot.lane.b32.xlu1 %v7190_v21, %s7497_s14 }
 0x2d8   : > { %1356 = vrot.lane.b32.xlu0 %v8047_v33, %s7498_s13 }
 0x2d9   : > { %1358 = vrot.lane.b32.xlu1 %v8059_v36, %s7498_s13 }
 0x2dc   : > { %7196 = vrot.lane.b32.xlu0 %v7195_v43, %s7497_s14 }
 0x2dd   : > { %1362 = vrot.lane.b32.xlu1 %v8072_v41, %s7498_s13 }
 0x2e0   : > { %1360 = vrot.lane.b32.xlu0 %v8062_v34, %s7498_s13 }
 0x2e1   : > { %1366 = vrot.lane.b32.xlu1 %v1232_v45, %s7498_s13 }
 0x2e4   : > { %1364 = vrot.lane.b32.xlu0 %v8075_v42, %s7498_s13 }
 0x2e5   : > { %2030 = vperm.xlu1 %7200, %v2027_v46  }
 0x2e8   : > { %1404 = vperm.xlu0 %7159, %v1401_v54  }
 0x31c   : > { %v1335_v53 = vpop.permute.xlu1 %1334 }
 0x320   : > { %v1337_v47 = vpop.permute.xlu1 %1336 }
 0x325   : > { %v1341_v31 = vpop.permute.xlu1 %1340 }
 0x326   : > { %v7162_v52 = vpop.permute.xlu0 %7161 }
 0x327   : > { %v7164_v55 = vunpack.i.h.bf16 %v7162_v52  ;;  %v7163_v29 = vunpack.i.l.bf16 %v7162_v52 }
 0x329   : > { %v1303_v58 = vsel %vm457_vm2, %v7163_v29, %v7164_v55 }
 0x32a   : > { %v1339_v61 = vpop.permute.xlu0 %1338  ;;  %v7167_v51 = vpop.permute.xlu1 %7166  ;;  %v6869_v37 = vpack.c.bf16 %v1303_v58, %v7990_v39 }
 0x32b   : > { %v7169_v63 = vunpack.i.h.bf16 %v7167_v51  ;;  %v7168_v16 = vunpack.i.l.bf16 %v7167_v51  ;;  %v1370_v32 = vsel %vm524_vm3, %v1339_v61, %v1341_v31  ;;  %v1369_v40 = vsel %vm524_vm3, %v1337_v47, %v1339_v61 }
 0x32c   : > { %6870 = vmatprep.subr.bf16.mxu0 %v6869_v37 }
 0x32d   : > { %v1304_v18 = vsel %vm457_vm2, %v7164_v55, %v7168_v16  ;;  %v1305_v27 = vsel %vm457_vm2, %v7168_v16, %v7169_v63 }
 0x32e   : > { %v6875_v24 = vpack.c.bf16 %v1304_v18, %v7995_v59  ;;  %v1343_v26 = vpop.permute.xlu0 %1342  ;;  %v6873_v19 = vpack.c.bf16 %v1305_v27, %v7998_v62 }
 0x32f   : > { %v1371_v20 = vsel %vm524_vm3, %v1341_v31, %v1343_v26  ;;  %v1368_v31 = vsel %vm524_vm3, %v1335_v53, %v1337_v47 }
 0x330   : > { %6874 = vmatprep.subr.bf16.mxu1 %v6873_v19 }
 0x331   : > { %6876 = vmatpush1.bf16.msra.mxu1 %v6875_v24 }
 0x332   : > { %v7172_v25 = vpop.permute.xlu0 %7171  ;;  %1485 = vmatprep.subr.mxu1 %v1371_v20 }
 0x333   : > { %v7173_v49 = vunpack.i.l.bf16 %v7172_v25  ;;  %v7177_v39 = vpop.permute.xlu1 %7176  ;;  %v7174_v23 = vunpack.i.h.bf16 %v7172_v25 }
 0x334   : > { %v7178_v59 = vunpack.i.l.bf16 %v7177_v39 }
 0x335   : > { %v1302_v45 = vsel %vm457_vm2, %v7173_v49, %v7163_v29  ;;  %1486 = vmatpush1.msra.mxu1 %v1370_v32  ;;  %v1306_v54 = vsel %vm457_vm2, %v7169_v63, %v7174_v23  ;;  %v7179_v29 = vunpack.i.h.bf16 %v7177_v39 }
 0x336   : > { %v6871_v62 = vpack.c.bf16 %v1302_v45, %v7985_v22  ;;  %v1345_v48 = vpop.permute.xlu0 %1344  ;;  %6764 = vmatmul.mubr.msk.f32.vlgmr.msra.gmra.mrb[8].mxu1 %vm564_vm4, %v8107_v30  ;;  %v1307_v43 = vsel %vm457_vm2, %v7174_v23, %v7178_v59  ;;  %v6879_v55 = vpack.c.bf16 %v1306_v54, %v8006_v38 }
 0x337   : > { %v1347_v21 = vpop.permute.xlu1 %1346  ;;  %1687 = vmatprep.mubr.f32.mxu1 %v7499_v44  ;;  %v6877_v22 = vpack.c.bf16 %v1307_v43, %v8014_v17  ;;  %v1308_v53 = vsel %vm457_vm2, %v7178_v59, %v7179_v29  ;;  %v1372_v38 = vsel %vm524_vm3, %v1343_v26, %v1345_v48 }
 0x338   : > { %6872 = vmatpush1.bf16.msra.mxu0 %v6871_v62  ;;  %v1373_v61 = vsel %vm524_vm3, %v1345_v48, %v1347_v21  ;;  %v6883_v18 = vpack.c.bf16 %v1308_v53, %v8019_v56 }
 0x339   : > { %1414 = vmatprep.subr.mxu0 %v1369_v40 }
 0x33a   : > { %v1349_v46 = vpop.permute.xlu0 %1348 }
 0x33b   : > { %v1351_v52 = vpop.permute.xlu1 %1350  ;;  %v1374_v32 = vsel %vm524_vm3, %v1347_v21, %v1349_v46 }
 0x33c   : > { %1415 = vmatpush1.msra.mxu0 %v1368_v31  ;;  %v1375_v26 = vsel %vm524_vm3, %v1349_v46, %v1351_v52 }
 0x33d   : > { %6763 = vmatmul.mubr.msk.f32.vlgmr.msra.gmra.mrb[8].mxu0 %vm564_vm4, %v8107_v30  ;;  %6878 = vmatprep.subr.bf16.mxu0 %v6877_v22 }
 0x33e   : > { %v7182_v58 = vpop.permute.xlu0 %7181  ;;  %6880 = vmatpush1.bf16.msra.mxu0 %v6879_v55  ;;  %1616 = vmatprep.mubr.f32.mxu0 %v7499_v44 }
 0x33f   : > { %v7183_v51 = vunpack.i.l.bf16 %v7182_v58  ;;  %v1355_v37 = vpop.permute.xlu1 %1354  ;;  %1556 = vmatprep.subr.mxu0 %v1373_v61  ;;  %v7184_v17 = vunpack.i.h.bf16 %v7182_v58 }
 0x341   : > { %v1309_v47 = vsel %vm457_vm2, %v7179_v29, %v7183_v51  ;;  %v1310_v19 = vsel %vm457_vm2, %v7183_v51, %v7184_v17 }
 0x342   : > { %v7187_v63 = vpop.permute.xlu0 %7186  ;;  %1557 = vmatpush1.msra.mxu0 %v1372_v38  ;;  %v6881_v16 = vpack.c.bf16 %v1309_v47, %v8022_v57  ;;  %v6887_v57 = vpack.c.bf16 %v1310_v19, %v8038_v50 }
 0x343   : > { %v7188_v27 = vunpack.i.l.bf16 %v7187_v63  ;;  %v1301_v24 = vpop.permute.xlu1 %1300  ;;  %6765 = vmatmul.mubr.msk.f32.vlgmr.msra.gmra.mrb[10].mxu0 %vm564_vm4, %v8107_v30  ;;  %v7189_v20 = vunpack.i.h.bf16 %v7187_v63 }
 0x344   : > { %6882 = vmatprep.subr.bf16.mxu1 %v6881_v16  ;;  %1758 = vmatprep.mubr.f32.mxu0 %v7499_v44 }
 0x345   : > { %6884 = vmatpush1.bf16.msra.mxu1 %v6883_v18  ;;  %v1311_v25 = vsel %vm457_vm2, %v7184_v17, %v7188_v27  ;;  %v1312_v59 = vsel %vm457_vm2, %v7188_v27, %v7189_v20 }
 0x346   : > { %v1353_v49 = vpop.permute.xlu0 %1352  ;;  %1627 = vmatprep.subr.mxu1 %v1375_v26  ;;  %v6885_v56 = vpack.c.bf16 %v1311_v25, %v8035_v28  ;;  %v6891_v21 = vpack.c.bf16 %v1312_v59, %v8050_v35 }
 0x347   : > { %v7192_v39 = vpop.permute.xlu1 %7191  ;;  %v1377_v45 = vsel %vm524_vm3, %v1353_v49, %v1355_v37  ;;  %v1376_v40 = vsel %vm524_vm3, %v1351_v52, %v1353_v49 }
 0x348   : > { %v7193_v23 = vunpack.i.l.bf16 %v7192_v39  ;;  %6886 = vmatprep.subr.bf16.mxu0 %v6885_v56  ;;  %v7194_v43 = vunpack.i.h.bf16 %v7192_v39 }
 0x349   : > { %1628 = vmatpush1.msra.mxu1 %v1374_v32  ;;  %6888 = vmatpush1.bf16.msra.mxu0 %v6887_v57 }
 0x34a   : > { %v1357_v62 = vpop.permute.xlu0 %1356  ;;  %6766 = vmatmul.mubr.msk.f32.vlgmr.msra.gmra.mrb[10].mxu1 %vm564_vm4, %v8107_v30  ;;  %1698 = vmatprep.subr.mxu0 %v1377_v45  ;;  %v1313_v28 = vsel %vm457_vm2, %v7189_v20, %v7193_v23 }
 0x34b   : > { %v1359_v48 = vpop.permute.xlu1 %1358  ;;  %v6889_v50 = vpack.c.bf16 %v1313_v28, %v8047_v33  ;;  %1829 = vmatprep.mubr.f32.mxu1 %v7499_v44  ;;  %v1314_v33 = vsel %vm457_vm2, %v7193_v23, %v7194_v43  ;;  %v1378_v52 = vsel %vm524_vm3, %v1355_v37, %v1357_v62 }
 0x34c   : > { %v1379_v46 = vsel %vm524_vm3, %v1357_v62, %v1359_v48  ;;  %v6895_v38 = vpack.c.bf16 %v1314_v33, %v8059_v36 }
 0x34d   : > { %1699 = vmatpush1.msra.mxu0 %v1376_v40  ;;  %6890 = vmatprep.subr.bf16.mxu1 %v6889_v50 }
 0x34e   : > { %v7197_v54 = vpop.permute.xlu0 %7196  ;;  %6767 = vmatmul.mubr.msk.f32.vlgmr.msra.gmra.mrb[12].mxu0 %vm564_vm4, %v8107_v30  ;;  %6892 = vmatpush1.bf16.msra.mxu1 %v6891_v21 }
 0x34f   : > { %v7199_v31 = vunpack.i.h.bf16 %v7197_v54  ;;  %v7198_v22 = vunpack.i.l.bf16 %v7197_v54  ;;  %1769 = vmatprep.subr.mxu1 %v1379_v46  ;;  %1900 = vmatprep.mubr.f32.mxu0 %v7499_v44  ;;  %v1363_v35 = vpop.permute.xlu1 %1362 }
 0x351   : > { %v1316_v55 = vsel %vm457_vm2, %v7198_v22, %v7199_v31  ;;  %v1315_v29 = vsel %vm457_vm2, %v7194_v43, %v7198_v22  ;;  %v1317_v58 = vsel %vm457_vm2, %v7199_v31, %v1301_v24 }
 0x352   : > { %v6899_v61 = vpack.c.bf16 %v1316_v55, %v8072_v41  ;;  %v1361_v51 = vpop.permute.xlu0 %1360  ;;  %1770 = vmatpush1.msra.mxu1 %v1378_v52  ;;  %v6893_v53 = vpack.c.bf16 %v1315_v29, %v8062_v34  ;;  %v6897_v17 = vpack.c.bf16 %v1317_v58, %v8075_v42  ;;  %v2026_v42 = vld [vmem:[%s9440_s5] sm:$0xff] }
 0x353   : > { %6768 = vmatmul.mubr.msk.f32.vlgmr.msra.gmra.mrb[12].mxu1 %vm564_vm4, %v8107_v30  ;;  %v1381_v37 = vsel %vm524_vm3, %v1361_v51, %v1363_v35  ;;  %v1367_v47 = vpop.permute.xlu1 %1366  ;;  %v1380_v36 = vsel %vm524_vm3, %v1359_v48, %v1361_v51 }
 0x354   : > { %6894 = vmatprep.subr.bf16.mxu0 %v6893_v53  ;;  %6898 = vmatprep.subr.bf16.mxu1 %v6897_v17 }
 0x355   : > { %6896 = vmatpush1.bf16.msra.mxu0 %v6895_v38  ;;  %6900 = vmatpush1.bf16.msra.mxu1 %v6899_v61 }
 0x356   : > { %v1365_v63 = vpop.permute.xlu0 %1364  ;;  %1840 = vmatprep.subr.mxu0 %v1381_v37  ;;  %1971 = vmatprep.mubr.f32.mxu1 %v7499_v44 }
 0x357   : > { %v1382_v34 = vsel %vm524_vm3, %v1363_v35, %v1365_v63  ;;  %v1383_v41 = vsel %vm524_vm3, %v1365_v63, %v1367_v47 }
 0x358   : > { %1911 = vmatprep.subr.mxu1 %v1383_v41 }
 0x359   : > { %1841 = vmatpush1.msra.mxu0 %v1380_v36  ;;  %1912 = vmatpush1.msra.mxu1 %v1382_v34 }
 0x35a   : > { %6769 = vmatmul.mubr.msk.f32.vlgmr.msra.gmra.mrb[14].mxu0 %vm564_vm4, %v8107_v30  ;;  %6770 = vmatmul.mubr.msk.f32.vlgmr.msra.gmra.mrb[14].mxu1 %vm564_vm4, %v8107_v30 }
 0x35b   : > { %2037 = vmatprep.subr.mxu0 %v7685_v1  ;;  %2108 = vmatprep.subr.mxu1 %v7689_v3 }
 0x35c   : > { %2038 = vmatpush1.msra.mxu0 %v7683_v0  ;;  %2109 = vmatpush1.msra.mxu1 %v7687_v2 }
 0x35d   : > { %2101 = vmatprep.mubr.f32.mxu0 %v7499_v44  ;;  %2172 = vmatprep.mubr.f32.mxu1 %v7499_v44 }
 0x35e   : > { %6771 = vmatmul.mubr.msk.f32.vlgmr.msra.gmra.mrb[16].mxu0 %vm2033_vm1, %v2026_v42  ;;  %6772 = vmatmul.mubr.msk.f32.vlgmr.msra.gmra.mrb[16].mxu1 %vm2033_vm1, %v2026_v42 }
 0x35f   : > { %2179 = vmatprep.subr.mxu0 %v7693_v5  ;;  %2250 = vmatprep.subr.mxu1 %v7697_v7 }
 0x360   : > { %2180 = vmatpush1.msra.mxu0 %v7691_v4  ;;  %2251 = vmatpush1.msra.mxu1 %v7695_v6 }
 0x361   : > { %2243 = vmatprep.mubr.f32.mxu0 %v7499_v44  ;;  %2314 = vmatprep.mubr.f32.mxu1 %v7499_v44 }
 0x362   : > { %6773 = vmatmul.mubr.msk.f32.vlgmr.msra.gmra.mrb[18].mxu0 %vm2033_vm1, %v2026_v42  ;;  %6774 = vmatmul.mubr.msk.f32.vlgmr.msra.gmra.mrb[18].mxu1 %vm2033_vm1, %v2026_v42 }
 0x363   : > { %2321 = vmatprep.subr.mxu0 %v7701_v9  ;;  %2392 = vmatprep.subr.mxu1 %v7705_v11 }
 0x364   : > { %2322 = vmatpush1.msra.mxu0 %v7699_v8  ;;  %2393 = vmatpush1.msra.mxu1 %v7703_v10  ;;  %v8221_v40 = vpop.permute.xlu1 %2030 }
 0x365   : > { %2385 = vmatprep.mubr.f32.mxu0 %v7499_v44  ;;  %2456 = vmatprep.mubr.f32.mxu1 %v7499_v44 }
 0x366   : > { %6775 = vmatmul.mubr.msk.f32.vlgmr.msra.gmra.mrb[20].mxu0 %vm2033_vm1, %v2026_v42  ;;  %6776 = vmatmul.mubr.msk.f32.vlgmr.msra.gmra.mrb[20].mxu1 %vm2033_vm1, %v2026_v42 }
 0x367   : > { %2463 = vmatprep.subr.mxu0 %v7709_v13  ;;  %2534 = vmatprep.subr.mxu1 %v7713_v15  ;;  %v8207_v10 = vpop.permute.xlu0 %1404 }
 0x368   : > { %2464 = vmatpush1.msra.mxu0 %v7707_v12  ;;  %2535 = vmatpush1.msra.mxu1 %v7711_v14 }
 0x369   : > { %2527 = vmatprep.mubr.f32.mxu0 %v7499_v44  ;;  %2598 = vmatprep.mubr.f32.mxu1 %v7499_v44 }
 0x36a   : > { %6777 = vmatmul.mubr.msk.f32.vlgmr.msra.gmra.mrb[22].mxu0 %vm2033_vm1, %v2026_v42  ;;  %6778 = vmatmul.mubr.msk.f32.vlgmr.msra.gmra.mrb[22].mxu1 %vm2033_vm1, %v2026_v42 }
 0x409   : > { %v1547_v0 = vpop.f32.mrb[8].mxu1 }
 0x40a   : > { %v1549_v1 = vpop.f32.mrb[9].mxu1  ;;  %v1548_v11 = vadd.f32 %v1547_v0, %v8207_v10 }
 0x40b   : > { %v1550_v13 = vadd.f32 %v1549_v1, %v8207_v10 }
 0x40c   : > { %vm1980_vm2 = vcmp.gt.f32.partialorder %v1548_v11, 0.0  ;;  %v1996_v27 = vmul.f32 0.01, %v1548_v11 }
 0x40d   : > { %vm1981_vm9 = vcmp.gt.f32.partialorder %v1550_v13, 0.0  ;;  %v1997_v20 = vmul.f32 0.01, %v1550_v13 }
 0x40e   : > { %v2012_v43 = vsel %vm1980_vm2, %v1548_v11, %v1996_v27 }
 0x40f   : > { %v2013_v54 = vsel %vm1981_vm9, %v1550_v13, %v1997_v20 }
 0x410   : > { %v1476_v2 = vpop.f32.mrb[8].mxu0 }
 0x411   : > { %v1478_v3 = vpop.f32.mrb[9].mxu0  ;;  %v1477_v14 = vadd.f32 %v1476_v2, %v8207_v10 }
 0x412   : > { %v1479_v30 = vadd.f32 %v1478_v3, %v8207_v10 }
 0x413   : > { %v1994_v26 = vmul.f32 0.01, %v1477_v14  ;;  %vm1978_vm10 = vcmp.gt.f32.partialorder %v1477_v14, 0.0 }
 0x414   : > { %vm1979_vm11 = vcmp.gt.f32.partialorder %v1479_v30, 0.0  ;;  %v1995_v49 = vmul.f32 0.01, %v1479_v30 }
 0x415   : > { %v2010_v46 = vsel %vm1978_vm10, %v1477_v14, %v1994_v26 }
 0x416   : > { %v1618_v4 = vpop.f32.mrb[10].mxu0  ;;  %v2011_v31 = vsel %vm1979_vm11, %v1479_v30, %v1995_v49  ;;  %vm2624_vm11 = vcmask (!%p6754_p8), 31744  }
 0x417   : > { %v1620_v5 = vpop.f32.mrb[11].mxu0  ;;  %v1619_v16 = vadd.f32 %v1618_v4, %v8207_v10 }
 0x418   : > { %v1621_v18 = vadd.f32 %v1620_v5, %v8207_v10 }
 0x419   : > { %v1998_v56 = vmul.f32 0.01, %v1619_v16  ;;  %vm1982_vm12 = vcmp.gt.f32.partialorder %v1619_v16, 0.0 }
 0x41a   : > { %vm1983_vm13 = vcmp.gt.f32.partialorder %v1621_v18, 0.0  ;;  %v1999_v57 = vmul.f32 0.01, %v1621_v18 }
 0x41b   : > { %v2014_v22 = vsel %vm1982_vm12, %v1619_v16, %v1998_v56 }
 0x41c   : > { %v2015_v33 = vsel %vm1983_vm13, %v1621_v18, %v1999_v57 }
 0x41d   : > { %v1689_v6 = vpop.f32.mrb[10].mxu1 }
 0x41e   : > { %v1691_v7 = vpop.f32.mrb[11].mxu1  ;;  %v1690_v24 = vadd.f32 %v1689_v6, %v8207_v10 }
 0x41f   : > { %v1692_v19 = vadd.f32 %v1691_v7, %v8207_v10 }
 0x420   : > { %v2000_v23 = vmul.f32 0.01, %v1690_v24  ;;  %vm1984_vm14 = vcmp.gt.f32.partialorder %v1690_v24, 0.0 }
 0x421   : > { %v1760_v8 = vpop.f32.mrb[12].mxu0  ;;  %v2001_v59 = vmul.f32 0.01, %v1692_v19  ;;  %vm1985_vm15 = vcmp.gt.f32.partialorder %v1692_v19, 0.0 }
 0x422   : > { %v1762_v9 = vpop.f32.mrb[13].mxu0  ;;  %v1761_v25 = vadd.f32 %v1760_v8, %v8207_v10  ;;  %v2016_v29 = vsel %vm1984_vm14, %v1690_v24, %v2000_v23 }
 0x423   : > { %v1763_v45 = vadd.f32 %v1762_v9, %v8207_v10  ;;  %v2017_v58 = vsel %vm1985_vm15, %v1692_v19, %v2001_v59 }
 0x424   : > { %v2002_v48 = vmul.f32 0.01, %v1761_v25  ;;  %vm1986_vm0 = vcmp.gt.f32.partialorder %v1761_v25, 0.0 }
 0x425   : > { %vm1987_vm5 = vcmp.gt.f32.partialorder %v1763_v45, 0.0  ;;  %v2003_v35 = vmul.f32 0.01, %v1763_v45 }
 0x426   : > { %v1831_v12 = vpop.f32.mrb[12].mxu1  ;;  %v2018_v38 = vsel %vm1986_vm0, %v1761_v25, %v2002_v48 }
 0x427   : > { %v1833_v15 = vpop.f32.mrb[13].mxu1  ;;  %v1832_v50 = vadd.f32 %v1831_v12, %v8207_v10  ;;  %v2019_v12 = vsel %vm1987_vm5, %v1763_v45, %v2003_v35 }
 0x428   : > { %v1834_v21 = vadd.f32 %v1833_v15, %v8207_v10 }
 0x429   : > { %vm1988_vm6 = vcmp.gt.f32.partialorder %v1832_v50, 0.0  ;;  %v2004_v37 = vmul.f32 0.01, %v1832_v50 }
 0x42a   : > { %vm1989_vm7 = vcmp.gt.f32.partialorder %v1834_v21, 0.0  ;;  %v2005_v34 = vmul.f32 0.01, %v1834_v21 }
 0x42b   : > { %v2020_v24 = vsel %vm1988_vm6, %v1832_v50, %v2004_v37 }
 0x42c   : > { %v2021_v20 = vsel %vm1989_vm7, %v1834_v21, %v2005_v34 }
 0x42d   : > { %v1902_v39 = vpop.f32.mrb[14].mxu0  ;;  %v1973_v32 = vpop.f32.mrb[14].mxu1 }
 0x42e   : > { %v1904_v62 = vpop.f32.mrb[15].mxu0  ;;  %v1975_v28 = vpop.f32.mrb[15].mxu1  ;;  %v1903_v41 = vadd.f32 %v1902_v39, %v8207_v10  ;;  %v1974_v8 = vadd.f32 %v1973_v32, %v8207_v10 }
 0x42f   : > { %v1905_v13 = vadd.f32 %v1904_v62, %v8207_v10  ;;  %v1976_v14 = vadd.f32 %v1975_v28, %v8207_v10 }
 0x430   : > { %vm1990_vm8 = vcmp.gt.f32.partialorder %v1903_v41, 0.0  ;;  %v2006_v26 = vmul.f32 0.01, %v1903_v41  ;;  %vm1992_vm2 = vcmp.gt.f32.partialorder %v1974_v8, 0.0  ;;  %v2008_v57 = vmul.f32 0.01, %v1974_v8 }
 0x431   : > { %v2103_v52 = vpop.f32.mrb[16].mxu0  ;;  %v2174_v55 = vpop.f32.mrb[16].mxu1  ;;  %v2007_v23 = vmul.f32 0.01, %v1905_v13  ;;  %v2009_v59 = vmul.f32 0.01, %v1976_v14 }
 0x432   : > { %v2104_v61 = vadd.f32 %v2103_v52, %v8221_v40  ;;  %v2175_v51 = vadd.f32 %v2174_v55, %v8221_v40  ;;  %v2105_v53 = vpop.f32.mrb[17].mxu0  ;;  %v2176_v17 = vpop.f32.mrb[17].mxu1  ;;  %vm1991_vm9 = vcmp.gt.f32.partialorder %v1905_v13, 0.0  ;;  %vm1993_vm10 = vcmp.gt.f32.partialorder %v1976_v14, 0.0 }
 0x433   : > { %v2106_v47 = vadd.f32 %v2105_v53, %v8221_v40  ;;  %v2177_v63 = vadd.f32 %v2176_v17, %v8221_v40  ;;  %v7501_v17 = vmov (!%p6754_p8), 0.0  }
 0x434   : > { %v8237_v36 = vadd.f32 %v2104_v61, %v2010_v46  ;;  %v8239_v42 = vadd.f32 %v2175_v51, %v2012_v43  ;;  %v2025_v61 = vsel %vm1993_vm10, %v1976_v14, %v2009_v59  ;;  %2625 = vst.msk [vmem:[#allocation4] sm:$0xff] (!%p6754_p8), %vm2624_vm11, %v7501_v17  ;;  %2626 = vst.msk [vmem:[#allocation5] sm:$0xff] (!%p6754_p8), %vm2624_vm11, %v7501_v17 }
 0x435   : > { %v2245_v0 = vpop.f32.mrb[18].mxu0  ;;  %v2316_v1 = vpop.f32.mrb[18].mxu1  ;;  %v8241_v2 = vadd.f32 %v2106_v47, %v2011_v31  ;;  %v8243_v3 = vadd.f32 %v2177_v63, %v2013_v54 }
 0x436   : > { %v2246_v4 = vadd.f32 %v2245_v0, %v8221_v40  ;;  %v2317_v5 = vadd.f32 %v2316_v1, %v8221_v40  ;;  %v2247_v6 = vpop.f32.mrb[19].mxu0  ;;  %v2318_v7 = vpop.f32.mrb[19].mxu1 }
 0x437   : > { %v2248_v9 = vadd.f32 %v2247_v6, %v8221_v40  ;;  %v2319_v11 = vadd.f32 %v2318_v7, %v8221_v40 }
 0x438   : > { %v8253_v15 = vadd.f32 %v2246_v4, %v2014_v22  ;;  %v8255_v30 = vadd.f32 %v2317_v5, %v2016_v29  ;;  %v2022_v22 = vsel %vm1990_vm8, %v1903_v41, %v2006_v26 }
 0x439   : > { %v8257_v16 = vadd.f32 %v2248_v9, %v2015_v33  ;;  %v8259_v18 = vadd.f32 %v2319_v11, %v2017_v58  ;;  %v2387_v27 = vpop.f32.mrb[20].mxu0  ;;  %v2458_v19 = vpop.f32.mrb[20].mxu1  ;;  %v2024_v33 = vsel %vm1992_vm2, %v1974_v8, %v2008_v57  ;;  %v2023_v58 = vsel %vm1991_vm9, %v1905_v13, %v2007_v23 }
 0x43a   : > { %v2388_v25 = vadd.f32 %v2387_v27, %v8221_v40  ;;  %v2459_v10 = vadd.f32 %v2458_v19, %v8221_v40  ;;  %v2389_v49 = vpop.f32.mrb[21].mxu0  ;;  %v2460_v56 = vpop.f32.mrb[21].mxu1 }
 0x43b   : > { %v2390_v39 = vadd.f32 %v2389_v49, %v8221_v40  ;;  %v2461_v32 = vadd.f32 %v2460_v56, %v8221_v40  ;;  %2623 = sbr.rel (%p6754_p8) target bundleno = 1090 (0x442), region = 60 }
 0x43c   : > { %v8267_v45 = vadd.f32 %v2388_v25, %v2018_v38  ;;  %v8269_v62 = vadd.f32 %v2459_v10, %v2020_v24 }
 0x43d   : > { %v8271_v28 = vadd.f32 %v2390_v39, %v2019_v12  ;;  %v8273_v48 = vadd.f32 %v2461_v32, %v2021_v20  ;;  %v2529_v50 = vpop.f32.mrb[22].mxu0  ;;  %v2600_v21 = vpop.f32.mrb[22].mxu1 }
 0x43e   : > { %v2530_v43 = vadd.f32 %v2529_v50, %v8221_v40  ;;  %v2601_v54 = vadd.f32 %v2600_v21, %v8221_v40  ;;  %v2531_v46 = vpop.f32.mrb[23].mxu0  ;;  %v2602_v31 = vpop.f32.mrb[23].mxu1 }
 0x43f   : > { %v2532_v35 = vadd.f32 %v2531_v46, %v8221_v40  ;;  %v2603_v52 = vadd.f32 %v2602_v31, %v8221_v40 }
 0x440   : > { %v8281_v55 = vadd.f32 %v2530_v43, %v2022_v22  ;;  %v8283_v29 = vadd.f32 %v2601_v54, %v2024_v33 }
 0x441   : > { %v8287_v51 = vadd.f32 %v2532_v35, %v2023_v58  ;;  %v8289_v53 = vadd.f32 %v2603_v52, %v2025_v61 }
 0x442 PF: > { %2921 = vmatprep.mubr.f32.mxu0 %v7499_v44  ;;  %2992 = vmatprep.mubr.f32.mxu1 %v7499_v44  ;;  %s7502_s10 = smov 4   ;;  %vm2676_vm12 = vcmask 31744   ;;  %s7503_s21 = smov 124   ;;  %v2627_v12 = vld [vmem:[#allocation4] sm:$0xff]  ;;  %v6781_v35 = vld [vmem:[%s9437_s2 + $0x8] sm:$0xff]  ;;  %vm2812_vm13 = vcmask 1014784  }
 0x443   : > { %2648 = vrot.lane.b32.xlu1 %v8239_v42, %s7502_s10  ;;  %2644 = vrot.lane.b32.xlu0 %v8237_v36, %s7502_s10 }
 0x444   : > { %7241 = vset.pattern.permute.xlu0 %v7500_v60 }
 0x447   : > { %2650 = vrot.lane.b32.xlu1 %v8243_v3, %s7502_s10  ;;  %2646 = vrot.lane.b32.xlu0 %v8241_v2, %s7502_s10 }
 0x44b   : > { %2654 = vrot.lane.b32.xlu1 %v8257_v16, %s7502_s10  ;;  %2652 = vrot.lane.b32.xlu0 %v8253_v15, %s7502_s10 }
 0x44f   : > { %2658 = vrot.lane.b32.xlu1 %v8259_v18, %s7502_s10  ;;  %2656 = vrot.lane.b32.xlu0 %v8255_v30, %s7502_s10 }
 0x453   : > { %2662 = vrot.lane.b32.xlu1 %v8271_v28, %s7502_s10  ;;  %2660 = vrot.lane.b32.xlu0 %v8267_v45, %s7502_s10 }
 0x457   : > { %2666 = vrot.lane.b32.xlu1 %v8273_v48, %s7502_s10  ;;  %2664 = vrot.lane.b32.xlu0 %v8269_v62, %s7502_s10 }
 0x45b   : > { %2670 = vrot.lane.b32.xlu1 %v8287_v51, %s7502_s10  ;;  %2668 = vrot.lane.b32.xlu0 %v8281_v55, %s7502_s10 }
 0x45f   : > { %2674 = vrot.lane.b32.xlu1 %v8289_v53, %s7502_s10  ;;  %2672 = vrot.lane.b32.xlu0 %v8283_v29, %s7502_s10 }
 0x4b5   : > { %v2649_v40 = vpop.permute.xlu1 %2648  ;;  %v2645_v38 = vpop.permute.xlu0 %2644 }
 0x4b6   : > { %v8349_v13 = vsel %vm2676_vm12, %v2627_v12, %v2645_v38 }
 0x4b9   : > { %v2651_v37 = vpop.permute.xlu1 %2650  ;;  %v2647_v47 = vpop.permute.xlu0 %2646 }
 0x4ba   : > { %v8329_v63 = vsel %vm2676_vm12, %v2645_v38, %v2647_v47  ;;  %v8332_v34 = vsel %vm2676_vm12, %v2647_v47, %v2649_v40  ;;  %v8360_v20 = vsel %vm2676_vm12, %v2649_v40, %v2651_v37 }
 0x4bb   : > { %v7201_v41 = vpack.i.bf16 %v8332_v34, %v8329_v63  ;;  %v7206_v57 = vpack.i.bf16 %v8360_v20, %v8349_v13 }
 0x4bd   : > { %v2655_v0 = vpop.permute.xlu1 %2654  ;;  %7202 = vrot.lane.b32.xlu0 %v7201_v41, %s7498_s13  ;;  %v2653_v1 = vpop.permute.xlu0 %2652 }
 0x4be   : > { %v8338_v4 = vsel %vm2676_vm12, %v2651_v37, %v2653_v1  ;;  %v8341_v5 = vsel %vm2676_vm12, %v2653_v1, %v2655_v0 }
 0x4bf   : > { %v7211_v6 = vpack.i.bf16 %v8341_v5, %v8338_v4 }
 0x4c1   : > { %v2659_v7 = vpop.permute.xlu1 %2658  ;;  %7212 = vrot.lane.b32.xlu0 %v7211_v6, %s7498_s13  ;;  %v2657_v8 = vpop.permute.xlu0 %2656 }
 0x4c2   : > { %v8370_v56 = vsel %vm2676_vm12, %v2655_v0, %v2657_v8  ;;  %v8377_v32 = vsel %vm2676_vm12, %v2657_v8, %v2659_v7 }
 0x4c3   : > { %v7216_v50 = vpack.i.bf16 %v8377_v32, %v8370_v56 }
 0x4c5   : > { %v2663_v9 = vpop.permute.xlu1 %2662  ;;  %2780 = vrot.lane.b32.xlu0 %v8329_v63, %s7503_s21  ;;  %v2661_v11 = vpop.permute.xlu0 %2660 }
 0x4c6   : > { %v8394_v43 = vsel %vm2676_vm12, %v2659_v7, %v2661_v11  ;;  %v8397_v54 = vsel %vm2676_vm12, %v2661_v11, %v2663_v9 }
 0x4c7   : > { %v7221_v46 = vpack.i.bf16 %v8397_v54, %v8394_v43 }
 0x4c9   : > { %v2667_v14 = vpop.permute.xlu1 %2666  ;;  %v2665_v27 = vpop.permute.xlu0 %2664  ;;  %2778 = vrot.lane.b32.xlu0 %v8349_v13, %s7503_s21 }
 0x4ca   : > { %v8354_v24 = vsel %vm2676_vm12, %v2663_v9, %v2665_v27  ;;  %v8357_v19 = vsel %vm2676_vm12, %v2665_v27, %v2667_v14 }
 0x4cb   : > { %v7226_v10 = vpack.i.bf16 %v8357_v19, %v8354_v24 }
 0x4cd   : > { %v2671_v26 = vpop.permute.xlu1 %2670  ;;  %2784 = vrot.lane.b32.xlu0 %v8360_v20, %s7503_s21  ;;  %v2669_v25 = vpop.permute.xlu0 %2668 }
 0x4ce   : > { %v8412_v31 = vsel %vm2676_vm12, %v2669_v25, %v2671_v26  ;;  %v8415_v22 = vsel %vm2676_vm12, %v2667_v14, %v2669_v25 }
 0x4cf   : > { %v7231_v33 = vpack.i.bf16 %v8412_v31, %v8415_v22 }
 0x4d1   : > { %v2675_v49 = vpop.permute.xlu1 %2674  ;;  %7227 = vrot.lane.b32.xlu0 %v7226_v10, %s7498_s13  ;;  %v2673_v39 = vpop.permute.xlu0 %2672 }
 0x4d2   : > { %2710 = vst.msk [vmem:[#allocation4] sm:$0xff] %vm2676_vm12, %v2675_v49  ;;  %2744 = vrot.lane.b32.xlu1 %v2675_v49, %s7498_s13  ;;  %v8381_v23 = vsel %vm2676_vm12, %v2671_v26, %v2673_v39  ;;  %v8384_v59 = vsel %vm2676_vm12, %v2673_v39, %v2675_v49 }
 0x4d3   : > { %v7236_v21 = vpack.i.bf16 %v8384_v59, %v8381_v23 }
 0x4d5   : > { %2790 = vrot.lane.b32.xlu0 %v8370_v56, %s7503_s21 }
 0x4d6   : > { %7207 = vrot.lane.b32.xlu1 %v7206_v57, %s7498_s13 }
 0x4d9   : > { %2792 = vrot.lane.b32.xlu0 %v8377_v32, %s7503_s21 }
 0x4da   : > { %7217 = vrot.lane.b32.xlu1 %v7216_v50, %s7498_s13 }
 0x4dd   : > { %7237 = vrot.lane.b32.xlu0 %v7236_v21, %s7498_s13 }
 0x4de   : > { %2782 = vrot.lane.b32.xlu1 %v8332_v34, %s7503_s21 }
 0x4e1   : > { %2798 = vrot.lane.b32.xlu0 %v8354_v24, %s7503_s21 }
 0x4e2   : > { %7222 = vrot.lane.b32.xlu1 %v7221_v46, %s7498_s13 }
 0x4e5   : > { %2800 = vrot.lane.b32.xlu0 %v8357_v19, %s7503_s21 }
 0x4e6   : > { %2786 = vrot.lane.b32.xlu1 %v8338_v4, %s7503_s21 }
 0x4e9   : > { %2804 = vrot.lane.b32.xlu0 %v8412_v31, %s7503_s21 }
 0x4ea   : > { %2788 = vrot.lane.b32.xlu1 %v8341_v5, %s7503_s21 }
 0x4ed   : > { %2808 = vrot.lane.b32.xlu0 %v8384_v59, %s7503_s21 }
 0x4ee   : > { %7232 = vrot.lane.b32.xlu1 %v7231_v33, %s7498_s13 }
 0x4f1   : > { %2851 = vperm.xlu0 %7241, %v6781_v35  }
 0x4f2   : > { %2794 = vrot.lane.b32.xlu1 %v8394_v43, %s7503_s21 }
 0x4f6   : > { %2796 = vrot.lane.b32.xlu1 %v8397_v54, %s7503_s21 }
 0x4fa   : > { %2802 = vrot.lane.b32.xlu1 %v8415_v22, %s7503_s21 }
 0x4fe   : > { %2806 = vrot.lane.b32.xlu1 %v8381_v23, %s7503_s21 }
 0x502   : > { %2810 = vrot.lane.b32.xlu1 %v2675_v49, %s7503_s21 }
 0x52f   : > { %v7203_v52 = vpop.permute.xlu0 %7202 }
 0x530   : > { %v7205_v58 = vunpack.i.h.bf16 %v7203_v52  ;;  %v7204_v61 = vunpack.i.l.bf16 %v7203_v52 }
 0x532   : > { %v2747_v17 = vsel %vm524_vm3, %v7204_v61, %v7205_v58 }
 0x533   : > { %v7213_v40 = vpop.permute.xlu0 %7212  ;;  %v6901_v38 = vpack.c.bf16 %v2747_v17, %v8329_v63 }
 0x534   : > { %v7214_v6 = vunpack.i.l.bf16 %v7213_v40  ;;  %v7215_v27 = vunpack.i.h.bf16 %v7213_v40 }
 0x535   : > { %6902 = vmatprep.subr.bf16.mxu0 %v6901_v38 }
 0x536   : > { %v2750_v39 = vsel %vm524_vm3, %v7214_v6, %v7215_v27 }
 0x537   : > { %v2781_v37 = vpop.permute.xlu0 %2780  ;;  %v6911_v33 = vpack.c.bf16 %v2750_v39, %v8338_v4 }
 0x53b   : > { %v2779_v47 = vpop.permute.xlu0 %2778 }
 0x53f   : > { %v2785_v41 = vpop.permute.xlu0 %2784 }
 0x543   : > { %v8442_v9 = vpop.permute.xlu0 %7227 }
 0x544   : > { %v8440_v0 = vpop.permute.xlu1 %2744  ;;  %v7229_v4 = vunpack.i.l.bf16 %v8442_v9 }
 0x547   : > { %v2791_v50 = vpop.permute.xlu0 %2790 }
 0x548   : > { %v7208_v1 = vpop.permute.xlu1 %7207 }
 0x549   : > { %v7210_v7 = vunpack.i.h.bf16 %v7208_v1  ;;  %v7209_v8 = vunpack.i.l.bf16 %v7208_v1 }
 0x54b   : > { %v2746_v11 = vsel %vm524_vm3, %v7209_v8, %v7204_v61  ;;  %v2749_v12 = vsel %vm524_vm3, %v7210_v7, %v7214_v6  ;;  %v2748_v14 = vsel %vm524_vm3, %v7205_v58, %v7210_v7  ;;  %v2793_v61 = vpop.permute.xlu0 %2792 }
 0x54c   : > { %v7218_v63 = vpop.permute.xlu1 %7217  ;;  %v6903_v26 = vpack.c.bf16 %v2746_v11, %v8349_v13  ;;  %v6905_v25 = vpack.c.bf16 %v2749_v12, %v8360_v20  ;;  %v6907_v10 = vpack.c.bf16 %v2748_v14, %v8332_v34  ;;  %v8456_v13 = vld [vmem:[%s9436_s1 + $0x8] sm:$0xff]  ;;  %v2813_v34 = vsel %vm2812_vm13, %v2779_v47, %v2781_v37 }
 0x54d   : > { %v7219_v49 = vunpack.i.l.bf16 %v7218_v63  ;;  %v7220_v35 = vunpack.i.h.bf16 %v7218_v63 }
 0x54e   : > { %6904 = vmatpush1.bf16.msra.mxu0 %v6903_v26  ;;  %6906 = vmatprep.subr.bf16.mxu1 %v6905_v25 }
 0x54f   : > { %v2751_v57 = vsel %vm524_vm3, %v7215_v27, %v7219_v49  ;;  %6908 = vmatpush1.bf16.msra.mxu1 %v6907_v10  ;;  %v2752_v38 = vsel %vm524_vm3, %v7219_v49, %v7220_v35  ;;  %v7238_v8 = vpop.permute.xlu0 %7237  ;;  %v7230_v27 = vunpack.i.h.bf16 %v8442_v9  ;;  %v2819_v9 = vsel %vm2812_vm13, %v2791_v50, %v2793_v61 }
 0x550   : > { %v2783_v21 = vpop.permute.xlu1 %2782  ;;  %v6909_v20 = vpack.c.bf16 %v2751_v57, %v8341_v5  ;;  %v6915_v6 = vpack.c.bf16 %v2752_v38, %v8370_v56 }
 0x551   : > { %v2814_v46 = vsel %vm2812_vm13, %v2781_v37, %v2783_v21  ;;  %v2815_v47 = vsel %vm2812_vm13, %v2783_v21, %v2785_v41 }
 0x552   : > { %2861 = vmatprep.subr.mxu0 %v2814_v46 }
 0x553   : > { %2862 = vmatpush1.msra.mxu0 %v2813_v34  ;;  %v2799_v25 = vpop.permute.xlu0 %2798  ;;  %v7240_v34 = vunpack.i.h.bf16 %v7238_v8 }
 0x554   : > { %v7223_v52 = vpop.permute.xlu1 %7222  ;;  %6782 = vmatmul.mubr.msk.f32.vlgmr.msra.gmra.mrb[24].mxu0 %vm564_vm4, %v8456_v13  ;;  %6910 = vmatprep.subr.bf16.mxu0 %v6909_v20 }
 0x555   : > { %v7224_v58 = vunpack.i.l.bf16 %v7223_v52  ;;  %6912 = vmatpush1.bf16.msra.mxu0 %v6911_v33  ;;  %3063 = vmatprep.mubr.f32.mxu0 %v7499_v44  ;;  %v7225_v17 = vunpack.i.h.bf16 %v7223_v52 }
 0x557   : > { %v2753_v40 = vsel %vm524_vm3, %v7220_v35, %v7224_v58  ;;  %v2755_v7 = vsel %vm524_vm3, %v7225_v17, %v7229_v4  ;;  %v2754_v11 = vsel %vm524_vm3, %v7224_v58, %v7225_v17  ;;  %v2801_v33 = vpop.permute.xlu0 %2800 }
 0x558   : > { %v2787_v5 = vpop.permute.xlu1 %2786  ;;  %v6913_v1 = vpack.c.bf16 %v2753_v40, %v8377_v32  ;;  %v6917_v56 = vpack.c.bf16 %v2755_v7, %v8397_v54  ;;  %v6919_v32 = vpack.c.bf16 %v2754_v11, %v8394_v43  ;;  %v2756_v54 = vsel %vm524_vm3, %v7229_v4, %v7230_v27 }
 0x559   : > { %v2816_v37 = vsel %vm2812_vm13, %v2785_v41, %v2787_v5  ;;  %v7239_v43 = vunpack.i.l.bf16 %v7238_v8  ;;  %v6923_v46 = vpack.c.bf16 %v2756_v54, %v8354_v24 }
 0x55a   : > { %2932 = vmatprep.subr.mxu1 %v2816_v37 }
 0x55b   : > { %2933 = vmatpush1.msra.mxu1 %v2815_v47  ;;  %v2760_v17 = vsel %vm524_vm3, %v7239_v43, %v7240_v34 }
 0x55c   : > { %v2789_v12 = vpop.permute.xlu1 %2788  ;;  %6783 = vmatmul.mubr.msk.f32.vlgmr.msra.gmra.mrb[24].mxu1 %vm564_vm4, %v8456_v13  ;;  %6914 = vmatprep.subr.bf16.mxu1 %v6913_v1 }
 0x55d   : > { %v2817_v14 = vsel %vm2812_vm13, %v2787_v5, %v2789_v12  ;;  %6916 = vmatpush1.bf16.msra.mxu1 %v6915_v6  ;;  %v2818_v41 = vsel %vm2812_vm13, %v2789_v12, %v2791_v50  ;;  %3134 = vmatprep.mubr.f32.mxu1 %v7499_v44  ;;  %v2805_v5 = vpop.permute.xlu0 %2804 }
 0x55e   : > { %3003 = vmatprep.subr.mxu0 %v2818_v41 }
 0x55f   : > { %3004 = vmatpush1.msra.mxu0 %v2817_v14 }
 0x560   : > { %v7233_v63 = vpop.permute.xlu1 %7232  ;;  %6784 = vmatmul.mubr.msk.f32.vlgmr.msra.gmra.mrb[26].mxu0 %vm564_vm4, %v8456_v13  ;;  %6918 = vmatprep.subr.bf16.mxu0 %v6917_v56 }
 0x561   : > { %v7234_v26 = vunpack.i.l.bf16 %v7233_v63  ;;  %6920 = vmatpush1.bf16.msra.mxu0 %v6919_v32  ;;  %3205 = vmatprep.mubr.f32.mxu0 %v7499_v44  ;;  %v7235_v10 = vunpack.i.h.bf16 %v7233_v63  ;;  %v2809_v1 = vpop.permute.xlu0 %2808 }
 0x563   : > { %v2757_v49 = vsel %vm524_vm3, %v7230_v27, %v7234_v26  ;;  %v2759_v20 = vsel %vm524_vm3, %v7235_v10, %v7239_v43  ;;  %v2758_v35 = vsel %vm524_vm3, %v7234_v26, %v7235_v10 }
 0x564   : > { %v2795_v57 = vpop.permute.xlu1 %2794  ;;  %v6921_v21 = vpack.c.bf16 %v2757_v49, %v8357_v19  ;;  %v6925_v24 = vpack.c.bf16 %v2759_v20, %v8412_v31  ;;  %v2761_v19 = vsel %vm524_vm3, %v7240_v34, %v8440_v0  ;;  %v2823_v31 = vsel %vm2812_vm13, %v2799_v25, %v2801_v33 }
 0x565   : > { %v2820_v39 = vsel %vm2812_vm13, %v2793_v61, %v2795_v57  ;;  %v6927_v61 = vpack.c.bf16 %v2758_v35, %v8415_v22  ;;  %v6929_v0 = vpack.c.bf16 %v2761_v19, %v8384_v59  ;;  %v6931_v22 = vpack.c.bf16 %v2760_v17, %v8381_v23 }
 0x566   : > { %3074 = vmatprep.subr.mxu1 %v2820_v39 }
 0x567   : > { %3075 = vmatpush1.msra.mxu1 %v2819_v9 }
 0x568   : > { %v2797_v52 = vpop.permute.xlu1 %2796  ;;  %6785 = vmatmul.mubr.msk.f32.vlgmr.msra.gmra.mrb[26].mxu1 %vm564_vm4, %v8456_v13  ;;  %6922 = vmatprep.subr.bf16.mxu1 %v6921_v21 }
 0x569   : > { %v2821_v58 = vsel %vm2812_vm13, %v2795_v57, %v2797_v52  ;;  %6924 = vmatpush1.bf16.msra.mxu1 %v6923_v46  ;;  %v2822_v50 = vsel %vm2812_vm13, %v2797_v52, %v2799_v25  ;;  %3276 = vmatprep.mubr.f32.mxu1 %v7499_v44 }
 0x56a   : > { %3145 = vmatprep.subr.mxu0 %v2822_v50 }
 0x56b   : > { %3146 = vmatpush1.msra.mxu0 %v2821_v58 }
 0x56c   : > { %v2803_v40 = vpop.permute.xlu1 %2802  ;;  %6786 = vmatmul.mubr.msk.f32.vlgmr.msra.gmra.mrb[28].mxu0 %vm564_vm4, %v8456_v13  ;;  %6926 = vmatprep.subr.bf16.mxu0 %v6925_v24 }
 0x56d   : > { %6928 = vmatpush1.bf16.msra.mxu0 %v6927_v61  ;;  %v2824_v38 = vsel %vm2812_vm13, %v2801_v33, %v2803_v40  ;;  %3347 = vmatprep.mubr.f32.mxu0 %v7499_v44  ;;  %v2825_v47 = vsel %vm2812_vm13, %v2803_v40, %v2805_v5 }
 0x56e   : > { %3216 = vmatprep.subr.mxu1 %v2824_v38 }
 0x56f   : > { %3217 = vmatpush1.msra.mxu1 %v2823_v31 }
 0x570   : > { %v2807_v4 = vpop.permute.xlu1 %2806  ;;  %6787 = vmatmul.mubr.msk.f32.vlgmr.msra.gmra.mrb[28].mxu1 %vm564_vm4, %v8456_v13  ;;  %6930 = vmatprep.subr.bf16.mxu1 %v6929_v0  ;;  %v8522_v7 = vpop.permute.xlu0 %2851 }
 0x571   : > { %6932 = vmatpush1.bf16.msra.mxu1 %v6931_v22  ;;  %v2826_v37 = vsel %vm2812_vm13, %v2805_v5, %v2807_v4  ;;  %3418 = vmatprep.mubr.f32.mxu1 %v7499_v44  ;;  %v2827_v59 = vsel %vm2812_vm13, %v2807_v4, %v2809_v1 }
 0x572   : > { %3287 = vmatprep.subr.mxu0 %v2826_v37 }
 0x573   : > { %3288 = vmatpush1.msra.mxu0 %v2825_v47 }
 0x574   : > { %v2811_v6 = vpop.permute.xlu1 %2810  ;;  %6788 = vmatmul.mubr.msk.f32.vlgmr.msra.gmra.mrb[30].mxu0 %vm564_vm4, %v8456_v13 }
 0x575   : > { %v2828_v23 = vsel %vm2812_vm13, %v2809_v1, %v2811_v6  ;;  %3765 = vmatprep.mubr.f32.mxu0 %v7499_v44 }
 0x576   : > { %3358 = vmatprep.subr.mxu1 %v2828_v23 }
 0x577   : > { %3359 = vmatpush1.msra.mxu1 %v2827_v59 }
 0x578   : > { %6789 = vmatmul.mubr.msk.f32.vlgmr.msra.gmra.mrb[30].mxu1 %vm564_vm4, %v8456_v13 }
 0x579   : > { %3836 = vmatprep.mubr.f32.mxu1 %v7499_v44 }
 0x627   : > { %v2923_v8 = vpop.f32.mrb[24].mxu0 }
 0x628   : > { %v2924_v11 = vadd.f32 %v2923_v8, %v8522_v7  ;;  %v2925_v12 = vpop.f32.mrb[25].mxu0 }
 0x629   : > { %v2926_v14 = vadd.f32 %v2925_v12, %v8522_v7 }
 0x62a   : > { %v3441_v41 = vmul.f32 0.01, %v2924_v11  ;;  %vm3425_vm14 = vcmp.gt.f32.partialorder %v2924_v11, 0.0 }
 0x62b   : > { %v3442_v56 = vmul.f32 0.01, %v2926_v14  ;;  %vm3426_vm15 = vcmp.gt.f32.partialorder %v2926_v14, 0.0 }
 0x62c   : > { %v3457_v32 = vsel %vm3425_vm14, %v2924_v11, %v3441_v41 }
 0x62d   : > { %3490 = vrot.lane.b32.xlu1 %v3457_v32, %s7502_s10  ;;  %v3458_v26 = vsel %vm3426_vm15, %v2926_v14, %v3442_v56 }
 0x62f   : > { %v2994_v27 = vpop.f32.mrb[24].mxu1 }
 0x630   : > { %v2995_v13 = vadd.f32 %v2994_v27, %v8522_v7  ;;  %v2996_v63 = vpop.f32.mrb[25].mxu1 }
 0x631   : > { %v2997_v25 = vadd.f32 %v2996_v63, %v8522_v7  ;;  %3492 = vrot.lane.b32.xlu1 %v3458_v26, %s7502_s10 }
 0x632   : > { %v3443_v10 = vmul.f32 0.01, %v2995_v13  ;;  %vm3427_vm0 = vcmp.gt.f32.partialorder %v2995_v13, 0.0 }
 0x633   : > { %v3444_v49 = vmul.f32 0.01, %v2997_v25  ;;  %v3065_v54 = vpop.f32.mrb[26].mxu0  ;;  %vm3428_vm5 = vcmp.gt.f32.partialorder %v2997_v25, 0.0 }
 0x634   : > { %v3066_v57 = vadd.f32 %v3065_v54, %v8522_v7  ;;  %v3067_v43 = vpop.f32.mrb[27].mxu0  ;;  %v3459_v39 = vsel %vm3427_vm0, %v2995_v13, %v3443_v10 }
 0x635   : > { %v3068_v9 = vadd.f32 %v3067_v43, %v8522_v7  ;;  %3494 = vrot.lane.b32.xlu0 %v3459_v39, %s7502_s10  ;;  %v3460_v21 = vsel %vm3428_vm5, %v2997_v25, %v3444_v49 }
 0x636   : > { %v3445_v46 = vmul.f32 0.01, %v3066_v57  ;;  %3496 = vrot.lane.b32.xlu1 %v3460_v21, %s7502_s10  ;;  %vm3429_vm6 = vcmp.gt.f32.partialorder %v3066_v57, 0.0  ;;  %v3473_v21 = vld [vmem:[#allocation5] sm:$0xff] }
 0x637   : > { %v3446_v34 = vmul.f32 0.01, %v3068_v9  ;;  %vm3430_vm7 = vcmp.gt.f32.partialorder %v3068_v9, 0.0 }
 0x638   : > { %v3461_v20 = vsel %vm3429_vm6, %v3066_v57, %v3445_v46 }
 0x639   : > { %3498 = vrot.lane.b32.xlu0 %v3461_v20, %s7502_s10  ;;  %v3462_v33 = vsel %vm3430_vm7, %v3068_v9, %v3446_v34 }
 0x63a   : > { %3500 = vrot.lane.b32.xlu1 %v3462_v33, %s7502_s10 }
 0x63b   : > { %v3136_v35 = vpop.f32.mrb[26].mxu1 }
 0x63c   : > { %v3137_v52 = vadd.f32 %v3136_v35, %v8522_v7  ;;  %v3138_v58 = vpop.f32.mrb[27].mxu1 }
 0x63d   : > { %v3139_v50 = vadd.f32 %v3138_v58, %v8522_v7 }
 0x63e   : > { %v3447_v24 = vmul.f32 0.01, %v3137_v52  ;;  %vm3431_vm8 = vcmp.gt.f32.partialorder %v3137_v52, 0.0 }
 0x63f   : > { %v3448_v19 = vmul.f32 0.01, %v3139_v50  ;;  %v3207_v61 = vpop.f32.mrb[28].mxu0  ;;  %vm3432_vm2 = vcmp.gt.f32.partialorder %v3139_v50, 0.0 }
 0x640   : > { %v3208_v17 = vadd.f32 %v3207_v61, %v8522_v7  ;;  %v3209_v40 = vpop.f32.mrb[29].mxu0  ;;  %v3463_v38 = vsel %vm3431_vm8, %v3137_v52, %v3447_v24 }
 0x641   : > { %v3210_v31 = vadd.f32 %v3209_v40, %v8522_v7  ;;  %3502 = vrot.lane.b32.xlu0 %v3463_v38, %s7502_s10  ;;  %v3464_v5 = vsel %vm3432_vm2, %v3139_v50, %v3448_v19 }
 0x642   : > { %v3449_v0 = vmul.f32 0.01, %v3208_v17  ;;  %3504 = vrot.lane.b32.xlu1 %v3464_v5, %s7502_s10  ;;  %vm3433_vm9 = vcmp.gt.f32.partialorder %v3208_v17, 0.0 }
 0x643   : > { %v3450_v22 = vmul.f32 0.01, %v3210_v31  ;;  %v3278_v4 = vpop.f32.mrb[28].mxu1  ;;  %vm3434_vm10 = vcmp.gt.f32.partialorder %v3210_v31, 0.0 }
 0x644   : > { %v3279_v37 = vadd.f32 %v3278_v4, %v8522_v7  ;;  %v3280_v47 = vpop.f32.mrb[29].mxu1  ;;  %v3465_v1 = vsel %vm3433_vm9, %v3208_v17, %v3449_v0 }
 0x645   : > { %v3281_v6 = vadd.f32 %v3280_v47, %v8522_v7  ;;  %3506 = vrot.lane.b32.xlu0 %v3465_v1, %s7502_s10  ;;  %v3466_v23 = vsel %vm3434_vm10, %v3210_v31, %v3450_v22 }
 0x646   : > { %v3451_v59 = vmul.f32 0.01, %v3279_v37  ;;  %3508 = vrot.lane.b32.xlu1 %v3466_v23, %s7502_s10  ;;  %vm3435_vm11 = vcmp.gt.f32.partialorder %v3279_v37, 0.0 }
 0x647   : > { %v3452_v8 = vmul.f32 0.01, %v3281_v6  ;;  %v3349_v11 = vpop.f32.mrb[30].mxu0  ;;  %vm3436_vm14 = vcmp.gt.f32.partialorder %v3281_v6, 0.0 }
 0x648   : > { %v3350_v12 = vadd.f32 %v3349_v11, %v8522_v7  ;;  %v3351_v14 = vpop.f32.mrb[31].mxu0  ;;  %v3467_v41 = vsel %vm3435_vm11, %v3279_v37, %v3451_v59 }
 0x649   : > { %v3352_v56 = vadd.f32 %v3351_v14, %v8522_v7  ;;  %3510 = vrot.lane.b32.xlu0 %v3467_v41, %s7502_s10  ;;  %v3468_v32 = vsel %vm3436_vm14, %v3281_v6, %v3452_v8 }
 0x64a   : > { %v3453_v27 = vmul.f32 0.01, %v3350_v12  ;;  %3512 = vrot.lane.b32.xlu1 %v3468_v32, %s7502_s10  ;;  %vm3437_vm15 = vcmp.gt.f32.partialorder %v3350_v12, 0.0 }
 0x64b   : > { %v3454_v13 = vmul.f32 0.01, %v3352_v56  ;;  %v3420_v63 = vpop.f32.mrb[30].mxu1  ;;  %vm3438_vm0 = vcmp.gt.f32.partialorder %v3352_v56, 0.0 }
 0x64c   : > { %v3421_v26 = vadd.f32 %v3420_v63, %v8522_v7  ;;  %v3422_v25 = vpop.f32.mrb[31].mxu1  ;;  %v3469_v10 = vsel %vm3437_vm15, %v3350_v12, %v3453_v27 }
 0x64d   : > { %v3423_v49 = vadd.f32 %v3422_v25, %v8522_v7  ;;  %3514 = vrot.lane.b32.xlu0 %v3469_v10, %s7502_s10  ;;  %v3470_v54 = vsel %vm3438_vm0, %v3352_v56, %v3454_v13 }
 0x64e   : > { %v3455_v57 = vmul.f32 0.01, %v3421_v26  ;;  %3516 = vrot.lane.b32.xlu1 %v3470_v54, %s7502_s10  ;;  %vm3439_vm5 = vcmp.gt.f32.partialorder %v3421_v26, 0.0  ;;  %v6791_v54 = vld [vmem:[%s9439_s4 + $0x8] sm:$0xff] }
 0x64f   : > { %v3456_v43 = vmul.f32 0.01, %v3423_v49  ;;  %vm3440_vm6 = vcmp.gt.f32.partialorder %v3423_v49, 0.0 }
 0x650   : > { %v3471_v39 = vsel %vm3439_vm5, %v3421_v26, %v3455_v57 }
 0x651   : > { %3518 = vrot.lane.b32.xlu0 %v3471_v39, %s7502_s10  ;;  %v3472_v9 = vsel %vm3440_vm6, %v3423_v49, %v3456_v43 }
 0x652   : > { %3520 = vrot.lane.b32.xlu1 %v3472_v9, %s7502_s10 }
 0x69f   : > { %v3491_v46 = vpop.permute.xlu1 %3490 }
 0x6a0   : > { %v8557_v34 = vsel %vm2676_vm12, %v3473_v21, %v3491_v46 }
 0x6a1   : > { %3623 = vrot.lane.b32.xlu1 %v8557_v34, %s7503_s21 }
 0x6a3   : > { %v3493_v7 = vpop.permute.xlu1 %3492 }
 0x6a4   : > { %v8562_v20 = vsel %vm2676_vm12, %v3491_v46, %v3493_v7 }
 0x6a5   : > { %3625 = vrot.lane.b32.xlu1 %v8562_v20, %s7503_s21 }
 0x6a7   : > { %v3495_v33 = vpop.permute.xlu0 %3494 }
 0x6a8   : > { %v8567_v35 = vsel %vm2676_vm12, %v3493_v7, %v3495_v33  ;;  %v3497_v52 = vpop.permute.xlu1 %3496 }
 0x6a9   : > { %v8570_v58 = vsel %vm2676_vm12, %v3495_v33, %v3497_v52  ;;  %v7242_v50 = vpack.i.bf16 %v8567_v35, %v8562_v20 }
 0x6aa   : > { %3629 = vrot.lane.b32.xlu1 %v8570_v58, %s7503_s21 }
 0x6ab   : > { %v3499_v24 = vpop.permute.xlu0 %3498  ;;  %7243 = vrot.lane.b32.xlu0 %v7242_v50, %s7498_s13 }
 0x6ac   : > { %v8578_v19 = vsel %vm2676_vm12, %v3497_v52, %v3499_v24  ;;  %v3501_v17 = vpop.permute.xlu1 %3500 }
 0x6ad   : > { %v7247_v61 = vpack.i.bf16 %v8578_v19, %v8570_v58  ;;  %v8586_v40 = vsel %vm2676_vm12, %v3499_v24, %v3501_v17 }
 0x6ae   : > { %v7252_v22 = vpack.i.bf16 %v8586_v40, %v8557_v34 }
 0x6af   : > { %3627 = vrot.lane.b32.xlu0 %v8567_v35, %s7503_s21  ;;  %7248 = vrot.lane.b32.xlu1 %v7247_v61, %s7498_s13 }
 0x6b3   : > { %v3503_v38 = vpop.permute.xlu0 %3502  ;;  %3631 = vrot.lane.b32.xlu0 %v8578_v19, %s7503_s21 }
 0x6b4   : > { %v8591_v31 = vsel %vm2676_vm12, %v3501_v17, %v3503_v38  ;;  %v3505_v5 = vpop.permute.xlu1 %3504 }
 0x6b5   : > { %v8594_v0 = vsel %vm2676_vm12, %v3503_v38, %v3505_v5 }
 0x6b6   : > { %v7257_v4 = vpack.i.bf16 %v8594_v0, %v8591_v31 }
 0x6b7   : > { %7253 = vrot.lane.b32.xlu0 %v7252_v22, %s7498_s13  ;;  %v3507_v37 = vpop.permute.xlu0 %3506 }
 0x6b8   : > { %7258 = vrot.lane.b32.xlu1 %v7257_v4, %s7498_s13  ;;  %v3509_v47 = vpop.permute.xlu1 %3508  ;;  %v8610_v59 = vsel %vm2676_vm12, %v3505_v5, %v3507_v37 }
 0x6b9   : > { %v8607_v6 = vsel %vm2676_vm12, %v3507_v37, %v3509_v47 }
 0x6ba   : > { %v7262_v11 = vpack.i.bf16 %v8607_v6, %v8610_v59 }
 0x6bb   : > { %3633 = vrot.lane.b32.xlu0 %v8586_v40, %s7503_s21  ;;  %v3511_v23 = vpop.permute.xlu0 %3510 }
 0x6bc   : > { %3635 = vrot.lane.b32.xlu1 %v8591_v31, %s7503_s21  ;;  %v3513_v1 = vpop.permute.xlu1 %3512  ;;  %v8622_v14 = vsel %vm2676_vm12, %v3509_v47, %v3511_v23 }
 0x6bd   : > { %v8619_v12 = vsel %vm2676_vm12, %v3511_v23, %v3513_v1  ;;  %v8676_v23 = vld [vmem:[%s9438_s3 + $0x8] sm:$0xff] }
 0x6be   : > { %v7267_v32 = vpack.i.bf16 %v8619_v12, %v8622_v14 }
 0x6bf   : > { %3637 = vrot.lane.b32.xlu0 %v8594_v0, %s7503_s21  ;;  %v3515_v41 = vpop.permute.xlu0 %3514 }
 0x6c0   : > { %3639 = vrot.lane.b32.xlu1 %v8610_v59, %s7503_s21  ;;  %v3517_v8 = vpop.permute.xlu1 %3516  ;;  %v8631_v27 = vsel %vm2676_vm12, %v3513_v1, %v3515_v41 }
 0x6c1   : > { %v8634_v13 = vsel %vm2676_vm12, %v3515_v41, %v3517_v8 }
 0x6c2   : > { %v7272_v63 = vpack.i.bf16 %v8634_v13, %v8631_v27 }
 0x6c3   : > { %7263 = vrot.lane.b32.xlu0 %v7262_v11, %s7498_s13  ;;  %v3519_v26 = vpop.permute.xlu0 %3518 }
 0x6c4   : > { %3643 = vrot.lane.b32.xlu1 %v8622_v14, %s7503_s21  ;;  %v3521_v56 = vpop.permute.xlu1 %3520  ;;  %v8644_v25 = vsel %vm2676_vm12, %v3517_v8, %v3519_v26 }
 0x6c5   : > { %3555 = vst.msk [vmem:[#allocation5] sm:$0xff] %vm2676_vm12, %v3521_v56  ;;  %v8647_v10 = vsel %vm2676_vm12, %v3519_v26, %v3521_v56 }
 0x6c6   : > { %v7277_v49 = vpack.i.bf16 %v8647_v10, %v8644_v25 }
 0x6c7   : > { %7268 = vrot.lane.b32.xlu0 %v7267_v32, %s7498_s13 }
 0x6c8   : > { %3589 = vrot.lane.b32.xlu1 %v3521_v56, %s7498_s13 }
 0x6cb   : > { %3641 = vrot.lane.b32.xlu0 %v8607_v6, %s7503_s21 }
 0x6cc   : > { %7273 = vrot.lane.b32.xlu1 %v7272_v63, %s7498_s13 }
 0x6cf   : > { %3645 = vrot.lane.b32.xlu0 %v8619_v12, %s7503_s21 }
 0x6d0   : > { %3647 = vrot.lane.b32.xlu1 %v8631_v27, %s7503_s21 }
 0x6d3   : > { %7278 = vrot.lane.b32.xlu0 %v7277_v49, %s7498_s13 }
 0x6d4   : > { %3651 = vrot.lane.b32.xlu1 %v8644_v25, %s7503_s21 }
 0x6d7   : > { %3649 = vrot.lane.b32.xlu0 %v8634_v13, %s7503_s21 }
 0x6d8   : > { %3655 = vrot.lane.b32.xlu1 %v3521_v56, %s7503_s21 }
 0x6db   : > { %3653 = vrot.lane.b32.xlu0 %v8647_v10, %s7503_s21 }
 0x6df   : > { %3695 = vperm.xlu0 %7241, %v6791_v54  }
 0x713   : > { %v3624_v57 = vpop.permute.xlu1 %3623 }
 0x717   : > { %v3626_v43 = vpop.permute.xlu1 %3625 }
 0x71c   : > { %v3630_v39 = vpop.permute.xlu1 %3629 }
 0x71d   : > { %v7244_v9 = vpop.permute.xlu0 %7243 }
 0x71e   : > { %v7246_v21 = vunpack.i.h.bf16 %v7244_v9  ;;  %v7245_v46 = vunpack.i.l.bf16 %v7244_v9 }
 0x720   : > { %v3592_v7 = vsel %vm524_vm3, %v7245_v46, %v7246_v21 }
 0x721   : > { %v3628_v33 = vpop.permute.xlu0 %3627  ;;  %v7249_v52 = vpop.permute.xlu1 %7248  ;;  %v6933_v50 = vpack.c.bf16 %v3592_v7, %v8562_v20 }
 0x722   : > { %v7251_v24 = vunpack.i.h.bf16 %v7249_v52  ;;  %v7250_v61 = vunpack.i.l.bf16 %v7249_v52  ;;  %v3659_v8 = vsel %vm2812_vm13, %v3628_v33, %v3630_v39  ;;  %v3658_v26 = vsel %vm2812_vm13, %v3626_v43, %v3628_v33 }
 0x723   : > { %6934 = vmatprep.subr.bf16.mxu0 %v6933_v50 }
 0x724   : > { %v3593_v17 = vsel %vm524_vm3, %v7246_v21, %v7250_v61  ;;  %v3594_v38 = vsel %vm524_vm3, %v7250_v61, %v7251_v24 }
 0x725   : > { %v6939_v5 = vpack.c.bf16 %v3593_v17, %v8567_v35  ;;  %v3632_v22 = vpop.permute.xlu0 %3631  ;;  %v6937_v4 = vpack.c.bf16 %v3594_v38, %v8570_v58 }
 0x726   : > { %v3660_v37 = vsel %vm2812_vm13, %v3630_v39, %v3632_v22  ;;  %v3657_v39 = vsel %vm2812_vm13, %v3624_v57, %v3626_v43 }
 0x727   : > { %6938 = vmatprep.subr.bf16.mxu1 %v6937_v4 }
 0x728   : > { %6940 = vmatpush1.bf16.msra.mxu1 %v6939_v5 }
 0x729   : > { %v7254_v47 = vpop.permute.xlu0 %7253  ;;  %3776 = vmatprep.subr.mxu1 %v3660_v37 }
 0x72a   : > { %v7255_v1 = vunpack.i.l.bf16 %v7254_v47  ;;  %v7259_v20 = vpop.permute.xlu1 %7258  ;;  %v7256_v11 = vunpack.i.h.bf16 %v7254_v47 }
 0x72b   : > { %v7260_v35 = vunpack.i.l.bf16 %v7259_v20 }
 0x72c   : > { %v3591_v41 = vsel %vm524_vm3, %v7255_v1, %v7245_v46  ;;  %3777 = vmatpush1.msra.mxu1 %v3659_v8  ;;  %v3595_v49 = vsel %vm524_vm3, %v7251_v24, %v7256_v11  ;;  %v7261_v46 = vunpack.i.h.bf16 %v7259_v20 }
 0x72d   : > { %v6935_v58 = vpack.c.bf16 %v3591_v41, %v8557_v34  ;;  %v3634_v56 = vpop.permute.xlu0 %3633  ;;  %6793 = vmatmul.mubr.msk.f32.vlgmr.msra.gmra.mrb[32].mxu1 %vm564_vm4, %v8676_v23  ;;  %v3596_v63 = vsel %vm524_vm3, %v7256_v11, %v7260_v35  ;;  %v6943_v21 = vpack.c.bf16 %v3595_v49, %v8578_v19 }
 0x72e   : > { %v3636_v32 = vpop.permute.xlu1 %3635  ;;  %3978 = vmatprep.mubr.f32.mxu1 %v7499_v44  ;;  %v6941_v34 = vpack.c.bf16 %v3596_v63, %v8586_v40  ;;  %v3597_v57 = vsel %vm524_vm3, %v7260_v35, %v7261_v46  ;;  %v3661_v19 = vsel %vm2812_vm13, %v3632_v22, %v3634_v56 }
 0x72f   : > { %6936 = vmatpush1.bf16.msra.mxu0 %v6935_v58  ;;  %v3662_v33 = vsel %vm2812_vm13, %v3634_v56, %v3636_v32  ;;  %v6947_v17 = vpack.c.bf16 %v3597_v57, %v8591_v31 }
 0x730   : > { %3705 = vmatprep.subr.mxu0 %v3658_v26 }
 0x731   : > { %v3638_v54 = vpop.permute.xlu0 %3637 }
 0x732   : > { %v3640_v9 = vpop.permute.xlu1 %3639  ;;  %v3663_v8 = vsel %vm2812_vm13, %v3636_v32, %v3638_v54 }
 0x733   : > { %3706 = vmatpush1.msra.mxu0 %v3657_v39  ;;  %v3664_v47 = vsel %vm2812_vm13, %v3638_v54, %v3640_v9 }
 0x734   : > { %6792 = vmatmul.mubr.msk.f32.vlgmr.msra.gmra.mrb[32].mxu0 %vm564_vm4, %v8676_v23  ;;  %6942 = vmatprep.subr.bf16.mxu0 %v6941_v34 }
 0x735   : > { %v7264_v7 = vpop.permute.xlu0 %7263  ;;  %6944 = vmatpush1.bf16.msra.mxu0 %v6943_v21  ;;  %3907 = vmatprep.mubr.f32.mxu0 %v7499_v44 }
 0x736   : > { %v7265_v52 = vunpack.i.l.bf16 %v7264_v7  ;;  %v3644_v50 = vpop.permute.xlu1 %3643  ;;  %3847 = vmatprep.subr.mxu0 %v3662_v33  ;;  %v7266_v40 = vunpack.i.h.bf16 %v7264_v7 }
 0x738   : > { %v3598_v43 = vsel %vm524_vm3, %v7261_v46, %v7265_v52  ;;  %v3599_v4 = vsel %vm524_vm3, %v7265_v52, %v7266_v40 }
 0x739   : > { %v7269_v24 = vpop.permute.xlu0 %7268  ;;  %3848 = vmatpush1.msra.mxu0 %v3661_v19  ;;  %v6945_v61 = vpack.c.bf16 %v3598_v43, %v8594_v0  ;;  %v6951_v0 = vpack.c.bf16 %v3599_v4, %v8610_v59 }
 0x73a   : > { %v7270_v38 = vunpack.i.l.bf16 %v7269_v24  ;;  %v3590_v5 = vpop.permute.xlu1 %3589  ;;  %6794 = vmatmul.mubr.msk.f32.vlgmr.msra.gmra.mrb[34].mxu0 %vm564_vm4, %v8676_v23  ;;  %v7271_v37 = vunpack.i.h.bf16 %v7269_v24 }
 0x73b   : > { %6946 = vmatprep.subr.bf16.mxu1 %v6945_v61  ;;  %4049 = vmatprep.mubr.f32.mxu0 %v7499_v44 }
 0x73c   : > { %v3600_v22 = vsel %vm524_vm3, %v7266_v40, %v7270_v38  ;;  %6948 = vmatpush1.bf16.msra.mxu1 %v6947_v17  ;;  %v3601_v35 = vsel %vm524_vm3, %v7270_v38, %v7271_v37 }
 0x73d   : > { %v3642_v1 = vpop.permute.xlu0 %3641  ;;  %3918 = vmatprep.subr.mxu1 %v3664_v47  ;;  %v6949_v31 = vpack.c.bf16 %v3600_v22, %v8607_v6  ;;  %v6955_v32 = vpack.c.bf16 %v3601_v35, %v8622_v14 }
 0x73e   : > { %v7274_v20 = vpop.permute.xlu1 %7273  ;;  %v3666_v41 = vsel %vm2812_vm13, %v3642_v1, %v3644_v50  ;;  %v3665_v63 = vsel %vm2812_vm13, %v3640_v9, %v3642_v1 }
 0x73f   : > { %v7275_v11 = vunpack.i.l.bf16 %v7274_v20  ;;  %6950 = vmatprep.subr.bf16.mxu0 %v6949_v31  ;;  %v7276_v26 = vunpack.i.h.bf16 %v7274_v20 }
 0x740   : > { %3919 = vmatpush1.msra.mxu1 %v3663_v8  ;;  %6952 = vmatpush1.bf16.msra.mxu0 %v6951_v0 }
 0x741   : > { %v3602_v58 = vsel %vm524_vm3, %v7271_v37, %v7275_v11  ;;  %v3646_v56 = vpop.permute.xlu0 %3645  ;;  %6795 = vmatmul.mubr.msk.f32.vlgmr.msra.gmra.mrb[34].mxu1 %vm564_vm4, %v8676_v23  ;;  %3989 = vmatprep.subr.mxu0 %v3666_v41 }
 0x742   : > { %v3648_v6 = vpop.permute.xlu1 %3647  ;;  %v6953_v59 = vpack.c.bf16 %v3602_v58, %v8619_v12  ;;  %4120 = vmatprep.mubr.f32.mxu1 %v7499_v44  ;;  %v3603_v12 = vsel %vm524_vm3, %v7275_v11, %v7276_v26  ;;  %v3667_v9 = vsel %vm2812_vm13, %v3644_v50, %v3646_v56 }
 0x743   : > { %v3668_v54 = vsel %vm2812_vm13, %v3646_v56, %v3648_v6  ;;  %v6959_v19 = vpack.c.bf16 %v3603_v12, %v8631_v27 }
 0x744   : > { %3990 = vmatpush1.msra.mxu0 %v3665_v63  ;;  %6954 = vmatprep.subr.bf16.mxu1 %v6953_v59 }
 0x745   : > { %v7279_v49 = vpop.permute.xlu0 %7278  ;;  %6796 = vmatmul.mubr.msk.f32.vlgmr.msra.gmra.mrb[36].mxu0 %vm564_vm4, %v8676_v23  ;;  %6956 = vmatpush1.bf16.msra.mxu1 %v6955_v32 }
 0x746   : > { %v7281_v39 = vunpack.i.h.bf16 %v7279_v49  ;;  %v7280_v34 = vunpack.i.l.bf16 %v7279_v49  ;;  %4060 = vmatprep.subr.mxu1 %v3668_v54  ;;  %4191 = vmatprep.mubr.f32.mxu0 %v7499_v44  ;;  %v3652_v14 = vpop.permute.xlu1 %3651 }
 0x748   : > { %v3604_v21 = vsel %vm524_vm3, %v7276_v26, %v7280_v34  ;;  %v3605_v46 = vsel %vm524_vm3, %v7280_v34, %v7281_v39  ;;  %v3606_v7 = vsel %vm524_vm3, %v7281_v39, %v3590_v5 }
 0x749   : > { %v6963_v33 = vpack.c.bf16 %v3605_v46, %v8644_v25  ;;  %v3650_v52 = vpop.permute.xlu0 %3649  ;;  %4061 = vmatpush1.msra.mxu1 %v3667_v9  ;;  %v6957_v57 = vpack.c.bf16 %v3604_v21, %v8634_v13  ;;  %v6961_v40 = vpack.c.bf16 %v3606_v7, %v8647_v10 }
 0x74a   : > { %6797 = vmatmul.mubr.msk.f32.vlgmr.msra.gmra.mrb[36].mxu1 %vm564_vm4, %v8676_v23  ;;  %v3670_v50 = vsel %vm2812_vm13, %v3650_v52, %v3652_v14  ;;  %v3656_v43 = vpop.permute.xlu1 %3655  ;;  %v3669_v27 = vsel %vm2812_vm13, %v3648_v6, %v3650_v52 }
 0x74b   : > { %6958 = vmatprep.subr.bf16.mxu0 %v6957_v57  ;;  %6962 = vmatprep.subr.bf16.mxu1 %v6961_v40 }
 0x74c   : > { %6960 = vmatpush1.bf16.msra.mxu0 %v6959_v19  ;;  %6964 = vmatpush1.bf16.msra.mxu1 %v6963_v33 }
 0x74d   : > { %v3654_v24 = vpop.permute.xlu0 %3653  ;;  %4131 = vmatprep.subr.mxu0 %v3670_v50  ;;  %4262 = vmatprep.mubr.f32.mxu1 %v7499_v44 }
 0x74e   : > { %v3671_v13 = vsel %vm2812_vm13, %v3652_v14, %v3654_v24  ;;  %v3672_v25 = vsel %vm2812_vm13, %v3654_v24, %v3656_v43 }
 0x74f   : > { %4202 = vmatprep.subr.mxu1 %v3672_v25 }
 0x750   : > { %4132 = vmatpush1.msra.mxu0 %v3669_v27  ;;  %4203 = vmatpush1.msra.mxu1 %v3671_v13 }
 0x751   : > { %6798 = vmatmul.mubr.msk.f32.vlgmr.msra.gmra.mrb[38].mxu0 %vm564_vm4, %v8676_v23  ;;  %6799 = vmatmul.mubr.msk.f32.vlgmr.msra.gmra.mrb[38].mxu1 %vm564_vm4, %v8676_v23 }
 0x75e   : > { %v8741_v10 = vpop.permute.xlu0 %3695 }
 0x800   : > { %v3838_v61 = vpop.f32.mrb[32].mxu1 }
 0x801   : > { %v3839_v17 = vadd.f32 %v3838_v61, %v8741_v10  ;;  %v3840_v38 = vpop.f32.mrb[33].mxu1 }
 0x802   : > { %v3841_v5 = vadd.f32 %v3840_v38, %v8741_v10 }
 0x803   : > { %vm4271_vm3 = vcmp.gt.f32.partialorder %v3839_v17, 0.0  ;;  %v4287_v4 = vmul.f32 0.01, %v3839_v17 }
 0x804   : > { %vm4272_vm12 = vcmp.gt.f32.partialorder %v3841_v5, 0.0  ;;  %v4288_v37 = vmul.f32 0.01, %v3841_v5 }
 0x805   : > { %v4303_v22 = vsel %vm4271_vm3, %v3839_v17, %v4287_v4 }
 0x806   : > { %v8746_v47 = vadd.f32 %v4303_v22, %v8239_v42  ;;  %v4304_v1 = vsel %vm4272_vm12, %v3841_v5, %v4288_v37 }
 0x807   : > { %v8749_v31 = vadd.f32 %v4304_v1, %v8243_v3  ;;  %v3767_v23 = vpop.f32.mrb[32].mxu0 }
 0x808   : > { %v3768_v0 = vadd.f32 %v3767_v23, %v8741_v10  ;;  %v3769_v20 = vpop.f32.mrb[33].mxu0 }
 0x809   : > { %v3770_v8 = vadd.f32 %v3769_v20, %v8741_v10 }
 0x80a   : > { %vm4269_vm7 = vcmp.gt.f32.partialorder %v3768_v0, 0.0  ;;  %v4285_v11 = vmul.f32 0.01, %v3768_v0 }
 0x80b   : > { %vm4270_vm8 = vcmp.gt.f32.partialorder %v3770_v8, 0.0  ;;  %v4286_v35 = vmul.f32 0.01, %v3770_v8 }
 0x80c   : > { %v4301_v41 = vsel %vm4269_vm7, %v3768_v0, %v4285_v11 }
 0x80d   : > { %v8754_v58 = vadd.f32 %v4301_v41, %v8237_v36  ;;  %v4302_v42 = vsel %vm4270_vm8, %v3770_v8, %v4286_v35  ;;  %v3909_v56 = vpop.f32.mrb[34].mxu0 }
 0x80e   : > { %v8757_v6 = vadd.f32 %v4302_v42, %v8241_v2  ;;  %v3910_v3 = vadd.f32 %v3909_v56, %v8741_v10  ;;  %v3911_v59 = vpop.f32.mrb[35].mxu0 }
 0x80f   : > { %v3912_v32 = vadd.f32 %v3911_v59, %v8741_v10 }
 0x810   : > { %vm4273_vm2 = vcmp.gt.f32.partialorder %v3910_v3, 0.0  ;;  %v4289_v63 = vmul.f32 0.01, %v3910_v3 }
 0x811   : > { %vm4274_vm9 = vcmp.gt.f32.partialorder %v3912_v32, 0.0  ;;  %v4290_v26 = vmul.f32 0.01, %v3912_v32 }
 0x812   : > { %v4305_v49 = vsel %vm4273_vm2, %v3910_v3, %v4289_v63 }
 0x813   : > { %v8762_v54 = vadd.f32 %v4305_v49, %v8253_v15  ;;  %v4306_v36 = vsel %vm4274_vm9, %v3912_v32, %v4290_v26  ;;  %v7504_v49 = vmov (!%p6754_p8), 0.0  }
 0x814   : > { %v8765_v39 = vadd.f32 %v4306_v36, %v8257_v16  ;;  %v3980_v34 = vpop.f32.mrb[34].mxu1  ;;  %4336 = vst.msk [vmem:[#allocation6] sm:$0xff] (!%p6754_p8), %vm2033_vm1, %v7504_v49  ;;  %4337 = vst.msk [vmem:[#allocation7] sm:$0xff] (!%p6754_p8), %vm2033_vm1, %v7504_v49 }
 0x815   : > { %v3981_v2 = vadd.f32 %v3980_v34, %v8741_v10  ;;  %v3982_v12 = vpop.f32.mrb[35].mxu1 }
 0x816   : > { %v3983_v14 = vadd.f32 %v3982_v12, %v8741_v10 }
 0x817   : > { %vm4275_vm10 = vcmp.gt.f32.partialorder %v3981_v2, 0.0  ;;  %v4291_v9 = vmul.f32 0.01, %v3981_v2 }
 0x818   : > { %vm4276_vm11 = vcmp.gt.f32.partialorder %v3983_v14, 0.0  ;;  %v4292_v21 = vmul.f32 0.01, %v3983_v14  ;;  %v4051_v46 = vpop.f32.mrb[36].mxu0 }
 0x819   : > { %v4307_v7 = vsel %vm4275_vm10, %v3981_v2, %v4291_v9  ;;  %v4052_v33 = vadd.f32 %v4051_v46, %v8741_v10  ;;  %v4053_v15 = vpop.f32.mrb[37].mxu0 }
 0x81a   : > { %v8771_v52 = vadd.f32 %v4307_v7, %v8255_v30  ;;  %v4308_v16 = vsel %vm4276_vm11, %v3983_v14, %v4292_v21  ;;  %v4054_v57 = vadd.f32 %v4053_v15, %v8741_v10 }
 0x81b   : > { %v8775_v40 = vadd.f32 %v4308_v16, %v8259_v18  ;;  %vm4277_vm14 = vcmp.gt.f32.partialorder %v4052_v33, 0.0  ;;  %v4293_v19 = vmul.f32 0.01, %v4052_v33 }
 0x81c   : > { %vm4278_vm15 = vcmp.gt.f32.partialorder %v4054_v57, 0.0  ;;  %v4294_v50 = vmul.f32 0.01, %v4054_v57 }
 0x81d   : > { %v4309_v43 = vsel %vm4277_vm14, %v4052_v33, %v4293_v19  ;;  %v4122_v24 = vpop.f32.mrb[36].mxu1 }
 0x81e   : > { %v8778_v13 = vadd.f32 %v4309_v43, %v8267_v45  ;;  %v4310_v25 = vsel %vm4278_vm15, %v4054_v57, %v4294_v50  ;;  %v4123_v27 = vadd.f32 %v4122_v24, %v8741_v10  ;;  %v4124_v30 = vpop.f32.mrb[37].mxu1 }
 0x81f   : > { %v8782_v61 = vadd.f32 %v4310_v25, %v8271_v28  ;;  %v4125_v17 = vadd.f32 %v4124_v30, %v8741_v10 }
 0x820   : > { %vm4279_vm0 = vcmp.gt.f32.partialorder %v4123_v27, 0.0  ;;  %v4295_v18 = vmul.f32 0.01, %v4123_v27 }
 0x821   : > { %vm4280_vm5 = vcmp.gt.f32.partialorder %v4125_v17, 0.0  ;;  %v4296_v38 = vmul.f32 0.01, %v4125_v17 }
 0x822   : > { %v4311_v5 = vsel %vm4279_vm0, %v4123_v27, %v4295_v18 }
 0x823   : > { %v8786_v4 = vadd.f32 %v4311_v5, %v8269_v62  ;;  %v4312_v37 = vsel %vm4280_vm5, %v4125_v17, %v4296_v38 }
 0x824   : > { %v8789_v45 = vadd.f32 %v4312_v37, %v8273_v48  ;;  %v4193_v22 = vpop.f32.mrb[38].mxu0  ;;  %v4264_v1 = vpop.f32.mrb[38].mxu1 }
 0x825   : > { %v4194_v23 = vadd.f32 %v4193_v22, %v8741_v10  ;;  %v4265_v28 = vadd.f32 %v4264_v1, %v8741_v10  ;;  %v4195_v0 = vpop.f32.mrb[39].mxu0  ;;  %v4266_v20 = vpop.f32.mrb[39].mxu1  ;;  %4335 = sbr.rel (%p6754_p8) target bundleno = 2092 (0x82c), region = 64 }
 0x826   : > { %v4196_v8 = vadd.f32 %v4195_v0, %v8741_v10  ;;  %v4267_v11 = vadd.f32 %v4266_v20, %v8741_v10 }
 0x827   : > { %vm4281_vm6 = vcmp.gt.f32.partialorder %v4194_v23, 0.0  ;;  %v4297_v35 = vmul.f32 0.01, %v4194_v23  ;;  %vm4283_vm3 = vcmp.gt.f32.partialorder %v4265_v28, 0.0  ;;  %v4299_v62 = vmul.f32 0.01, %v4265_v28 }
 0x828   : > { %vm4282_vm12 = vcmp.gt.f32.partialorder %v4196_v8, 0.0  ;;  %v4298_v41 = vmul.f32 0.01, %v4196_v8  ;;  %vm4284_vm7 = vcmp.gt.f32.partialorder %v4267_v11, 0.0  ;;  %v4300_v48 = vmul.f32 0.01, %v4267_v11 }
 0x829   : > { %v4313_v42 = vsel %vm4281_vm6, %v4194_v23, %v4297_v35  ;;  %v4315_v56 = vsel %vm4283_vm3, %v4265_v28, %v4299_v62 }
 0x82a   : > { %v8796_v3 = vadd.f32 %v4313_v42, %v8281_v55  ;;  %v8799_v59 = vadd.f32 %v4315_v56, %v8283_v29  ;;  %v4314_v32 = vsel %vm4282_vm12, %v4196_v8, %v4298_v41  ;;  %v4316_v63 = vsel %vm4284_vm7, %v4267_v11, %v4300_v48 }
 0x82b   : > { %v8802_v10 = vadd.f32 %v4314_v32, %v8287_v51  ;;  %v8805_v26 = vadd.f32 %v4316_v63, %v8289_v53 }
 0x82c PF: > { %4631 = vmatprep.mubr.f32.mxu0 %v7499_v44  ;;  %4702 = vmatprep.mubr.f32.mxu1 %v7499_v44  ;;  %s7505_s14 = smov 8   ;;  %s7506_s24 = smov 120   ;;  %v4338_v16 = vld [vmem:[#allocation6] sm:$0xff]  ;;  %v6802_v48 = vld [vmem:[%s9437_s2 + $0x10] sm:$0xff]  ;;  %vm4522_vm8 = vcmask 982016  }
 0x82d   : > { %4359 = vrot.lane.b32.xlu1 %v8746_v47, %s7505_s14  ;;  %4355 = vrot.lane.b32.xlu0 %v8754_v58, %s7505_s14  ;;  %s6832_s10 = sshll.u32 %s7476_s27, 4  ;;  %s6833_s18 = sshll.u32 %s7480_s28, 5 }
 0x82e   : > { %7322 = vset.pattern.permute.xlu0 %v7500_v60  ;;  %7363 = vset.pattern.permute.xlu1 %v7500_v60  ;;  %s9356_s27 = sadd.s32 %s6833_s18, %s6832_s10  ;;  %s6656_s19 = sshll.u32 %s7715_s7, 4  ;;  %s9379_s19 = int_to_ptr.vmem [resolvable:$true] %s6656_s19 }
 0x82f   : > { %s6834_s28 = sshll.u32 %s9356_s27, 7  ;;  %s9459_s23 = sld [smem:[#allocation17_spill]] }
 0x830   : > { %s6640_s13 = scalar_lea.sflag [#allocation10], %s7675_s11  ;;  %p9460_p12 = scmp.ne.s32.totalorder %s9454_s17, 0 }
 0x831   : > { %4361 = vrot.lane.b32.xlu1 %v8749_v31, %s7505_s14  ;;  %4357 = vrot.lane.b32.xlu0 %v8757_v6, %s7505_s14  ;;  %s7507_s16 = smov [#allocation11]  }
 0x835   : > { %4365 = vrot.lane.b32.xlu1 %v8765_v39, %s7505_s14  ;;  %4363 = vrot.lane.b32.xlu0 %v8762_v54, %s7505_s14  ;;  %s9377_s9 = scalar_lea.hbm %s9459_s23, %s6834_s28 }
 0x839   : > { %4369 = vrot.lane.b32.xlu1 %v8775_v40, %s7505_s14  ;;  %4367 = vrot.lane.b32.xlu0 %v8771_v52, %s7505_s14 }
 0x83d   : > { %4373 = vrot.lane.b32.xlu1 %v8782_v61, %s7505_s14  ;;  %4371 = vrot.lane.b32.xlu0 %v8778_v13, %s7505_s14 }
 0x841   : > { %4377 = vrot.lane.b32.xlu1 %v8789_v45, %s7505_s14  ;;  %4375 = vrot.lane.b32.xlu0 %v8786_v4, %s7505_s14 }
 0x845   : > { %4381 = vrot.lane.b32.xlu1 %v8802_v10, %s7505_s14  ;;  %4379 = vrot.lane.b32.xlu0 %v8796_v3, %s7505_s14 }
 0x849   : > { %4385 = vrot.lane.b32.xlu1 %v8805_v26, %s7505_s14  ;;  %4383 = vrot.lane.b32.xlu0 %v8799_v59, %s7505_s14 }
 0x89f   : > { %v4360_v60 = vpop.permute.xlu1 %4359  ;;  %v4356_v55 = vpop.permute.xlu0 %4355 }
 0x8a0   : > { %v8868_v57 = vsel %vm2033_vm1, %v4338_v16, %v4356_v55 }
 0x8a3   : > { %v4362_v29 = vpop.permute.xlu1 %4361  ;;  %v4358_v51 = vpop.permute.xlu0 %4357 }
 0x8a4   : > { %v8848_v53 = vsel %vm2033_vm1, %v4356_v55, %v4358_v51  ;;  %v8851_v36 = vsel %vm2033_vm1, %v4358_v51, %v4360_v60  ;;  %v8879_v25 = vsel %vm2033_vm1, %v4360_v60, %v4362_v29 }
 0x8a5   : > { %v7282_v34 = vpack.i.bf16 %v8851_v36, %v8848_v53  ;;  %v7287_v5 = vpack.i.bf16 %v8879_v25, %v8868_v57 }
 0x8a7   : > { %v4366_v2 = vpop.permute.xlu1 %4365  ;;  %7283 = vrot.lane.b32.xlu0 %v7282_v34, %s7503_s21  ;;  %v4364_v12 = vpop.permute.xlu0 %4363 }
 0x8a8   : > { %v8857_v14 = vsel %vm2033_vm1, %v4362_v29, %v4364_v12  ;;  %v8860_v9 = vsel %vm2033_vm1, %v4364_v12, %v4366_v2 }
 0x8a9   : > { %v7292_v21 = vpack.i.bf16 %v8860_v9, %v8857_v14 }
 0x8ab   : > { %v4370_v46 = vpop.permute.xlu1 %4369  ;;  %7293 = vrot.lane.b32.xlu0 %v7292_v21, %s7503_s21  ;;  %v4368_v7 = vpop.permute.xlu0 %4367 }
 0x8ac   : > { %v8889_v38 = vsel %vm2033_vm1, %v4366_v2, %v4368_v7  ;;  %v8896_v22 = vsel %vm2033_vm1, %v4368_v7, %v4370_v46 }
 0x8ad   : > { %v7297_v28 = vpack.i.bf16 %v8896_v22, %v8889_v38 }
 0x8af   : > { %v4374_v33 = vpop.permute.xlu1 %4373  ;;  %4490 = vrot.lane.b32.xlu0 %v8848_v53, %s7506_s24  ;;  %v4372_v15 = vpop.permute.xlu0 %4371 }
 0x8b0   : > { %v8913_v20 = vsel %vm2033_vm1, %v4370_v46, %v4372_v15  ;;  %v8916_v8 = vsel %vm2033_vm1, %v4372_v15, %v4374_v33 }
 0x8b1   : > { %v7302_v11 = vpack.i.bf16 %v8916_v8, %v8913_v20 }
 0x8b3   : > { %v4378_v19 = vpop.permute.xlu1 %4377  ;;  %v4376_v50 = vpop.permute.xlu0 %4375  ;;  %4488 = vrot.lane.b32.xlu0 %v8868_v57, %s7506_s24 }
 0x8b4   : > { %v8873_v43 = vsel %vm2033_vm1, %v4374_v33, %v4376_v50  ;;  %v8876_v24 = vsel %vm2033_vm1, %v4376_v50, %v4378_v19 }
 0x8b5   : > { %v7307_v17 = vpack.i.bf16 %v8876_v24, %v8873_v43 }
 0x8b7   : > { %v4382_v27 = vpop.permute.xlu1 %4381  ;;  %4494 = vrot.lane.b32.xlu0 %v8879_v25, %s7506_s24  ;;  %v4380_v30 = vpop.permute.xlu0 %4379 }
 0x8b8   : > { %v8931_v35 = vsel %vm2033_vm1, %v4380_v30, %v4382_v27  ;;  %v8934_v62 = vsel %vm2033_vm1, %v4378_v19, %v4380_v30 }
 0x8b9   : > { %v7312_v41 = vpack.i.bf16 %v8931_v35, %v8934_v62 }
 0x8bb   : > { %v4386_v18 = vpop.permute.xlu1 %4385  ;;  %7308 = vrot.lane.b32.xlu0 %v7307_v17, %s7503_s21  ;;  %v4384_v37 = vpop.permute.xlu0 %4383 }
 0x8bc   : > { %4420 = vst.msk [vmem:[#allocation6] sm:$0xff] %vm2033_vm1, %v4386_v18  ;;  %4454 = vrot.lane.b32.xlu1 %v4386_v18, %s7503_s21  ;;  %v8900_v1 = vsel %vm2033_vm1, %v4382_v27, %v4384_v37  ;;  %v8903_v23 = vsel %vm2033_vm1, %v4384_v37, %v4386_v18 }
 0x8bd   : > { %v7317_v0 = vpack.i.bf16 %v8903_v23, %v8900_v1 }
 0x8bf   : > { %4500 = vrot.lane.b32.xlu0 %v8889_v38, %s7506_s24 }
 0x8c0   : > { %7288 = vrot.lane.b32.xlu1 %v7287_v5, %s7503_s21 }
 0x8c3   : > { %4502 = vrot.lane.b32.xlu0 %v8896_v22, %s7506_s24 }
 0x8c4   : > { %7298 = vrot.lane.b32.xlu1 %v7297_v28, %s7503_s21 }
 0x8c7   : > { %7318 = vrot.lane.b32.xlu0 %v7317_v0, %s7503_s21 }
 0x8c8   : > { %4492 = vrot.lane.b32.xlu1 %v8851_v36, %s7506_s24 }
 0x8cb   : > { %4508 = vrot.lane.b32.xlu0 %v8873_v43, %s7506_s24 }
 0x8cc   : > { %7303 = vrot.lane.b32.xlu1 %v7302_v11, %s7503_s21 }
 0x8cf   : > { %4510 = vrot.lane.b32.xlu0 %v8876_v24, %s7506_s24 }
 0x8d0   : > { %4496 = vrot.lane.b32.xlu1 %v8857_v14, %s7506_s24 }
 0x8d3   : > { %4514 = vrot.lane.b32.xlu0 %v8931_v35, %s7506_s24 }
 0x8d4   : > { %4498 = vrot.lane.b32.xlu1 %v8860_v9, %s7506_s24 }
 0x8d7   : > { %4518 = vrot.lane.b32.xlu0 %v8903_v23, %s7506_s24 }
 0x8d8   : > { %7313 = vrot.lane.b32.xlu1 %v7312_v41, %s7503_s21 }
 0x8db   : > { %4561 = vperm.xlu0 %7322, %v6802_v48  }
 0x8dc   : > { %4504 = vrot.lane.b32.xlu1 %v8913_v20, %s7506_s24 }
 0x8e0   : > { %4506 = vrot.lane.b32.xlu1 %v8916_v8, %s7506_s24 }
 0x8e4   : > { %4512 = vrot.lane.b32.xlu1 %v8934_v62, %s7506_s24 }
 0x8e8   : > { %4516 = vrot.lane.b32.xlu1 %v8900_v1, %s7506_s24 }
 0x8ec   : > { %4520 = vrot.lane.b32.xlu1 %v4386_v18, %s7506_s24 }
 0x919   : > { %v7284_v42 = vpop.permute.xlu0 %7283 }
 0x91a   : > { %v7286_v56 = vunpack.i.h.bf16 %v7284_v42  ;;  %v7285_v32 = vunpack.i.l.bf16 %v7284_v42 }
 0x91c   : > { %v4457_v63 = vsel %vm2812_vm13, %v7285_v32, %v7286_v56 }
 0x91d   : > { %v7294_v49 = vpop.permute.xlu0 %7293  ;;  %v6965_v60 = vpack.c.bf16 %v4457_v63, %v8848_v53 }
 0x91e   : > { %v7295_v12 = vunpack.i.l.bf16 %v7294_v49  ;;  %v7296_v19 = vunpack.i.h.bf16 %v7294_v49 }
 0x91f   : > { %6966 = vmatprep.subr.bf16.mxu0 %v6965_v60 }
 0x920   : > { %v4460_v5 = vsel %vm2812_vm13, %v7295_v12, %v7296_v19 }
 0x921   : > { %v4491_v55 = vpop.permute.xlu0 %4490  ;;  %v6975_v11 = vpack.c.bf16 %v4460_v5, %v8857_v14 }
 0x925   : > { %v4489_v29 = vpop.permute.xlu0 %4488 }
 0x929   : > { %v4495_v51 = vpop.permute.xlu0 %4494 }
 0x92d   : > { %v8961_v7 = vpop.permute.xlu0 %7308 }
 0x92e   : > { %v8959_v34 = vpop.permute.xlu1 %4454  ;;  %v7310_v14 = vunpack.i.l.bf16 %v8961_v7 }
 0x931   : > { %v4501_v37 = vpop.permute.xlu0 %4500 }
 0x932   : > { %v7289_v2 = vpop.permute.xlu1 %7288 }
 0x933   : > { %v7291_v21 = vunpack.i.h.bf16 %v7289_v2  ;;  %v7290_v46 = vunpack.i.l.bf16 %v7289_v2 }
 0x935   : > { %v4456_v33 = vsel %vm2812_vm13, %v7290_v46, %v7285_v32  ;;  %v4459_v15 = vsel %vm2812_vm13, %v7291_v21, %v7295_v12  ;;  %v4458_v16 = vsel %vm2812_vm13, %v7286_v56, %v7291_v21  ;;  %v4503_v56 = vpop.permute.xlu0 %4502 }
 0x936   : > { %v7299_v53 = vpop.permute.xlu1 %7298  ;;  %v6967_v50 = vpack.c.bf16 %v4456_v33, %v8868_v57  ;;  %v6969_v27 = vpack.c.bf16 %v4459_v15, %v8879_v25  ;;  %v6971_v30 = vpack.c.bf16 %v4458_v16, %v8851_v36  ;;  %v8975_v57 = vld [vmem:[%s9436_s1 + $0x10] sm:$0xff]  ;;  %v4523_v36 = vsel %vm4522_vm8, %v4489_v29, %v4491_v55 }
 0x937   : > { %v7300_v17 = vunpack.i.l.bf16 %v7299_v53  ;;  %v7301_v41 = vunpack.i.h.bf16 %v7299_v53  ;;  %v7311_v16 = vunpack.i.h.bf16 %v8961_v7  ;;  %v4529_v7 = vsel %vm4522_vm8, %v4501_v37, %v4503_v56 }
 0x938   : > { %6968 = vmatpush1.bf16.msra.mxu0 %v6967_v50  ;;  %6970 = vmatprep.subr.bf16.mxu1 %v6969_v27 }
 0x939   : > { %v4461_v18 = vsel %vm2812_vm13, %v7296_v19, %v7300_v17  ;;  %6972 = vmatpush1.bf16.msra.mxu1 %v6971_v30  ;;  %v4462_v49 = vsel %vm2812_vm13, %v7300_v17, %v7301_v41  ;;  %v7319_v21 = vpop.permute.xlu0 %7318 }
 0x93a   : > { %v4493_v28 = vpop.permute.xlu1 %4492  ;;  %v6973_v25 = vpack.c.bf16 %v4461_v18, %v8860_v9  ;;  %v6979_v2 = vpack.c.bf16 %v4462_v49, %v8889_v38 }
 0x93b   : > { %v4524_v0 = vsel %vm4522_vm8, %v4491_v55, %v4493_v28  ;;  %v4525_v55 = vsel %vm4522_vm8, %v4493_v28, %v4495_v51 }
 0x93c   : > { %4571 = vmatprep.subr.mxu0 %v4524_v0  ;;  %v7321_v0 = vunpack.i.h.bf16 %v7319_v21 }
 0x93d   : > { %4572 = vmatpush1.msra.mxu0 %v4523_v36  ;;  %v4509_v50 = vpop.permute.xlu0 %4508 }
 0x93e   : > { %v7304_v48 = vpop.permute.xlu1 %7303  ;;  %6803 = vmatmul.mubr.msk.f32.vlgmr.msra.gmra.mrb[40].mxu0 %vm564_vm4, %v8975_v57  ;;  %6974 = vmatprep.subr.bf16.mxu0 %v6973_v25 }
 0x93f   : > { %v7305_v42 = vunpack.i.l.bf16 %v7304_v48  ;;  %6976 = vmatpush1.bf16.msra.mxu0 %v6975_v11  ;;  %4773 = vmatprep.mubr.f32.mxu0 %v7499_v44  ;;  %v7306_v32 = vunpack.i.h.bf16 %v7304_v48 }
 0x941   : > { %v4463_v63 = vsel %vm2812_vm13, %v7301_v41, %v7305_v42  ;;  %v4465_v12 = vsel %vm2812_vm13, %v7306_v32, %v7310_v14  ;;  %v4464_v46 = vsel %vm2812_vm13, %v7305_v42, %v7306_v32  ;;  %v4511_v25 = vpop.permute.xlu0 %4510 }
 0x942   : > { %v4497_v9 = vpop.permute.xlu1 %4496  ;;  %v6977_v29 = vpack.c.bf16 %v4463_v63, %v8896_v22  ;;  %v6981_v38 = vpack.c.bf16 %v4465_v12, %v8916_v8  ;;  %v6983_v22 = vpack.c.bf16 %v4464_v46, %v8913_v20  ;;  %v4466_v8 = vsel %vm2812_vm13, %v7310_v14, %v7311_v16 }
 0x943   : > { %v4526_v60 = vsel %vm4522_vm8, %v4495_v51, %v4497_v9  ;;  %v7320_v20 = vunpack.i.l.bf16 %v7319_v21  ;;  %v6987_v28 = vpack.c.bf16 %v4466_v8, %v8873_v43 }
 0x944   : > { %4642 = vmatprep.subr.mxu1 %v4526_v60 }
 0x945   : > { %4643 = vmatpush1.msra.mxu1 %v4525_v55  ;;  %v4515_v49 = vpop.permute.xlu0 %4514 }
 0x946   : > { %v4499_v33 = vpop.permute.xlu1 %4498  ;;  %6804 = vmatmul.mubr.msk.f32.vlgmr.msra.gmra.mrb[40].mxu1 %vm564_vm4, %v8975_v57  ;;  %6978 = vmatprep.subr.bf16.mxu1 %v6977_v29 }
 0x947   : > { %v4527_v15 = vsel %vm4522_vm8, %v4497_v9, %v4499_v33  ;;  %6980 = vmatpush1.bf16.msra.mxu1 %v6979_v2  ;;  %v4528_v51 = vsel %vm4522_vm8, %v4499_v33, %v4501_v37  ;;  %4844 = vmatprep.mubr.f32.mxu1 %v7499_v44 }
 0x948   : > { %4713 = vmatprep.subr.mxu0 %v4528_v51 }
 0x949   : > { %4714 = vmatpush1.msra.mxu0 %v4527_v15  ;;  %v4519_v55 = vpop.permute.xlu0 %4518 }
 0x94a   : > { %v7314_v19 = vpop.permute.xlu1 %7313  ;;  %6805 = vmatmul.mubr.msk.f32.vlgmr.msra.gmra.mrb[42].mxu0 %vm564_vm4, %v8975_v57  ;;  %6982 = vmatprep.subr.bf16.mxu0 %v6981_v38 }
 0x94b   : > { %v7315_v53 = vunpack.i.l.bf16 %v7314_v19  ;;  %6984 = vmatpush1.bf16.msra.mxu0 %v6983_v22  ;;  %4915 = vmatprep.mubr.f32.mxu0 %v7499_v44  ;;  %v7316_v27 = vunpack.i.h.bf16 %v7314_v19 }
 0x94d   : > { %v4467_v30 = vsel %vm2812_vm13, %v7311_v16, %v7315_v53  ;;  %v4469_v36 = vsel %vm2812_vm13, %v7316_v27, %v7320_v20  ;;  %v4468_v11 = vsel %vm2812_vm13, %v7315_v53, %v7316_v27 }
 0x94e   : > { %v4505_v17 = vpop.permute.xlu1 %4504  ;;  %v6985_v5 = vpack.c.bf16 %v4467_v30, %v8876_v24  ;;  %v6989_v43 = vpack.c.bf16 %v4469_v36, %v8931_v35  ;;  %v4471_v24 = vsel %vm2812_vm13, %v7321_v0, %v8959_v34  ;;  %v6991_v42 = vpack.c.bf16 %v4468_v11, %v8934_v62 }
 0x94f   : > { %v4530_v18 = vsel %vm4522_vm8, %v4503_v56, %v4505_v17  ;;  %v4470_v56 = vsel %vm2812_vm13, %v7320_v20, %v7321_v0  ;;  %v4533_v35 = vsel %vm4522_vm8, %v4509_v50, %v4511_v25  ;;  %v6993_v34 = vpack.c.bf16 %v4471_v24, %v8903_v23 }
 0x950   : > { %4784 = vmatprep.subr.mxu1 %v4530_v18  ;;  %v6995_v62 = vpack.c.bf16 %v4470_v56, %v8900_v1 }
 0x951   : > { %4785 = vmatpush1.msra.mxu1 %v4529_v7 }
 0x952   : > { %v4507_v41 = vpop.permute.xlu1 %4506  ;;  %6806 = vmatmul.mubr.msk.f32.vlgmr.msra.gmra.mrb[42].mxu1 %vm564_vm4, %v8975_v57  ;;  %6986 = vmatprep.subr.bf16.mxu1 %v6985_v5 }
 0x953   : > { %v4531_v48 = vsel %vm4522_vm8, %v4505_v17, %v4507_v41  ;;  %6988 = vmatpush1.bf16.msra.mxu1 %v6987_v28  ;;  %v4532_v37 = vsel %vm4522_vm8, %v4507_v41, %v4509_v50  ;;  %4986 = vmatprep.mubr.f32.mxu1 %v7499_v44 }
 0x954   : > { %4855 = vmatprep.subr.mxu0 %v4532_v37 }
 0x955   : > { %4856 = vmatpush1.msra.mxu0 %v4531_v48 }
 0x956   : > { %v4513_v32 = vpop.permute.xlu1 %4512  ;;  %6807 = vmatmul.mubr.msk.f32.vlgmr.msra.gmra.mrb[44].mxu0 %vm564_vm4, %v8975_v57  ;;  %6990 = vmatprep.subr.bf16.mxu0 %v6989_v43 }
 0x957   : > { %6992 = vmatpush1.bf16.msra.mxu0 %v6991_v42  ;;  %v4534_v63 = vsel %vm4522_vm8, %v4511_v25, %v4513_v32  ;;  %5057 = vmatprep.mubr.f32.mxu0 %v7499_v44  ;;  %v4535_v60 = vsel %vm4522_vm8, %v4513_v32, %v4515_v49 }
 0x958   : > { %4926 = vmatprep.subr.mxu1 %v4534_v63 }
 0x959   : > { %4927 = vmatpush1.msra.mxu1 %v4533_v35 }
 0x95a   : > { %v4517_v9 = vpop.permute.xlu1 %4516  ;;  %6808 = vmatmul.mubr.msk.f32.vlgmr.msra.gmra.mrb[44].mxu1 %vm564_vm4, %v8975_v57  ;;  %6994 = vmatprep.subr.bf16.mxu1 %v6993_v34  ;;  %v9041_v2 = vpop.permute.xlu0 %4561 }
 0x95b   : > { %6996 = vmatpush1.bf16.msra.mxu1 %v6995_v62  ;;  %v4536_v14 = vsel %vm4522_vm8, %v4515_v49, %v4517_v9  ;;  %5128 = vmatprep.mubr.f32.mxu1 %v7499_v44  ;;  %v4537_v23 = vsel %vm4522_vm8, %v4517_v9, %v4519_v55 }
 0x95c   : > { %4997 = vmatprep.subr.mxu0 %v4536_v14 }
 0x95d   : > { %4998 = vmatpush1.msra.mxu0 %v4535_v60 }
 0x95e   : > { %v4521_v29 = vpop.permute.xlu1 %4520  ;;  %6809 = vmatmul.mubr.msk.f32.vlgmr.msra.gmra.mrb[46].mxu0 %vm564_vm4, %v8975_v57 }
 0x95f   : > { %v4538_v1 = vsel %vm4522_vm8, %v4519_v55, %v4521_v29  ;;  %5475 = vmatprep.mubr.f32.mxu0 %v7499_v44 }
 0x960   : > { %5068 = vmatprep.subr.mxu1 %v4538_v1 }
 0x961   : > { %5069 = vmatpush1.msra.mxu1 %v4537_v23 }
 0x962   : > { %6810 = vmatmul.mubr.msk.f32.vlgmr.msra.gmra.mrb[46].mxu1 %vm564_vm4, %v8975_v57 }
 0x963   : > { %5546 = vmatprep.mubr.f32.mxu1 %v7499_v44 }
 0xa11   : > { %v4633_v12 = vpop.f32.mrb[40].mxu0 }
 0xa12   : > { %v4634_v21 = vadd.f32 %v4633_v12, %v9041_v2  ;;  %v4635_v46 = vpop.f32.mrb[41].mxu0 }
 0xa13   : > { %v4636_v33 = vadd.f32 %v4635_v46, %v9041_v2 }
 0xa14   : > { %v5151_v15 = vmul.f32 0.01, %v4634_v21  ;;  %vm5135_vm2 = vcmp.gt.f32.partialorder %v4634_v21, 0.0 }
 0xa15   : > { %v5152_v51 = vmul.f32 0.01, %v4636_v33  ;;  %vm5136_vm9 = vcmp.gt.f32.partialorder %v4636_v33, 0.0 }
 0xa16   : > { %v5167_v38 = vsel %vm5135_vm2, %v4634_v21, %v5151_v15 }
 0xa17   : > { %5200 = vrot.lane.b32.xlu1 %v5167_v38, %s7505_s14  ;;  %v5168_v19 = vsel %vm5136_vm9, %v4636_v33, %v5152_v51 }
 0xa19   : > { %v4704_v22 = vpop.f32.mrb[40].mxu1 }
 0xa1a   : > { %v4705_v57 = vadd.f32 %v4704_v22, %v9041_v2  ;;  %v4706_v16 = vpop.f32.mrb[41].mxu1 }
 0xa1b   : > { %v4707_v53 = vadd.f32 %v4706_v16, %v9041_v2  ;;  %5202 = vrot.lane.b32.xlu1 %v5168_v19, %s7505_s14 }
 0xa1c   : > { %v5153_v50 = vmul.f32 0.01, %v4705_v57  ;;  %vm5137_vm10 = vcmp.gt.f32.partialorder %v4705_v57, 0.0 }
 0xa1d   : > { %v5154_v27 = vmul.f32 0.01, %v4707_v53  ;;  %v4775_v30 = vpop.f32.mrb[42].mxu0  ;;  %vm5138_vm11 = vcmp.gt.f32.partialorder %v4707_v53, 0.0 }
 0xa1e   : > { %v4776_v8 = vadd.f32 %v4775_v30, %v9041_v2  ;;  %v4777_v17 = vpop.f32.mrb[43].mxu0  ;;  %v5169_v20 = vsel %vm5137_vm10, %v4705_v57, %v5153_v50 }
 0xa1f   : > { %v4778_v18 = vadd.f32 %v4777_v17, %v9041_v2  ;;  %5204 = vrot.lane.b32.xlu0 %v5169_v20, %s7505_s14  ;;  %v5170_v7 = vsel %vm5138_vm11, %v4707_v53, %v5154_v27 }
 0xa20   : > { %v5155_v5 = vmul.f32 0.01, %v4776_v8  ;;  %5206 = vrot.lane.b32.xlu1 %v5170_v7, %s7505_s14  ;;  %vm5139_vm14 = vcmp.gt.f32.partialorder %v4776_v8, 0.0 }
 0xa21   : > { %v5156_v28 = vmul.f32 0.01, %v4778_v18  ;;  %vm5140_vm15 = vcmp.gt.f32.partialorder %v4778_v18, 0.0 }
 0xa22   : > { %v5171_v0 = vsel %vm5139_vm14, %v4776_v8, %v5155_v5 }
 0xa23   : > { %5208 = vrot.lane.b32.xlu0 %v5171_v0, %s7505_s14  ;;  %v5172_v36 = vsel %vm5140_vm15, %v4778_v18, %v5156_v28  ;;  %v5183_v18 = vld [vmem:[#allocation7] sm:$0xff] }
 0xa24   : > { %5210 = vrot.lane.b32.xlu1 %v5172_v36, %s7505_s14 }
 0xa25   : > { %v4846_v25 = vpop.f32.mrb[42].mxu1 }
 0xa26   : > { %v4847_v11 = vadd.f32 %v4846_v25, %v9041_v2  ;;  %v4848_v41 = vpop.f32.mrb[43].mxu1 }
 0xa27   : > { %v4849_v48 = vadd.f32 %v4848_v41, %v9041_v2 }
 0xa28   : > { %v5157_v37 = vmul.f32 0.01, %v4847_v11  ;;  %vm5141_vm0 = vcmp.gt.f32.partialorder %v4847_v11, 0.0 }
 0xa29   : > { %v5158_v43 = vmul.f32 0.01, %v4849_v48  ;;  %v4917_v24 = vpop.f32.mrb[44].mxu0  ;;  %vm5142_vm5 = vcmp.gt.f32.partialorder %v4849_v48, 0.0 }
 0xa2a   : > { %v4918_v42 = vadd.f32 %v4917_v24, %v9041_v2  ;;  %v4919_v56 = vpop.f32.mrb[45].mxu0  ;;  %v5173_v32 = vsel %vm5141_vm0, %v4847_v11, %v5157_v37 }
 0xa2b   : > { %v4920_v63 = vadd.f32 %v4919_v56, %v9041_v2  ;;  %5212 = vrot.lane.b32.xlu0 %v5173_v32, %s7505_s14  ;;  %v5174_v35 = vsel %vm5142_vm5, %v4849_v48, %v5158_v43 }
 0xa2c   : > { %v5159_v49 = vmul.f32 0.01, %v4918_v42  ;;  %5214 = vrot.lane.b32.xlu1 %v5174_v35, %s7505_s14  ;;  %vm5143_vm6 = vcmp.gt.f32.partialorder %v4918_v42, 0.0 }
 0xa2d   : > { %v5160_v34 = vmul.f32 0.01, %v4920_v63  ;;  %v4988_v62 = vpop.f32.mrb[44].mxu1  ;;  %vm5144_vm3 = vcmp.gt.f32.partialorder %v4920_v63, 0.0 }
 0xa2e   : > { %v4989_v9 = vadd.f32 %v4988_v62, %v9041_v2  ;;  %v4990_v14 = vpop.f32.mrb[45].mxu1  ;;  %v5175_v60 = vsel %vm5143_vm6, %v4918_v42, %v5159_v49 }
 0xa2f   : > { %v4991_v55 = vadd.f32 %v4990_v14, %v9041_v2  ;;  %5216 = vrot.lane.b32.xlu0 %v5175_v60, %s7505_s14  ;;  %v5176_v29 = vsel %vm5144_vm3, %v4920_v63, %v5160_v34 }
 0xa30   : > { %v5161_v1 = vmul.f32 0.01, %v4989_v9  ;;  %5218 = vrot.lane.b32.xlu1 %v5176_v29, %s7505_s14  ;;  %vm5145_vm12 = vcmp.gt.f32.partialorder %v4989_v9, 0.0 }
 0xa31   : > { %v5162_v23 = vmul.f32 0.01, %v4991_v55  ;;  %v5059_v12 = vpop.f32.mrb[46].mxu0  ;;  %vm5146_vm7 = vcmp.gt.f32.partialorder %v4991_v55, 0.0 }
 0xa32   : > { %v5060_v21 = vadd.f32 %v5059_v12, %v9041_v2  ;;  %v5061_v46 = vpop.f32.mrb[47].mxu0  ;;  %v5177_v33 = vsel %vm5145_vm12, %v4989_v9, %v5161_v1 }
 0xa33   : > { %v5062_v15 = vadd.f32 %v5061_v46, %v9041_v2  ;;  %5220 = vrot.lane.b32.xlu0 %v5177_v33, %s7505_s14  ;;  %v5178_v51 = vsel %vm5146_vm7, %v4991_v55, %v5162_v23 }
 0xa34   : > { %v5163_v38 = vmul.f32 0.01, %v5060_v21  ;;  %5222 = vrot.lane.b32.xlu1 %v5178_v51, %s7505_s14  ;;  %vm5147_vm2 = vcmp.gt.f32.partialorder %v5060_v21, 0.0 }
 0xa35   : > { %v5164_v22 = vmul.f32 0.01, %v5062_v15  ;;  %v5130_v57 = vpop.f32.mrb[46].mxu1  ;;  %vm5148_vm9 = vcmp.gt.f32.partialorder %v5062_v15, 0.0 }
 0xa36   : > { %v5131_v16 = vadd.f32 %v5130_v57, %v9041_v2  ;;  %v5132_v19 = vpop.f32.mrb[47].mxu1  ;;  %v5179_v53 = vsel %vm5147_vm2, %v5060_v21, %v5163_v38 }
 0xa37   : > { %v5133_v50 = vadd.f32 %v5132_v19, %v9041_v2  ;;  %5224 = vrot.lane.b32.xlu0 %v5179_v53, %s7505_s14  ;;  %v5180_v27 = vsel %vm5148_vm9, %v5062_v15, %v5164_v22 }
 0xa38   : > { %v5165_v30 = vmul.f32 0.01, %v5131_v16  ;;  %5226 = vrot.lane.b32.xlu1 %v5180_v27, %s7505_s14  ;;  %vm5149_vm10 = vcmp.gt.f32.partialorder %v5131_v16, 0.0  ;;  %v6822_v27 = vld [vmem:[%s9441_s6 + $0x10] sm:$0xff] }
 0xa39   : > { %v5166_v8 = vmul.f32 0.01, %v5133_v50  ;;  %vm5150_vm11 = vcmp.gt.f32.partialorder %v5133_v50, 0.0 }
 0xa3a   : > { %v5181_v17 = vsel %vm5149_vm10, %v5131_v16, %v5165_v30 }
 0xa3b   : > { %5228 = vrot.lane.b32.xlu0 %v5181_v17, %s7505_s14  ;;  %v5182_v20 = vsel %vm5150_vm11, %v5133_v50, %v5166_v8  ;;  %v6812_v50 = vld [vmem:[%s9439_s4 + $0x10] sm:$0xff] }
 0xa3c   : > { %5230 = vrot.lane.b32.xlu1 %v5182_v20, %s7505_s14  ;;  %s7398_s14 = sshll.u32 %s7507_s16, 4  ;;  %s7399_s14 = int_to_ptr.vmem [resolvable:$false] %s7398_s14 }
 0xa3d   : > { %p7401_p13 = scmp.lt.s32.totalorder %s9379_s19, %s7399_s14 }
 0xa89   : > { %v5201_v7 = vpop.permute.xlu1 %5200 }
 0xa8a   : > { %v9076_v5 = vsel %vm2033_vm1, %v5183_v18, %v5201_v7 }
 0xa8b   : > { %5333 = vrot.lane.b32.xlu1 %v9076_v5, %s7506_s24 }
 0xa8d   : > { %v5203_v2 = vpop.permute.xlu1 %5202 }
 0xa8e   : > { %v9081_v28 = vsel %vm2033_vm1, %v5201_v7, %v5203_v2 }
 0xa8f   : > { %5335 = vrot.lane.b32.xlu1 %v9081_v28, %s7506_s24 }
 0xa91   : > { %v5205_v0 = vpop.permute.xlu0 %5204 }
 0xa92   : > { %v9086_v36 = vsel %vm2033_vm1, %v5203_v2, %v5205_v0  ;;  %v5207_v25 = vpop.permute.xlu1 %5206 }
 0xa93   : > { %v9089_v11 = vsel %vm2033_vm1, %v5205_v0, %v5207_v25  ;;  %v7323_v41 = vpack.i.bf16 %v9086_v36, %v9081_v28 }
 0xa94   : > { %5339 = vrot.lane.b32.xlu1 %v9089_v11, %s7506_s24 }
 0xa95   : > { %v5209_v48 = vpop.permute.xlu0 %5208  ;;  %7324 = vrot.lane.b32.xlu0 %v7323_v41, %s7503_s21 }
 0xa96   : > { %v9097_v37 = vsel %vm2033_vm1, %v5207_v25, %v5209_v48  ;;  %v5211_v24 = vpop.permute.xlu1 %5210 }
 0xa97   : > { %v7328_v43 = vpack.i.bf16 %v9097_v37, %v9089_v11  ;;  %v9105_v42 = vsel %vm2033_vm1, %v5209_v48, %v5211_v24 }
 0xa98   : > { %v7333_v49 = vpack.i.bf16 %v9105_v42, %v9076_v5 }
 0xa99   : > { %5337 = vrot.lane.b32.xlu0 %v9086_v36, %s7506_s24  ;;  %7329 = vrot.lane.b32.xlu1 %v7328_v43, %s7503_s21 }
 0xa9d   : > { %v5213_v56 = vpop.permute.xlu0 %5212  ;;  %5341 = vrot.lane.b32.xlu0 %v9097_v37, %s7506_s24 }
 0xa9e   : > { %v9110_v32 = vsel %vm2033_vm1, %v5211_v24, %v5213_v56  ;;  %v5215_v63 = vpop.permute.xlu1 %5214 }
 0xa9f   : > { %v9113_v35 = vsel %vm2033_vm1, %v5213_v56, %v5215_v63 }
 0xaa0   : > { %v7338_v34 = vpack.i.bf16 %v9113_v35, %v9110_v32 }
 0xaa1   : > { %7334 = vrot.lane.b32.xlu0 %v7333_v49, %s7503_s21  ;;  %v5217_v62 = vpop.permute.xlu0 %5216 }
 0xaa2   : > { %7339 = vrot.lane.b32.xlu1 %v7338_v34, %s7503_s21  ;;  %v5219_v9 = vpop.permute.xlu1 %5218  ;;  %v9129_v29 = vsel %vm2033_vm1, %v5215_v63, %v5217_v62 }
 0xaa3   : > { %v9126_v60 = vsel %vm2033_vm1, %v5217_v62, %v5219_v9 }
 0xaa4   : > { %v7343_v23 = vpack.i.bf16 %v9126_v60, %v9129_v29 }
 0xaa5   : > { %5343 = vrot.lane.b32.xlu0 %v9105_v42, %s7506_s24  ;;  %v5221_v55 = vpop.permute.xlu0 %5220 }
 0xaa6   : > { %5345 = vrot.lane.b32.xlu1 %v9110_v32, %s7506_s24  ;;  %v5223_v14 = vpop.permute.xlu1 %5222  ;;  %v9141_v21 = vsel %vm2033_vm1, %v5219_v9, %v5221_v55 }
 0xaa7   : > { %v9138_v12 = vsel %vm2033_vm1, %v5221_v55, %v5223_v14  ;;  %v9198_v55 = vld [vmem:[%s9438_s3 + $0x10] sm:$0xff] }
 0xaa8   : > { %v7348_v15 = vpack.i.bf16 %v9138_v12, %v9141_v21 }
 0xaa9   : > { %5347 = vrot.lane.b32.xlu0 %v9113_v35, %s7506_s24  ;;  %v5225_v46 = vpop.permute.xlu0 %5224 }
 0xaaa   : > { %5349 = vrot.lane.b32.xlu1 %v9129_v29, %s7506_s24  ;;  %v5227_v1 = vpop.permute.xlu1 %5226  ;;  %v9150_v51 = vsel %vm2033_vm1, %v5223_v14, %v5225_v46 }
 0xaab   : > { %v9153_v38 = vsel %vm2033_vm1, %v5225_v46, %v5227_v1 }
 0xaac   : > { %v7353_v22 = vpack.i.bf16 %v9153_v38, %v9150_v51 }
 0xaad   : > { %7344 = vrot.lane.b32.xlu0 %v7343_v23, %s7503_s21  ;;  %v5229_v57 = vpop.permute.xlu0 %5228 }
 0xaae   : > { %5353 = vrot.lane.b32.xlu1 %v9141_v21, %s7506_s24  ;;  %v5231_v33 = vpop.permute.xlu1 %5230  ;;  %v9163_v16 = vsel %vm2033_vm1, %v5227_v1, %v5229_v57 }
 0xaaf   : > { %5265 = vst.msk [vmem:[#allocation7] sm:$0xff] %vm2033_vm1, %v5231_v33  ;;  %v9166_v19 = vsel %vm2033_vm1, %v5229_v57, %v5231_v33 }
 0xab0   : > { %v7358_v53 = vpack.i.bf16 %v9166_v19, %v9163_v16 }
 0xab1   : > { %7349 = vrot.lane.b32.xlu0 %v7348_v15, %s7503_s21 }
 0xab2   : > { %5299 = vrot.lane.b32.xlu1 %v5231_v33, %s7503_s21 }
 0xab5   : > { %5351 = vrot.lane.b32.xlu0 %v9126_v60, %s7506_s24 }
 0xab6   : > { %7354 = vrot.lane.b32.xlu1 %v7353_v22, %s7503_s21 }
 0xab9   : > { %5355 = vrot.lane.b32.xlu0 %v9138_v12, %s7506_s24 }
 0xaba   : > { %5357 = vrot.lane.b32.xlu1 %v9150_v51, %s7506_s24 }
 0xabd   : > { %7359 = vrot.lane.b32.xlu0 %v7358_v53, %s7503_s21  ;;  %s7394_s21 = scalar_lea.vmem %s9379_s19, 2048 }
 0xabe   : > { %5361 = vrot.lane.b32.xlu1 %v9163_v16, %s7506_s24  ;;  %p7395_p9 = scmp.ne.s32.totalorder %s9379_s19, %s7394_s21 }
 0xac0   : > { %p7396_p0 = pnand %p7395_p9, %p9460_p12 }
 0xac1   : > { %5359 = vrot.lane.b32.xlu0 %v9153_v38, %s7506_s24 }
 0xac2   : > { %5365 = vrot.lane.b32.xlu1 %v5231_v33, %s7506_s24  ;;  %p7397_p6 = pneg %p7396_p0 }
 0xac5   : > { %5363 = vrot.lane.b32.xlu0 %v9166_v19, %s7506_s24  ;;  %s7400_s24 = scalar_lea.vmem %s7399_s14, 4096 }
 0xac6   : > { %6033 = vperm.xlu1 %7363, %v6822_v27   ;;  %p7402_p4 = scmp.lt.s32.totalorder %s7400_s24, %s7394_s21 }
 0xac8   : > { %p7403_p5 = por %p7402_p4, %p7401_p13 }
 0xac9   : > { %5405 = vperm.xlu0 %7322, %v6812_v50  }
 0xaca   : > { %p7404_p7 = pnand %p7403_p5, %p7397_p6 }
 0xafd   : > { %v5334_v30 = vpop.permute.xlu1 %5333 }
 0xb01   : > { %v5336_v8 = vpop.permute.xlu1 %5335 }
 0xb02   : > { %v5367_v27 = vsel %vm4522_vm8, %v5334_v30, %v5336_v8 }
 0xb06   : > { %v5340_v17 = vpop.permute.xlu1 %5339 }
 0xb07   : > { %v7325_v20 = vpop.permute.xlu0 %7324 }
 0xb08   : > { %v7327_v18 = vunpack.i.h.bf16 %v7325_v20  ;;  %v7326_v7 = vunpack.i.l.bf16 %v7325_v20 }
 0xb0a   : > { %v5302_v2 = vsel %vm2812_vm13, %v7326_v7, %v7327_v18 }
 0xb0b   : > { %v5338_v0 = vpop.permute.xlu0 %5337  ;;  %v7330_v25 = vpop.permute.xlu1 %7329  ;;  %v6997_v41 = vpack.c.bf16 %v5302_v2, %v9081_v28 }
 0xb0c   : > { %v7332_v48 = vunpack.i.h.bf16 %v7330_v25  ;;  %v7331_v43 = vunpack.i.l.bf16 %v7330_v25  ;;  %v5369_v1 = vsel %vm4522_vm8, %v5338_v0, %v5340_v17  ;;  %v5368_v57 = vsel %vm4522_vm8, %v5336_v8, %v5338_v0 }
 0xb0d   : > { %6998 = vmatprep.subr.bf16.mxu0 %v6997_v41 }
 0xb0e   : > { %v5303_v24 = vsel %vm2812_vm13, %v7327_v18, %v7331_v43  ;;  %v5304_v56 = vsel %vm2812_vm13, %v7331_v43, %v7332_v48 }
 0xb0f   : > { %v7003_v63 = vpack.c.bf16 %v5303_v24, %v9086_v36  ;;  %v5342_v49 = vpop.permute.xlu0 %5341  ;;  %v7001_v34 = vpack.c.bf16 %v5304_v56, %v9089_v11 }
 0xb10   : > { %v5370_v62 = vsel %vm4522_vm8, %v5340_v17, %v5342_v49 }
 0xb11   : > { %7002 = vmatprep.subr.bf16.mxu1 %v7001_v34 }
 0xb12   : > { %7004 = vmatpush1.bf16.msra.mxu1 %v7003_v63 }
 0xb13   : > { %v7335_v9 = vpop.permute.xlu0 %7334  ;;  %5486 = vmatprep.subr.mxu1 %v5370_v62 }
 0xb14   : > { %v7336_v14 = vunpack.i.l.bf16 %v7335_v9  ;;  %v7340_v28 = vpop.permute.xlu1 %7339  ;;  %v7337_v23 = vunpack.i.h.bf16 %v7335_v9 }
 0xb15   : > { %v7341_v36 = vunpack.i.l.bf16 %v7340_v28  ;;  %v7342_v18 = vunpack.i.h.bf16 %v7340_v28 }
 0xb16   : > { %v5301_v46 = vsel %vm2812_vm13, %v7336_v14, %v7326_v7  ;;  %5487 = vmatpush1.msra.mxu1 %v5369_v1  ;;  %v5305_v53 = vsel %vm2812_vm13, %v7332_v48, %v7337_v23 }
 0xb17   : > { %v6999_v11 = vpack.c.bf16 %v5301_v46, %v9076_v5  ;;  %v5344_v33 = vpop.permute.xlu0 %5343  ;;  %6814 = vmatmul.mubr.msk.f32.vlgmr.msra.gmra.mrb[48].mxu1 %vm564_vm4, %v9198_v55  ;;  %v5306_v22 = vsel %vm2812_vm13, %v7337_v23, %v7341_v36  ;;  %v7007_v20 = vpack.c.bf16 %v5305_v53, %v9097_v37  ;;  %v5307_v30 = vsel %vm2812_vm13, %v7341_v36, %v7342_v18 }
 0xb18   : > { %v5346_v15 = vpop.permute.xlu1 %5345  ;;  %5688 = vmatprep.mubr.f32.mxu1 %v7499_v44  ;;  %v7005_v5 = vpack.c.bf16 %v5306_v22, %v9105_v42  ;;  %v5371_v37 = vsel %vm4522_vm8, %v5342_v49, %v5344_v33  ;;  %v7011_v43 = vpack.c.bf16 %v5307_v30, %v9110_v32 }
 0xb19   : > { %7000 = vmatpush1.bf16.msra.mxu0 %v6999_v11  ;;  %v5372_v2 = vsel %vm4522_vm8, %v5344_v33, %v5346_v15 }
 0xb1a   : > { %5415 = vmatprep.subr.mxu0 %v5368_v57 }
 0xb1b   : > { %v5348_v50 = vpop.permute.xlu0 %5347 }
 0xb1c   : > { %v5350_v17 = vpop.permute.xlu1 %5349  ;;  %v5373_v28 = vsel %vm4522_vm8, %v5346_v15, %v5348_v50 }
 0xb1d   : > { %5416 = vmatpush1.msra.mxu0 %v5367_v27  ;;  %v5374_v62 = vsel %vm4522_vm8, %v5348_v50, %v5350_v17 }
 0xb1e   : > { %6813 = vmatmul.mubr.msk.f32.vlgmr.msra.gmra.mrb[48].mxu0 %vm564_vm4, %v9198_v55  ;;  %7006 = vmatprep.subr.bf16.mxu0 %v7005_v5 }
 0xb1f   : > { %v7345_v7 = vpop.permute.xlu0 %7344  ;;  %7008 = vmatpush1.bf16.msra.mxu0 %v7007_v20  ;;  %5617 = vmatprep.mubr.f32.mxu0 %v7499_v44 }
 0xb20   : > { %v7346_v0 = vunpack.i.l.bf16 %v7345_v7  ;;  %v5354_v25 = vpop.permute.xlu1 %5353  ;;  %5557 = vmatprep.subr.mxu0 %v5372_v2  ;;  %v7347_v42 = vunpack.i.h.bf16 %v7345_v7 }
 0xb22   : > { %v5308_v8 = vsel %vm2812_vm13, %v7342_v18, %v7346_v0  ;;  %v5309_v63 = vsel %vm2812_vm13, %v7346_v0, %v7347_v42 }
 0xb23   : > { %v7350_v41 = vpop.permute.xlu0 %7349  ;;  %5558 = vmatpush1.msra.mxu0 %v5371_v37  ;;  %v7009_v48 = vpack.c.bf16 %v5308_v8, %v9113_v35  ;;  %v7015_v35 = vpack.c.bf16 %v5309_v63, %v9129_v29 }
 0xb24   : > { %v7351_v24 = vunpack.i.l.bf16 %v7350_v41  ;;  %v5300_v56 = vpop.permute.xlu1 %5299  ;;  %6815 = vmatmul.mubr.msk.f32.vlgmr.msra.gmra.mrb[50].mxu0 %vm564_vm4, %v9198_v55  ;;  %v7352_v34 = vunpack.i.h.bf16 %v7350_v41 }
 0xb25   : > { %7010 = vmatprep.subr.bf16.mxu1 %v7009_v48  ;;  %5759 = vmatprep.mubr.f32.mxu0 %v7499_v44 }
 0xb26   : > { %v5310_v49 = vsel %vm2812_vm13, %v7347_v42, %v7351_v24  ;;  %7012 = vmatpush1.bf16.msra.mxu1 %v7011_v43  ;;  %v5311_v23 = vsel %vm2812_vm13, %v7351_v24, %v7352_v34 }
 0xb27   : > { %v5352_v9 = vpop.permute.xlu0 %5351  ;;  %5628 = vmatprep.subr.mxu1 %v5374_v62  ;;  %v7013_v32 = vpack.c.bf16 %v5310_v49, %v9126_v60  ;;  %v7019_v33 = vpack.c.bf16 %v5311_v23, %v9141_v21 }
 0xb28   : > { %v7355_v14 = vpop.permute.xlu1 %7354  ;;  %v5376_v36 = vsel %vm4522_vm8, %v5352_v9, %v5354_v25  ;;  %v5375_v15 = vsel %vm4522_vm8, %v5350_v17, %v5352_v9 }
 0xb29   : > { %v7356_v1 = vunpack.i.l.bf16 %v7355_v14  ;;  %7014 = vmatprep.subr.bf16.mxu0 %v7013_v32  ;;  %v7357_v22 = vunpack.i.h.bf16 %v7355_v14 }
 0xb2a   : > { %5629 = vmatpush1.msra.mxu1 %v5373_v28  ;;  %7016 = vmatpush1.bf16.msra.mxu0 %v7015_v35 }
 0xb2b   : > { %v5312_v46 = vsel %vm2812_vm13, %v7352_v34, %v7356_v1  ;;  %v5356_v11 = vpop.permute.xlu0 %5355  ;;  %6816 = vmatmul.mubr.msk.f32.vlgmr.msra.gmra.mrb[50].mxu1 %vm564_vm4, %v9198_v55  ;;  %5699 = vmatprep.subr.mxu0 %v5376_v36 }
 0xb2c   : > { %v5358_v60 = vpop.permute.xlu1 %5357  ;;  %v7017_v29 = vpack.c.bf16 %v5312_v46, %v9138_v12  ;;  %5830 = vmatprep.mubr.f32.mxu1 %v7499_v44  ;;  %v5313_v12 = vsel %vm2812_vm13, %v7356_v1, %v7357_v22  ;;  %v5377_v17 = vsel %vm4522_vm8, %v5354_v25, %v5356_v11 }
 0xb2d   : > { %v5378_v53 = vsel %vm4522_vm8, %v5356_v11, %v5358_v60  ;;  %v7023_v42 = vpack.c.bf16 %v5313_v12, %v9150_v51 }
 0xb2e   : > { %5700 = vmatpush1.msra.mxu0 %v5375_v15  ;;  %7018 = vmatprep.subr.bf16.mxu1 %v7017_v29 }
 0xb2f   : > { %v7360_v57 = vpop.permute.xlu0 %7359  ;;  %6817 = vmatmul.mubr.msk.f32.vlgmr.msra.gmra.mrb[52].mxu0 %vm564_vm4, %v9198_v55  ;;  %7020 = vmatpush1.bf16.msra.mxu1 %v7019_v33 }
 0xb30   : > { %v7362_v50 = vunpack.i.h.bf16 %v7360_v57  ;;  %v7361_v27 = vunpack.i.l.bf16 %v7360_v57  ;;  %5770 = vmatprep.subr.mxu1 %v5378_v53  ;;  %5901 = vmatprep.mubr.f32.mxu0 %v7499_v44  ;;  %v5362_v21 = vpop.permute.xlu1 %5361 }
 0xb32   : > { %v5314_v5 = vsel %vm2812_vm13, %v7357_v22, %v7361_v27  ;;  %v5315_v20 = vsel %vm2812_vm13, %v7361_v27, %v7362_v50  ;;  %v5316_v18 = vsel %vm2812_vm13, %v7362_v50, %v5300_v56 }
 0xb33   : > { %v7027_v7 = vpack.c.bf16 %v5315_v20, %v9163_v16  ;;  %v5360_v2 = vpop.permute.xlu0 %5359  ;;  %5771 = vmatpush1.msra.mxu1 %v5377_v17  ;;  %v7021_v0 = vpack.c.bf16 %v5314_v5, %v9153_v38  ;;  %v7025_v30 = vpack.c.bf16 %v5316_v18, %v9166_v19  ;;  %v6821_v19 = vld [vmem:[%s9440_s5 + $0x10] sm:$0xff] }
 0xb34   : > { %6818 = vmatmul.mubr.msk.f32.vlgmr.msra.gmra.mrb[52].mxu1 %vm564_vm4, %v9198_v55  ;;  %v5380_v25 = vsel %vm4522_vm8, %v5360_v2, %v5362_v21  ;;  %v5366_v37 = vpop.permute.xlu1 %5365  ;;  %v5379_v51 = vsel %vm4522_vm8, %v5358_v60, %v5360_v2 }
 0xb35   : > { %7022 = vmatprep.subr.bf16.mxu0 %v7021_v0  ;;  %7026 = vmatprep.subr.bf16.mxu1 %v7025_v30 }
 0xb36   : > { %7024 = vmatpush1.bf16.msra.mxu0 %v7023_v42  ;;  %7028 = vmatpush1.bf16.msra.mxu1 %v7027_v7 }
 0xb37   : > { %v5364_v8 = vpop.permute.xlu0 %5363  ;;  %5841 = vmatprep.subr.mxu0 %v5380_v25  ;;  %5972 = vmatprep.mubr.f32.mxu1 %v7499_v44 }
 0xb38   : > { %v5381_v38 = vsel %vm4522_vm8, %v5362_v21, %v5364_v8  ;;  %v5382_v16 = vsel %vm4522_vm8, %v5364_v8, %v5366_v37 }
 0xb39   : > { %5912 = vmatprep.subr.mxu1 %v5382_v16 }
 0xb3a   : > { %5842 = vmatpush1.msra.mxu0 %v5379_v51  ;;  %5913 = vmatpush1.msra.mxu1 %v5381_v38 }
 0xb3b   : > { %6819 = vmatmul.mubr.msk.f32.vlgmr.msra.gmra.mrb[54].mxu0 %vm564_vm4, %v9198_v55  ;;  %6820 = vmatmul.mubr.msk.f32.vlgmr.msra.gmra.mrb[54].mxu1 %vm564_vm4, %v9198_v55 }
 0xb3c   : > { %6039 = vmatprep.subr.mxu0 %v8757_v6  ;;  %6110 = vmatprep.subr.mxu1 %v8749_v31 }
 0xb3d   : > { %6040 = vmatpush1.msra.mxu0 %v8754_v58  ;;  %6111 = vmatpush1.msra.mxu1 %v8746_v47 }
 0xb3e   : > { %6103 = vmatprep.mubr.f32.mxu0 %v7499_v44  ;;  %6174 = vmatprep.mubr.f32.mxu1 %v7499_v44 }
 0xb3f   : > { %6823 = vmatmul.mubr.msk.f32.vlgmr.msra.gmra.mrb[56].mxu0 %vm2033_vm1, %v6821_v19  ;;  %6824 = vmatmul.mubr.msk.f32.vlgmr.msra.gmra.mrb[56].mxu1 %vm2033_vm1, %v6821_v19 }
 0xb40   : > { %6181 = vmatprep.subr.mxu0 %v8765_v39  ;;  %6252 = vmatprep.subr.mxu1 %v8775_v40 }
 0xb41   : > { %6182 = vmatpush1.msra.mxu0 %v8762_v54  ;;  %6253 = vmatpush1.msra.mxu1 %v8771_v52 }
 0xb42   : > { %6245 = vmatprep.mubr.f32.mxu0 %v7499_v44  ;;  %6316 = vmatprep.mubr.f32.mxu1 %v7499_v44 }
 0xb43   : > { %6825 = vmatmul.mubr.msk.f32.vlgmr.msra.gmra.mrb[58].mxu0 %vm2033_vm1, %v6821_v19  ;;  %6826 = vmatmul.mubr.msk.f32.vlgmr.msra.gmra.mrb[58].mxu1 %vm2033_vm1, %v6821_v19 }
 0xb44   : > { %6323 = vmatprep.subr.mxu0 %v8782_v61  ;;  %6394 = vmatprep.subr.mxu1 %v8789_v45 }
 0xb45   : > { %6324 = vmatpush1.msra.mxu0 %v8778_v13  ;;  %6395 = vmatpush1.msra.mxu1 %v8786_v4  ;;  %v9312_v29 = vpop.permute.xlu1 %6033 }
 0xb46   : > { %6387 = vmatprep.mubr.f32.mxu0 %v7499_v44  ;;  %6458 = vmatprep.mubr.f32.mxu1 %v7499_v44 }
 0xb47   : > { %6827 = vmatmul.mubr.msk.f32.vlgmr.msra.gmra.mrb[60].mxu0 %vm2033_vm1, %v6821_v19  ;;  %6828 = vmatmul.mubr.msk.f32.vlgmr.msra.gmra.mrb[60].mxu1 %vm2033_vm1, %v6821_v19 }
 0xb48   : > { %6465 = vmatprep.subr.mxu0 %v8802_v10  ;;  %6536 = vmatprep.subr.mxu1 %v8805_v26  ;;  %v9298_v4 = vpop.permute.xlu0 %5405 }
 0xb49   : > { %6466 = vmatpush1.msra.mxu0 %v8796_v3  ;;  %6537 = vmatpush1.msra.mxu1 %v8799_v59 }
 0xb4a   : > { %6529 = vmatprep.mubr.f32.mxu0 %v7499_v44  ;;  %6600 = vmatprep.mubr.f32.mxu1 %v7499_v44 }
 0xb4b   : > { %6829 = vmatmul.mubr.msk.f32.vlgmr.msra.gmra.mrb[62].mxu0 %vm2033_vm1, %v6821_v19  ;;  %6830 = vmatmul.mubr.msk.f32.vlgmr.msra.gmra.mrb[62].mxu1 %vm2033_vm1, %v6821_v19 }
 0xbea   : > { %v5548_v47 = vpop.f32.mrb[48].mxu1 }
 0xbeb   : > { %v5550_v31 = vpop.f32.mrb[49].mxu1  ;;  %v5549_v45 = vadd.f32 %v5548_v47, %v9298_v4 }
 0xbec   : > { %v5551_v44 = vadd.f32 %v5550_v31, %v9298_v4 }
 0xbed   : > { %vm5981_vm4 = vcmp.gt.f32.partialorder %v5549_v45, 0.0  ;;  %v5997_v48 = vmul.f32 0.01, %v5549_v45 }
 0xbee   : > { %vm5982_vm1 = vcmp.gt.f32.partialorder %v5551_v44, 0.0  ;;  %v5998_v56 = vmul.f32 0.01, %v5551_v44 }
 0xbef   : > { %v6013_v33 = vsel %vm5981_vm4, %v5549_v45, %v5997_v48 }
 0xbf0   : > { %v6014_v15 = vsel %vm5982_vm1, %v5551_v44, %v5998_v56 }
 0xbf1   : > { %v5477_v58 = vpop.f32.mrb[48].mxu0 }
 0xbf2   : > { %v5479_v6 = vpop.f32.mrb[49].mxu0  ;;  %v5478_v59 = vadd.f32 %v5477_v58, %v9298_v4 }
 0xbf3   : > { %v5480_v26 = vadd.f32 %v5479_v6, %v9298_v4 }
 0xbf4   : > { %v5995_v63 = vmul.f32 0.01, %v5478_v59  ;;  %vm5979_vm13 = vcmp.gt.f32.partialorder %v5478_v59, 0.0 }
 0xbf5   : > { %vm5980_vm8 = vcmp.gt.f32.partialorder %v5480_v26, 0.0  ;;  %v5996_v49 = vmul.f32 0.01, %v5480_v26 }
 0xbf6   : > { %v6011_v22 = vsel %vm5979_vm13, %v5478_v59, %v5995_v63 }
 0xbf7   : > { %v5619_v54 = vpop.f32.mrb[50].mxu0  ;;  %v6012_v57 = vsel %vm5980_vm8, %v5480_v26, %v5996_v49 }
 0xbf8   : > { %v5621_v39 = vpop.f32.mrb[51].mxu0  ;;  %v5620_v55 = vadd.f32 %v5619_v54, %v9298_v4 }
 0xbf9   : > { %v5622_v41 = vadd.f32 %v5621_v39, %v9298_v4 }
 0xbfa   : > { %v5999_v62 = vmul.f32 0.01, %v5620_v55  ;;  %vm5983_vm14 = vcmp.gt.f32.partialorder %v5620_v55, 0.0 }
 0xbfb   : > { %vm5984_vm15 = vcmp.gt.f32.partialorder %v5622_v41, 0.0  ;;  %v6000_v9 = vmul.f32 0.01, %v5622_v41 }
 0xbfc   : > { %v6015_v53 = vsel %vm5983_vm14, %v5620_v55, %v5999_v62 }
 0xbfd   : > { %v6016_v50 = vsel %vm5984_vm15, %v5622_v41, %v6000_v9 }
 0xbfe   : > { %v5690_v52 = vpop.f32.mrb[50].mxu1 }
 0xbff   : > { %v5692_v40 = vpop.f32.mrb[51].mxu1  ;;  %v5691_v43 = vadd.f32 %v5690_v52, %v9298_v4 }
 0xc00   : > { %v5693_v24 = vadd.f32 %v5692_v40, %v9298_v4 }
 0xc01   : > { %v6001_v14 = vmul.f32 0.01, %v5691_v43  ;;  %vm5985_vm0 = vcmp.gt.f32.partialorder %v5691_v43, 0.0 }
 0xc02   : > { %v5761_v13 = vpop.f32.mrb[52].mxu0  ;;  %v6002_v28 = vmul.f32 0.01, %v5693_v24  ;;  %vm5986_vm5 = vcmp.gt.f32.partialorder %v5693_v24, 0.0 }
 0xc03   : > { %v5763_v61 = vpop.f32.mrb[53].mxu0  ;;  %v5762_v34 = vadd.f32 %v5761_v13, %v9298_v4  ;;  %v6017_v17 = vsel %vm5985_vm0, %v5691_v43, %v6001_v14 }
 0xc04   : > { %v5764_v1 = vadd.f32 %v5763_v61, %v9298_v4  ;;  %v6018_v5 = vsel %vm5986_vm5, %v5693_v24, %v6002_v28 }
 0xc05   : > { %v6003_v46 = vmul.f32 0.01, %v5762_v34  ;;  %vm5987_vm6 = vcmp.gt.f32.partialorder %v5762_v34, 0.0 }
 0xc06   : > { %vm5988_vm3 = vcmp.gt.f32.partialorder %v5764_v1, 0.0  ;;  %v6004_v27 = vmul.f32 0.01, %v5764_v1 }
 0xc07   : > { %v5832_v3 = vpop.f32.mrb[52].mxu1  ;;  %v6019_v0 = vsel %vm5987_vm6, %v5762_v34, %v6003_v46 }
 0xc08   : > { %v5834_v10 = vpop.f32.mrb[53].mxu1  ;;  %v5833_v11 = vadd.f32 %v5832_v3, %v9298_v4  ;;  %v6020_v61 = vsel %vm5988_vm3, %v5764_v1, %v6004_v27 }
 0xc09   : > { %v5835_v60 = vadd.f32 %v5834_v10, %v9298_v4 }
 0xc0a   : > { %vm5989_vm12 = vcmp.gt.f32.partialorder %v5833_v11, 0.0  ;;  %v6005_v30 = vmul.f32 0.01, %v5833_v11 }
 0xc0b   : > { %vm5990_vm7 = vcmp.gt.f32.partialorder %v5835_v60, 0.0  ;;  %v6006_v37 = vmul.f32 0.01, %v5835_v60 }
 0xc0c   : > { %v6021_v41 = vsel %vm5989_vm12, %v5833_v11, %v6005_v30 }
 0xc0d   : > { %v6022_v43 = vsel %vm5990_vm7, %v5835_v60, %v6006_v37 }
 0xc0e   : > { %v5903_v32 = vpop.f32.mrb[54].mxu0  ;;  %v5974_v35 = vpop.f32.mrb[54].mxu1 }
 0xc0f   : > { %v5905_v23 = vpop.f32.mrb[55].mxu0  ;;  %v5976_v36 = vpop.f32.mrb[55].mxu1  ;;  %v9328_v8 = vadd.f32 %v5903_v32, %v9298_v4  ;;  %v5975_v52 = vadd.f32 %v5974_v35, %v9298_v4 }
 0xc10   : > { %v5906_v45 = vadd.f32 %v5905_v23, %v9298_v4  ;;  %v5977_v3 = vadd.f32 %v5976_v36, %v9298_v4 }
 0xc11   : > { %vm5991_vm2 = vcmp.gt.f32.partialorder %v9328_v8, 0.0  ;;  %v6007_v4 = vmul.f32 0.01, %v9328_v8  ;;  %vm5993_vm9 = vcmp.gt.f32.partialorder %v5975_v52, 0.0  ;;  %v6009_v49 = vmul.f32 0.01, %v5975_v52 }
 0xc12   : > { %v6105_v12 = vpop.f32.mrb[56].mxu0  ;;  %v6176_v21 = vpop.f32.mrb[56].mxu1  ;;  %v6008_v32 = vmul.f32 0.01, %v5906_v45  ;;  %v6010_v35 = vmul.f32 0.01, %v5977_v3 }
 0xc13   : > { %v6106_v20 = vadd.f32 %v6105_v12, %v9312_v29  ;;  %v6177_v18 = vadd.f32 %v6176_v21, %v9312_v29  ;;  %v6107_v7 = vpop.f32.mrb[57].mxu0  ;;  %v6178_v2 = vpop.f32.mrb[57].mxu1  ;;  %vm5992_vm10 = vcmp.gt.f32.partialorder %v5906_v45, 0.0  ;;  %vm5994_vm11 = vcmp.gt.f32.partialorder %v5977_v3, 0.0 }
 0xc14   : > { %v6108_v42 = vadd.f32 %v6107_v7, %v9312_v29  ;;  %v6179_v25 = vadd.f32 %v6178_v2, %v9312_v29  ;;  %v6024_v21 = vsel %vm5992_vm10, %v5906_v45, %v6008_v32 }
 0xc15   : > { %v6607_v38 = vadd.f32 %v6106_v20, %v6011_v22  ;;  %v6609_v16 = vadd.f32 %v6177_v18, %v6013_v33  ;;  %v6023_v22 = vsel %vm5991_vm2, %v9328_v8, %v6007_v4 }
 0xc16   : > { %v6247_v51 = vpop.f32.mrb[58].mxu0  ;;  %v6318_v19 = vpop.f32.mrb[58].mxu1  ;;  %v6608_v47 = vadd.f32 %v6108_v42, %v6012_v57  ;;  %v6610_v31 = vadd.f32 %v6179_v25, %v6014_v15  ;;  %v6025_v57 = vsel %vm5993_vm9, %v5975_v52, %v6009_v49 }
 0xc17   : > { %v6248_v58 = vadd.f32 %v6247_v51, %v9312_v29  ;;  %v6319_v6 = vadd.f32 %v6318_v19, %v9312_v29  ;;  %v6249_v54 = vpop.f32.mrb[59].mxu0  ;;  %v6320_v39 = vpop.f32.mrb[59].mxu1  ;;  %6623 = vst [vmem:[%s7715_s7] sm:$0xff] %v6607_v38  ;;  %6625 = vst [vmem:[%s7715_s7 + $0x10] sm:$0xff] %v6609_v16 }
 0xc18   : > { %v6250_v40 = vadd.f32 %v6249_v54, %v9312_v29  ;;  %v6321_v13 = vadd.f32 %v6320_v39, %v9312_v29  ;;  %6624 = vst [vmem:[%s7715_s7 + $0x8] sm:$0xff] %v6608_v47  ;;  %6626 = vst [vmem:[%s7715_s7 + $0x18] sm:$0xff] %v6610_v31 }
 0xc19   : > { %v6611_v44 = vadd.f32 %v6248_v58, %v6015_v53  ;;  %v6613_v59 = vadd.f32 %v6319_v6, %v6017_v17  ;;  %v6026_v17 = vsel %vm5994_vm11, %v5977_v3, %v6010_v35 }
 0xc1a   : > { %v6612_v10 = vadd.f32 %v6250_v40, %v6016_v50  ;;  %v6614_v26 = vadd.f32 %v6321_v13, %v6018_v5  ;;  %v6389_v55 = vpop.f32.mrb[60].mxu0  ;;  %v6460_v48 = vpop.f32.mrb[60].mxu1 }
 0xc1b   : > { %6627 = vst [vmem:[%s7715_s7 + $0x20] sm:$0xff] %v6611_v44  ;;  %6629 = vst [vmem:[%s7715_s7 + $0x30] sm:$0xff] %v6613_v59  ;;  %v6390_v24 = vadd.f32 %v6389_v55, %v9312_v29  ;;  %v6461_v56 = vadd.f32 %v6460_v48, %v9312_v29  ;;  %v6391_v63 = vpop.f32.mrb[61].mxu0  ;;  %v6462_v34 = vpop.f32.mrb[61].mxu1 }
 0xc1c   : > { %6628 = vst [vmem:[%s7715_s7 + $0x28] sm:$0xff] %v6612_v10  ;;  %6630 = vst [vmem:[%s7715_s7 + $0x38] sm:$0xff] %v6614_v26  ;;  %v6392_v62 = vadd.f32 %v6391_v63, %v9312_v29  ;;  %v6463_v9 = vadd.f32 %v6462_v34, %v9312_v29 }
 0xc1d   : > { %v6615_v14 = vadd.f32 %v6390_v24, %v6019_v0  ;;  %v6617_v28 = vadd.f32 %v6461_v56, %v6021_v41 }
 0xc1e   : > { %v6616_v1 = vadd.f32 %v6392_v62, %v6020_v61  ;;  %v6618_v23 = vadd.f32 %v6463_v9, %v6022_v43  ;;  %v6531_v36 = vpop.f32.mrb[62].mxu0  ;;  %v6602_v46 = vpop.f32.mrb[62].mxu1 }
 0xc1f   : > { %6631 = vst [vmem:[%s7715_s7 + $0x40] sm:$0xff] %v6615_v14  ;;  %6633 = vst [vmem:[%s7715_s7 + $0x50] sm:$0xff] %v6617_v28  ;;  %v6532_v11 = vadd.f32 %v6531_v36, %v9312_v29  ;;  %v6603_v60 = vadd.f32 %v6602_v46, %v9312_v29  ;;  %v6533_v33 = vpop.f32.mrb[63].mxu0  ;;  %v6604_v15 = vpop.f32.mrb[63].mxu1 }
 0xc20   : > { %6632 = vst [vmem:[%s7715_s7 + $0x48] sm:$0xff] %v6616_v1  ;;  %6634 = vst [vmem:[%s7715_s7 + $0x58] sm:$0xff] %v6618_v23  ;;  %v6534_v53 = vadd.f32 %v6533_v33, %v9312_v29  ;;  %v6605_v50 = vadd.f32 %v6604_v15, %v9312_v29 }
 0xc21   : > { %v6619_v27 = vadd.f32 %v6532_v11, %v6023_v22  ;;  %v6621_v12 = vadd.f32 %v6603_v60, %v6025_v57 }
 0xc22   : > { %v6620_v5 = vadd.f32 %v6534_v53, %v6024_v21  ;;  %v6622_v20 = vadd.f32 %v6605_v50, %v6026_v17 }
 0xc23   : > { %6635 = vst [vmem:[%s7715_s7 + $0x60] sm:$0xff] %v6619_v27  ;;  %6637 = vst [vmem:[%s7715_s7 + $0x70] sm:$0xff] %v6621_v12 }
 0xc24   : > { %6636 = vst [vmem:[%s7715_s7 + $0x68] sm:$0xff] %v6620_v5  ;;  %6638 = vst [vmem:[%s7715_s7 + $0x78] sm:$0xff] %v6622_v20 }
 0xc25   : > { %7407 = shalt.err (!%p7404_p7)
}
 0xc26   : > { %s7408_s11 = scalar_lea.hbm %s9377_s9, 2048  ;;  %s7412_s18 = scalar_lea.hbm %s9459_s23, 8192 }
 0xc27   : > { %p7409_p10 = scmp.ne.s32.totalorder %s9377_s9, %s7408_s11  ;;  %p7413_p2 = scmp.lt.u32.totalorder %s9377_s9, %s9459_s23 }
 0xc28   : > { %p7414_p3 = scmp.lt.u32.totalorder %s7412_s18, %s7408_s11  ;;  %p7416_p9 = scmp.lt.u32.totalorder %s7408_s11, %s9377_s9 }
 0xc29   : > { %p7410_p11 = pnand %p7409_p10, %p9460_p12 }
 0xc2a   : > { %p7415_p8 = por %p7414_p3, %p7413_p2 }
 0xc2b   : > { %p7411_p1 = pneg %p7410_p11 }
 0xc2c   : > { %p7417_p0 = por %p7416_p9, %p7415_p8 }
 0xc2e   : > { %p7418_p6 = pnand %p7417_p0, %p7411_p1 }
 0xc30   : > { %7421 = shalt.err (!%p7418_p6)
}
 0xc31   : > { %7031 = dma.vmem_to_hbm [thread:$0]  (%p9460_p12), %s9379_s19, 2048, %s9377_s9, %s6640_s13  }
 0xc32 PF: > { %s9461_s12 = sld [smem:[#allocation14_spill]]  ;;  %p7042_p13 = scmp.ge.s32.totalorder %s7492_s8, 2 }
 0xc33   : > { %p9462_p4 = scmp.ne.s32.totalorder %s9455_s20, 0 }
 0xc35   : > { %p7038_p5 = pnand %p7042_p13, %p9462_p4 }
 0xc38   : > { %s6668_s15 = sand.u32 1, %s9461_s12  }
 0xc39   : > { %s6669_s21 = scalar_lea.sflag [#allocation10], %s6668_s15 }
 0xc3a   : > { %7459 = dma.done.wait (!%p7038_p5), %s6669_s21, 2048  }
 0xc3b   : > { %7461 = vsyncadd (!%p7038_p5), %s6669_s21, 4294965248  ;;  %s23_s8 = sadd.s32 1, %s7492_s8   ;;  %s9463_s17 = sld [smem:[#allocation15_spill]] }
 0xc3c   : > { %p20_p7 = scmp.ge.s32.totalorder %s23_s8, 6   ;;  %s9464_s19 = sld [smem:[#allocation16_spill]] }
 0xc3d   : > { %s9465_s24 = smov %s7468_s25  ;;  %s9466_s25 = smov %s7472_s26 }
 0xc3e   : > { %s9467_s26 = smov %s7626_s22  ;;  %s9468_s27 = smov %s7484_s29 }
 0xc3f   : > { %s9469_s28 = smov %s7488_s30  ;;  %22 = sbr.rel (!%p20_p7) target bundleno = 9 (0x9), region = 115 }
 0xc41   : > { %s9470_s29 = smov %s9463_s17 }
 0xc42   : > { %s9471_s30 = smov %s9464_s19 }
 0xc46   :  { %6674 = vsyncpa [#allocation9], 1 }
 0xc47   :  { %6676 = vsyncpa [#allocation9 + $0x1], 1 }
 0xc48   :  { %6677 = vsyncpa [#allocation10], 1 }
 0xc49   :  { %6679 = vsyncpa [#allocation10 + $0x1], 1 }

</bundles_post_ra>
